<compile_context>
chip_gen: v6e
topology: v6e:2x2x1
jax: 0.10.0
libtpu: 0.0.40
codegen_flags: <defaults>
</compile_context>

<pallas_src>
import math

import jax
import jax.numpy as jnp
from jax.experimental import pallas as pl
from jax.experimental.pallas import tpu as pltpu

# ---------------------------------------------------------------------------
# Small synthetic configuration
# StreamDecoder(odim, attention_dim, self_attention_heads=4,
#               src_attention_heads=1, linear_units, num_blocks)
# ---------------------------------------------------------------------------
ODIM = 16            # vocabulary size / output dim
D = 32               # attention_dim
H_SA = 4             # self_attention_heads
DK_SA = D // H_SA    # per-head dim for self attention
H_CA = 1             # src_attention_heads (spec default)
FFN = 64             # linear_units
NUM_BLOCKS = 2       # num_blocks
B = 2                # batch
T_OUT = 8            # maxlen_out
T_IN = 16            # maxlen_in
BT_OUT = B * T_OUT
BT_IN = B * T_IN
EPS = 1e-12          # espnet LayerNorm eps
MASK_BIAS = -1e9     # bounded masking value (avoids -inf/NaN propagation)
EMB_SCALE = math.sqrt(D)
SA_SCALE = 1.0 / math.sqrt(DK_SA)
CA_SCALE = 1.0 / math.sqrt(D // H_CA)
LANES = 128

# ----- layer weight slab: all D-input weight matrices lane-concatenated -----
C_SAQKV = 0            # (D, 3D) self-attn fused QKV
C_SAO = 3 * D          # (D, D)  self-attn output proj
C_CAQ = 4 * D          # (D, D)  cross-attn Q
C_CAKV = 5 * D         # (D, 2D) cross-attn fused KV
C_CAO = 7 * D          # (D, D)  cross-attn output proj
C_W1 = 8 * D           # (D, FFN) feed-forward up
LW_COLS = 8 * D + FFN  # 320

# ----- layer vector slab: LayerNorm params + biases, one row each -----------
R_LN_G = 0    # rows 0..2 : ln gamma (self, src, ffn)
R_LN_B = 3    # rows 3..5 : ln beta
R_SAQKV_B = 6
R_SAO_B = 7
R_CAQ_B = 8
R_CAKV_B = 9
R_CAO_B = 10
R_B1 = 11
R_B2 = 12
LV_ROWS = 16          # padded
LV_COLS = 3 * D       # 96 (>= FFN=64)

# ----- head slab (non per-layer params), width = 128 lanes ------------------
HR_EMB = 0                      # ODIM rows : embedding table
HR_PE = HR_EMB + ODIM           # BT_OUT rows : positional encoding (pre-tiled)
HR_AN_G = HR_PE + BT_OUT        # after_norm gamma
HR_AN_B = HR_AN_G + 1           # after_norm beta
HR_OUTW = HR_AN_B + 1           # D rows : output proj (lane-padded to 128)
HR_OUTB = HR_OUTW + D           # output bias (lane-padded)
HEAD_ROWS = ((HR_OUTB + 1 + 7) // 8) * 8


# ---------------------------------------------------------------------------
# In-kernel helpers (traced inside the fused Pallas kernel)
# ---------------------------------------------------------------------------
def _layer_norm(x, g, b):
    m = jnp.mean(x, axis=-1, keepdims=True)
    v = jnp.mean(jnp.square(x - m), axis=-1, keepdims=True)
    return (x - m) * jax.lax.rsqrt(v + EPS) * g + b


def _masked_softmax(s, keep):
    s = jnp.where(keep, s, MASK_BIAS)
    s = s - jnp.max(s, axis=-1, keepdims=True)
    e = jnp.exp(s)
    attn = e * pl.reciprocal(jnp.sum(e, axis=-1, keepdims=True), approx=True)
    return jnp.where(keep, attn, 0.0)


def _qkt(q, k):
    return jax.lax.dot_general(q, k, (((1,), (1,)), ((), ())),
                               preferred_element_type=jnp.float32)


# ---------------------------------------------------------------------------
# Fused Pallas kernel: embed + PE + all layers + after_norm + output_layer
# ---------------------------------------------------------------------------
def fused_decoder_kernel(ids_ref, masks_ref, mem_ref,
                         head_ref, lw_ref, lw2_ref, lv_ref,
                         o_ref, ctx_ref):
    # ---- embedding lookup as one-hot matmul (MXU) + positional encoding ----
    ids = ids_ref[...]                                              # (BT_OUT, 1)
    onehot = (ids == jax.lax.broadcasted_iota(jnp.int32, (BT_OUT, ODIM), 1)
              ).astype(jnp.float32)
    emb = head_ref[HR_EMB:HR_EMB + ODIM, 0:D]
    pe = head_ref[HR_PE:HR_PE + BT_OUT, 0:D]                        # pre-tiled
    x = jnp.dot(onehot, emb, preferred_element_type=jnp.float32) * EMB_SCALE + pe

    mem = mem_ref[...]                                              # (BT_IN, D)

    # Hoist loop-invariant per-batch mask comparisons out of the layer loops.
    masks = masks_ref[...]                                          # (BT_OUT, T_OUT+T_IN)
    sa_keeps, ca_keeps = [], []
    for b in range(B):
        r0 = b * T_OUT
        sa_keeps.append(masks[r0:r0 + T_OUT, 0:T_OUT] > 0.0)
        ca_keeps.append(masks[r0:r0 + T_OUT, T_OUT:T_OUT + T_IN] > 0.0)

    for l in range(NUM_BLOCKS):                                     # static unroll
        wl = lw_ref[l]                                              # (D, 320)
        w2 = lw2_ref[l]                                             # (FFN, D)
        vec = lv_ref[l]                                             # (16, 96)

        # ---------- masked multi-head self-attention sublayer ----------
        residual = x
        xn = _layer_norm(x, vec[R_LN_G:R_LN_G + 1, 0:D],
                         vec[R_LN_B:R_LN_B + 1, 0:D])
        qkv = (jnp.dot(xn, wl[:, C_SAQKV:C_SAQKV + 3 * D],
                       preferred_element_type=jnp.float32)
               + vec[R_SAQKV_B:R_SAQKV_B + 1, 0:3 * D])
        sa_o_w = wl[:, C_SAO:C_SAO + D]
        for b in range(B):                                          # per-batch scores
            r0 = b * T_OUT
            qkv_b = qkv[r0:r0 + T_OUT, :]
            acc = None
            for h in range(H_SA):                                   # per-head accumulate
                lo = h * DK_SA
                qh = qkv_b[:, lo:lo + DK_SA]
                kh = qkv_b[:, D + lo:D + lo + DK_SA]
                vh = qkv_b[:, 2 * D + lo:2 * D + lo + DK_SA]
                s = _qkt(qh, kh) * SA_SCALE                         # (T_OUT, T_OUT)
                attn = _masked_softmax(s, sa_keeps[b])
                ctx_h = jnp.dot(attn, vh, preferred_element_type=jnp.float32)
                part = jnp.dot(ctx_h, sa_o_w[lo:lo + DK_SA, :],
                               preferred_element_type=jnp.float32)
                acc = part if acc is None else acc + part
            ctx_ref[r0:r0 + T_OUT, :] = acc                         # sublane-aligned
        x = residual + ctx_ref[...] + vec[R_SAO_B:R_SAO_B + 1, 0:D]

        # ---------- source (encoder-decoder) attention, H_CA = 1 ----------
        residual = x
        xn = _layer_norm(x, vec[R_LN_G + 1:R_LN_G + 2, 0:D],
                         vec[R_LN_B + 1:R_LN_B + 2, 0:D])
        q = (jnp.dot(xn, wl[:, C_CAQ:C_CAQ + D],
                     preferred_element_type=jnp.float32)
             + vec[R_CAQ_B:R_CAQ_B + 1, 0:D])
        kv = (jnp.dot(mem, wl[:, C_CAKV:C_CAKV + 2 * D],
                      preferred_element_type=jnp.float32)
              + vec[R_CAKV_B:R_CAKV_B + 1, 0:2 * D])
        for b in range(B):
            r0 = b * T_OUT
            m0 = b * T_IN
            q_b = q[r0:r0 + T_OUT, :]
            k_b = kv[m0:m0 + T_IN, 0:D]
            v_b = kv[m0:m0 + T_IN, D:2 * D]
            s = _qkt(q_b, k_b) * CA_SCALE                           # (T_OUT, T_IN)
            attn = _masked_softmax(s, ca_keeps[b])
            ctx_ref[r0:r0 + T_OUT, :] = jnp.dot(attn, v_b,
                                                preferred_element_type=jnp.float32)
        x = (residual
             + jnp.dot(ctx_ref[...], wl[:, C_CAO:C_CAO + D],
                       preferred_element_type=jnp.float32)
             + vec[R_CAO_B:R_CAO_B + 1, 0:D])

        # ---------- position-wise feed-forward sublayer ----------
        residual = x
        xn = _layer_norm(x, vec[R_LN_G + 2:R_LN_G + 3, 0:D],
                         vec[R_LN_B + 2:R_LN_B + 3, 0:D])
        h1 = jnp.maximum(jnp.dot(xn, wl[:, C_W1:C_W1 + FFN],
                                 preferred_element_type=jnp.float32)
                         + vec[R_B1:R_B1 + 1, 0:FFN], 0.0)
        x = (residual
             + jnp.dot(h1, w2, preferred_element_type=jnp.float32)
             + vec[R_B2:R_B2 + 1, 0:D])

    # ---------- after_norm + output_layer (lane-dense 128-wide store) ------
    xn = _layer_norm(x, head_ref[HR_AN_G:HR_AN_G + 1, 0:D],
                     head_ref[HR_AN_B:HR_AN_B + 1, 0:D])
    o_ref[...] = (jnp.dot(xn, head_ref[HR_OUTW:HR_OUTW + D, :],
                          preferred_element_type=jnp.float32)
                  + head_ref[HR_OUTB:HR_OUTB + 1, :])


# ---------------------------------------------------------------------------
# Parameter packing (done once, host-side): 26 tiny operands -> 4 slabs
# ---------------------------------------------------------------------------
def pack_params(p):
    head = jnp.zeros((HEAD_ROWS, LANES), jnp.float32)
    head = head.at[HR_EMB:HR_EMB + ODIM, :D].set(p["emb"])
    head = head.at[HR_PE:HR_PE + BT_OUT, :D].set(jnp.tile(p["pe"], (B, 1)))
    head = head.at[HR_AN_G, :D].set(p["an_g"][0])
    head = head.at[HR_AN_B, :D].set(p["an_b"][0])
    head = head.at[HR_OUTW:HR_OUTW + D, :ODIM].set(p["out_w"])   # lane-padded
    head = head.at[HR_OUTB, :ODIM].set(p["out_b"][0])

    lw = jnp.zeros((NUM_BLOCKS, D, LW_COLS), jnp.float32)
    lw = lw.at[:, :, C_SAQKV:C_SAQKV + 3 * D].set(p["sa_qkv_w"])
    lw = lw.at[:, :, C_SAO:C_SAO + D].set(p["sa_o_w"])
    lw = lw.at[:, :, C_CAQ:C_CAQ + D].set(p["ca_q_w"])
    lw = lw.at[:, :, C_CAKV:C_CAKV + 2 * D].set(p["ca_kv_w"])
    lw = lw.at[:, :, C_CAO:C_CAO + D].set(p["ca_o_w"])
    lw = lw.at[:, :, C_W1:C_W1 + FFN].set(p["w1"])

    lw2 = p["w2"]                                                 # (L, FFN, D)

    lv = jnp.zeros((NUM_BLOCKS, LV_ROWS, LV_COLS), jnp.float32)
    lv = lv.at[:, R_LN_G:R_LN_G + 3, :D].set(p["ln_g"])
    lv = lv.at[:, R_LN_B:R_LN_B + 3, :D].set(p["ln_b"])
    lv = lv.at[:, R_SAQKV_B, :3 * D].set(p["sa_qkv_b"][:, 0, :])
    lv = lv.at[:, R_SAO_B, :D].set(p["sa_o_b"][:, 0, :])
    lv = lv.at[:, R_CAQ_B, :D].set(p["ca_q_b"][:, 0, :])
    lv = lv.at[:, R_CAKV_B, :2 * D].set(p["ca_kv_b"][:, 0, :])
    lv = lv.at[:, R_CAO_B, :D].set(p["ca_o_b"][:, 0, :])
    lv = lv.at[:, R_B1, :FFN].set(p["b1"][:, 0, :])
    lv = lv.at[:, R_B2, :D].set(p["b2"][:, 0, :])

    return {"head": head, "lw": lw, "lw2": lw2, "lv": lv}


# ---------------------------------------------------------------------------
# Wrapper (single gridless pallas_call: everything resident in VMEM)
# ---------------------------------------------------------------------------
def decoder_forward(packed, tgt, tgt_mask, memory, memory_mask):
    """Full Decoder.forward (eval mode, tags=None). Returns (scores, tgt_mask)."""
    bn, t = tgt.shape
    s_in = memory.shape[1]
    ids = tgt.reshape(bn * t, 1).astype(jnp.int32)
    mem_flat = memory.reshape(bn * s_in, D)

    # Per-batch masks packed into one operand: (B*T_OUT, T_OUT + T_IN).
    sa = tgt_mask.astype(jnp.float32)                             # (B, T, T)
    ca = jnp.broadcast_to(memory_mask.astype(jnp.float32), (bn, t, s_in))
    masks = jnp.concatenate([sa, ca], axis=-1).reshape(bn * t, t + s_in)

    out = pl.pallas_call(
        fused_decoder_kernel,
        out_shape=jax.ShapeDtypeStruct((bn * t, LANES), jnp.float32),
        scratch_shapes=[pltpu.VMEM((bn * t, D), jnp.float32)],
    )(ids, masks, mem_flat,
      packed["head"], packed["lw"], packed["lw2"], packed["lv"])

    return out[:, :ODIM].reshape(bn, t, ODIM), tgt_mask


# ---------------------------------------------------------------------------
# Deterministic synthetic parameters (stacked over the layer axis)
# ---------------------------------------------------------------------------
def positional_encoding(maxlen, d):
    pos = jnp.arange(maxlen, dtype=jnp.float32)[:, None]
    div = jnp.exp(jnp.arange(0, d, 2, dtype=jnp.float32) * (-math.log(10000.0) / d))
    pe = jnp.zeros((maxlen, d), jnp.float32)
    pe = pe.at[:, 0::2].set(jnp.sin(pos * div))
    pe = pe.at[:, 1::2].set(jnp.cos(pos * div))
    return pe


def init_params(key):
    ks = jax.random.split(key, 21)

    def rnd(k, shape, s=0.1):
        return s * jax.random.normal(k, shape, jnp.float32)

    return {
        "emb": rnd(ks[0], (ODIM, D)),
        "pe": positional_encoding(T_OUT, D),
        "an_g": 1.0 + rnd(ks[1], (1, D)),
        "an_b": rnd(ks[2], (1, D), 0.05),
        "out_w": rnd(ks[3], (D, ODIM)),
        "out_b": rnd(ks[4], (1, ODIM), 0.05),
        "ln_g": 1.0 + rnd(ks[5], (NUM_BLOCKS, 3, D)),
        "ln_b": rnd(ks[6], (NUM_BLOCKS, 3, D), 0.05),
        "sa_qkv_w": rnd(ks[7], (NUM_BLOCKS, D, 3 * D)),
        "sa_qkv_b": rnd(ks[8], (NUM_BLOCKS, 1, 3 * D), 0.05),
        "sa_o_w": rnd(ks[9], (NUM_BLOCKS, D, D)),
        "sa_o_b": rnd(ks[10], (NUM_BLOCKS, 1, D), 0.05),
        "ca_q_w": rnd(ks[11], (NUM_BLOCKS, D, D)),
        "ca_q_b": rnd(ks[12], (NUM_BLOCKS, 1, D), 0.05),
        "ca_kv_w": rnd(ks[13], (NUM_BLOCKS, D, 2 * D)),
        "ca_kv_b": rnd(ks[14], (NUM_BLOCKS, 1, 2 * D), 0.05),
        "ca_o_w": rnd(ks[15], (NUM_BLOCKS, D, D)),
        "ca_o_b": rnd(ks[16], (NUM_BLOCKS, 1, D), 0.05),
        "w1": rnd(ks[17], (NUM_BLOCKS, D, FFN)),
        "b1": rnd(ks[18], (NUM_BLOCKS, 1, FFN), 0.05),
        "w2": rnd(ks[19], (NUM_BLOCKS, FFN, D)),
        "b2": rnd(ks[20], (NUM_BLOCKS, 1, D), 0.05),
    }


# ---------------------------------------------------------------------------
# Pure-JAX reference (same math, batched) for a correctness check
# ---------------------------------------------------------------------------
def _ref_ln(x, g, b):
    m = x.mean(-1, keepdims=True)
    v = ((x - m) ** 2).mean(-1, keepdims=True)
    return (x - m) / jnp.sqrt(v + EPS) * g + b


def _ref_attend(q, k, v, mask, heads):
    bn, tq, _ = q.shape
    tk = k.shape[1]
    dk = D // heads
    qh = q.reshape(bn, tq, heads, dk).transpose(0, 2, 1, 3)
    kh = k.reshape(bn, tk, heads, dk).transpose(0, 2, 1, 3)
    vh = v.reshape(bn, tk, heads, dk).transpose(0, 2, 1, 3)
    s = jnp.einsum("bhqd,bhkd->bhqk", qh, kh) / math.sqrt(dk)
    keep = mask[:, None] > 0
    s = jnp.where(keep, s, MASK_BIAS)
    attn = jax.nn.softmax(s, axis=-1)
    attn = jnp.where(keep, attn, 0.0)
    return jnp.einsum("bhqk,bhkd->bhqd", attn, vh).transpose(0, 2, 1, 3).reshape(bn, tq, D)


def ref_forward(params, tgt, tgt_mask, memory, memory_mask):
    x = params["emb"][tgt] * EMB_SCALE + params["pe"][None, : tgt.shape[1], :]
    for l in range(NUM_BLOCKS):
        # self attention
        r = x
        xn = _ref_ln(x, params["ln_g"][l, 0], params["ln_b"][l, 0])
        qkv = xn @ params["sa_qkv_w"][l] + params["sa_qkv_b"][l, 0]
        q, k, v = qkv[..., :D], qkv[..., D:2 * D], qkv[..., 2 * D:]
        ctx = _ref_attend(q, k, v, tgt_mask, H_SA)
        x = r + ctx @ params["sa_o_w"][l] + params["sa_o_b"][l, 0]
        # source attention
        r = x
        xn = _ref_ln(x, params["ln_g"][l, 1], params["ln_b"][l, 1])
        q = xn @ params["ca_q_w"][l] + params["ca_q_b"][l, 0]
        kv = memory @ params["ca_kv_w"][l] + params["ca_kv_b"][l, 0]
        k, v = kv[..., :D], kv[..., D:]
        ctx = _ref_attend(q, k, v, memory_mask, H_CA)
        x = r + ctx @ params["ca_o_w"][l] + params["ca_o_b"][l, 0]
        # feed-forward
        r = x
        xn = _ref_ln(x, params["ln_g"][l, 2], params["ln_b"][l, 2])
        x = r + jnp.maximum(xn @ params["w1"][l] + params["b1"][l, 0], 0.0) \
            @ params["w2"][l] + params["b2"][l, 0]
    x = _ref_ln(x, params["an_g"], params["an_b"])
    return x @ params["out_w"] + params["out_b"]


# ---------------------------------------------------------------------------
if __name__ == "__main__":
    key = jax.random.PRNGKey(0)
    kp, kt, km = jax.random.split(key, 3)
    params = init_params(kp)
    packed = pack_params(params)      # one-time param packing (4 slabs)

    tgt = jax.random.randint(kt, (B, T_OUT), 0, ODIM, dtype=jnp.int32)
    tgt_mask = jnp.tile(jnp.tril(jnp.ones((T_OUT, T_OUT), jnp.float32))[None], (B, 1, 1))
    memory = jax.random.normal(km, (B, T_IN, D), jnp.float32)
    lens = jnp.array([T_IN, T_IN - 4])
    memory_mask = (jnp.arange(T_IN)[None, :] < lens[:, None]).astype(jnp.float32)[:, None, :]

    out, out_mask = decoder_forward(packed, tgt, tgt_mask, memory, memory_mask)
    out = jax.block_until_ready(out)

    ref = ref_forward(params, tgt, tgt_mask, memory, memory_mask)
    err = float(jnp.max(jnp.abs(out - ref)))
    assert out.shape == (B, T_OUT, ODIM), out.shape
    assert err < 1e-2, f"max abs err {err}"
    print("KERNEL_OK")
</pallas_src>

<mosaic_0001>
module attributes {stable_mosaic.version = 11 : i64} {
  func.func @fused_decoder_kernel(%arg0: memref<16x1xi32, #tpu.memory_space<vmem>>, %arg1: memref<16x24xf32, #tpu.memory_space<vmem>>, %arg2: memref<32x32xf32, #tpu.memory_space<vmem>>, %arg3: memref<72x128xf32, #tpu.memory_space<vmem>>, %arg4: memref<2x32x320xf32, #tpu.memory_space<vmem>>, %arg5: memref<2x64x32xf32, #tpu.memory_space<vmem>>, %arg6: memref<2x16x96xf32, #tpu.memory_space<vmem>>, %arg7: memref<16x128xf32, #tpu.memory_space<vmem>>, %arg8: memref<16x32xf32, #tpu.memory_space<vmem>>) attributes {dimension_semantics = [], scalar_prefetch = 0 : i64, scratch_operands = 1 : i64, tpu.core_type = #tpu.core_type<tc>} {
    %c0 = arith.constant 0 : index
    %c0_0 = arith.constant 0 : index
    %0 = vector.load %arg0[%c0, %c0_0] : memref<16x1xi32, #tpu.memory_space<vmem>>, vector<16x1xi32>
    %1 = tpu.iota {dimensions = array<i32: 1>} : vector<16x16xi32>
    %2 = vector.broadcast %0 : vector<16x1xi32> to vector<16x16xi32>
    %3 = arith.cmpi eq, %2, %1 : vector<16x16xi32>
    %4 = arith.extui %3 : vector<16x16xi1> to vector<16x16xi32>
    %5 = arith.sitofp %4 : vector<16x16xi32> to vector<16x16xf32>
    %c0_1 = arith.constant 0 : index
    %c0_2 = arith.constant 0 : index
    %6 = vector.load %arg3[%c0_1, %c0_2] : memref<72x128xf32, #tpu.memory_space<vmem>>, vector<16x32xf32>
    %c16 = arith.constant 16 : index
    %c0_3 = arith.constant 0 : index
    %7 = vector.load %arg3[%c16, %c0_3] : memref<72x128xf32, #tpu.memory_space<vmem>>, vector<16x32xf32>
    %cst = arith.constant dense<0.000000e+00> : vector<16x32xf32>
    %8 = tpu.matmul %5, %6, %cst {dimension_numbers = #tpu.dot_dimension_numbers<[1], [0], [0], [1], [0, 0, 1, 1], [], []>} : vector<16x16xf32>, vector<16x32xf32>, vector<16x32xf32> -> vector<16x32xf32>
    %cst_4 = arith.constant 5.65685415 : f32
    %9 = vector.broadcast %cst_4 : f32 to vector<16x32xf32>
    %10 = arith.mulf %8, %9 : vector<16x32xf32>
    %11 = arith.addf %10, %7 : vector<16x32xf32>
    %c0_5 = arith.constant 0 : index
    %c0_6 = arith.constant 0 : index
    %12 = vector.load %arg2[%c0_5, %c0_6] : memref<32x32xf32, #tpu.memory_space<vmem>>, vector<32x32xf32>
    %c0_7 = arith.constant 0 : index
    %c0_8 = arith.constant 0 : index
    %13 = vector.load %arg1[%c0_7, %c0_8] : memref<16x24xf32, #tpu.memory_space<vmem>>, vector<16x24xf32>
    %14 = vector.extract_strided_slice %13 {offsets = [0, 0], sizes = [8, 8], strides = [1, 1]} : vector<16x24xf32> to vector<8x8xf32>
    %cst_9 = arith.constant 0.000000e+00 : f32
    %15 = vector.broadcast %cst_9 : f32 to vector<8x8xf32>
    %16 = arith.cmpf ogt, %14, %15 : vector<8x8xf32>
    %17 = vector.extract_strided_slice %13 {offsets = [0, 8], sizes = [8, 16], strides = [1, 1]} : vector<16x24xf32> to vector<8x16xf32>
    %cst_10 = arith.constant 0.000000e+00 : f32
    %18 = vector.broadcast %cst_10 : f32 to vector<8x16xf32>
    %19 = arith.cmpf ogt, %17, %18 : vector<8x16xf32>
    %20 = vector.extract_strided_slice %13 {offsets = [8, 0], sizes = [8, 8], strides = [1, 1]} : vector<16x24xf32> to vector<8x8xf32>
    %cst_11 = arith.constant 0.000000e+00 : f32
    %21 = vector.broadcast %cst_11 : f32 to vector<8x8xf32>
    %22 = arith.cmpf ogt, %20, %21 : vector<8x8xf32>
    %23 = vector.extract_strided_slice %13 {offsets = [8, 8], sizes = [8, 16], strides = [1, 1]} : vector<16x24xf32> to vector<8x16xf32>
    %cst_12 = arith.constant 0.000000e+00 : f32
    %24 = vector.broadcast %cst_12 : f32 to vector<8x16xf32>
    %25 = arith.cmpf ogt, %23, %24 : vector<8x16xf32>
    %c0_13 = arith.constant 0 : index
    %c0_14 = arith.constant 0 : index
    %c0_15 = arith.constant 0 : index
    %26 = vector.load %arg4[%c0_13, %c0_14, %c0_15] : memref<2x32x320xf32, #tpu.memory_space<vmem>>, vector<1x32x320xf32>
    %27 = vector.shape_cast %26 : vector<1x32x320xf32> to vector<32x320xf32>
    %c0_16 = arith.constant 0 : index
    %c0_17 = arith.constant 0 : index
    %c0_18 = arith.constant 0 : index
    %28 = vector.load %arg5[%c0_16, %c0_17, %c0_18] : memref<2x64x32xf32, #tpu.memory_space<vmem>>, vector<1x64x32xf32>
    %29 = vector.shape_cast %28 : vector<1x64x32xf32> to vector<64x32xf32>
    %c0_19 = arith.constant 0 : index
    %c0_20 = arith.constant 0 : index
    %c0_21 = arith.constant 0 : index
    %30 = vector.load %arg6[%c0_19, %c0_20, %c0_21] : memref<2x16x96xf32, #tpu.memory_space<vmem>>, vector<1x16x96xf32>
    %31 = vector.shape_cast %30 : vector<1x16x96xf32> to vector<16x96xf32>
    %32 = vector.extract_strided_slice %31 {offsets = [0, 0], sizes = [1, 32], strides = [1, 1]} : vector<16x96xf32> to vector<1x32xf32>
    %33 = vector.extract_strided_slice %31 {offsets = [3, 0], sizes = [1, 32], strides = [1, 1]} : vector<16x96xf32> to vector<1x32xf32>
    %cst_22 = arith.constant dense<0.000000e+00> : vector<16xf32>
    %34 = vector.multi_reduction <add>, %11, %cst_22 [1] : vector<16x32xf32> to vector<16xf32>
    %35 = vector.shape_cast %34 : vector<16xf32> to vector<16x1xf32>
    %cst_23 = arith.constant 3.200000e+01 : f32
    %36 = vector.broadcast %cst_23 : f32 to vector<16x1xf32>
    %37 = arith.divf %35, %36 : vector<16x1xf32>
    %38 = vector.broadcast %37 : vector<16x1xf32> to vector<16x32xf32>
    %39 = arith.subf %11, %38 : vector<16x32xf32>
    %40 = arith.mulf %39, %39 : vector<16x32xf32>
    %cst_24 = arith.constant dense<0.000000e+00> : vector<16xf32>
    %41 = vector.multi_reduction <add>, %40, %cst_24 [1] : vector<16x32xf32> to vector<16xf32>
    %42 = vector.shape_cast %41 : vector<16xf32> to vector<16x1xf32>
    %cst_25 = arith.constant 3.200000e+01 : f32
    %43 = vector.broadcast %cst_25 : f32 to vector<16x1xf32>
    %44 = arith.divf %42, %43 : vector<16x1xf32>
    %45 = vector.broadcast %37 : vector<16x1xf32> to vector<16x32xf32>
    %46 = arith.subf %11, %45 : vector<16x32xf32>
    %cst_26 = arith.constant 9.99999996E-13 : f32
    %47 = vector.broadcast %cst_26 : f32 to vector<16x1xf32>
    %48 = arith.addf %44, %47 : vector<16x1xf32>
    %49 = math.rsqrt %48 : vector<16x1xf32>
    %50 = vector.broadcast %49 : vector<16x1xf32> to vector<16x32xf32>
    %51 = arith.mulf %46, %50 : vector<16x32xf32>
    %52 = vector.broadcast %32 : vector<1x32xf32> to vector<16x32xf32>
    %53 = arith.mulf %51, %52 : vector<16x32xf32>
    %54 = vector.broadcast %33 : vector<1x32xf32> to vector<16x32xf32>
    %55 = arith.addf %53, %54 : vector<16x32xf32>
    %56 = vector.extract_strided_slice %27 {offsets = [0, 0], sizes = [32, 96], strides = [1, 1]} : vector<32x320xf32> to vector<32x96xf32>
    %cst_27 = arith.constant dense<0.000000e+00> : vector<16x96xf32>
    %57 = tpu.matmul %55, %56, %cst_27 {dimension_numbers = #tpu.dot_dimension_numbers<[1], [0], [0], [1], [0, 0, 1, 1], [], []>} : vector<16x32xf32>, vector<32x96xf32>, vector<16x96xf32> -> vector<16x96xf32>
    %58 = vector.extract_strided_slice %31 {offsets = [6, 0], sizes = [1, 96], strides = [1, 1]} : vector<16x96xf32> to vector<1x96xf32>
    %59 = vector.broadcast %58 : vector<1x96xf32> to vector<16x96xf32>
    %60 = arith.addf %57, %59 : vector<16x96xf32>
    %61 = vector.extract_strided_slice %27 {offsets = [0, 96], sizes = [32, 32], strides = [1, 1]} : vector<32x320xf32> to vector<32x32xf32>
    %62 = vector.extract_strided_slice %60 {offsets = [0, 0], sizes = [8, 96], strides = [1, 1]} : vector<16x96xf32> to vector<8x96xf32>
    %63 = vector.extract_strided_slice %62 {offsets = [0, 0], sizes = [8, 8], strides = [1, 1]} : vector<8x96xf32> to vector<8x8xf32>
    %64 = vector.extract_strided_slice %62 {offsets = [0, 32], sizes = [8, 8], strides = [1, 1]} : vector<8x96xf32> to vector<8x8xf32>
    %65 = vector.extract_strided_slice %62 {offsets = [0, 64], sizes = [8, 8], strides = [1, 1]} : vector<8x96xf32> to vector<8x8xf32>
    %cst_28 = arith.constant dense<0.000000e+00> : vector<8x8xf32>
    %66 = tpu.matmul %63, %64, %cst_28 {dimension_numbers = #tpu.dot_dimension_numbers<[1], [1], [0], [0], [0, 0, 1, 0], [], []>} : vector<8x8xf32>, vector<8x8xf32>, vector<8x8xf32> -> vector<8x8xf32>
    %cst_29 = arith.constant 0.353553385 : f32
    %67 = vector.broadcast %cst_29 : f32 to vector<8x8xf32>
    %68 = arith.mulf %66, %67 : vector<8x8xf32>
    %cst_30 = arith.constant -1.000000e+09 : f32
    %69 = vector.broadcast %cst_30 : f32 to vector<8x8xf32>
    %70 = arith.select %16, %68, %69 : vector<8x8xi1>, vector<8x8xf32>
    %cst_31 = arith.constant dense<0xFF800000> : vector<8xf32>
    %71 = vector.multi_reduction <maximumf>, %70, %cst_31 [1] : vector<8x8xf32> to vector<8xf32>
    %72 = vector.shape_cast %71 : vector<8xf32> to vector<8x1xf32>
    %73 = vector.broadcast %72 : vector<8x1xf32> to vector<8x8xf32>
    %74 = arith.subf %70, %73 : vector<8x8xf32>
    %75 = math.exp %74 : vector<8x8xf32>
    %cst_32 = arith.constant dense<0.000000e+00> : vector<8xf32>
    %76 = vector.multi_reduction <add>, %75, %cst_32 [1] : vector<8x8xf32> to vector<8xf32>
    %77 = vector.shape_cast %76 : vector<8xf32> to vector<8x1xf32>
    %78 = tpu.reciprocal %77 {approx = true} : vector<8x1xf32> -> vector<8x1xf32>
    %79 = vector.broadcast %78 : vector<8x1xf32> to vector<8x8xf32>
    %80 = arith.mulf %75, %79 : vector<8x8xf32>
    %cst_33 = arith.constant 0.000000e+00 : f32
    %81 = vector.broadcast %cst_33 : f32 to vector<8x8xf32>
    %82 = arith.select %16, %80, %81 : vector<8x8xi1>, vector<8x8xf32>
    %cst_34 = arith.constant dense<0.000000e+00> : vector<8x8xf32>
    %83 = tpu.matmul %82, %65, %cst_34 {dimension_numbers = #tpu.dot_dimension_numbers<[1], [0], [0], [1], [0, 0, 1, 1], [], []>} : vector<8x8xf32>, vector<8x8xf32>, vector<8x8xf32> -> vector<8x8xf32>
    %84 = vector.extract_strided_slice %61 {offsets = [0, 0], sizes = [8, 32], strides = [1, 1]} : vector<32x32xf32> to vector<8x32xf32>
    %cst_35 = arith.constant dense<0.000000e+00> : vector<8x32xf32>
    %85 = tpu.matmul %83, %84, %cst_35 {dimension_numbers = #tpu.dot_dimension_numbers<[1], [0], [0], [1], [0, 0, 1, 1], [], []>} : vector<8x8xf32>, vector<8x32xf32>, vector<8x32xf32> -> vector<8x32xf32>
    %86 = vector.extract_strided_slice %62 {offsets = [0, 8], sizes = [8, 8], strides = [1, 1]} : vector<8x96xf32> to vector<8x8xf32>
    %87 = vector.extract_strided_slice %62 {offsets = [0, 40], sizes = [8, 8], strides = [1, 1]} : vector<8x96xf32> to vector<8x8xf32>
    %88 = vector.extract_strided_slice %62 {offsets = [0, 72], sizes = [8, 8], strides = [1, 1]} : vector<8x96xf32> to vector<8x8xf32>
    %cst_36 = arith.constant dense<0.000000e+00> : vector<8x8xf32>
    %89 = tpu.matmul %86, %87, %cst_36 {dimension_numbers = #tpu.dot_dimension_numbers<[1], [1], [0], [0], [0, 0, 1, 0], [], []>} : vector<8x8xf32>, vector<8x8xf32>, vector<8x8xf32> -> vector<8x8xf32>
    %cst_37 = arith.constant 0.353553385 : f32
    %90 = vector.broadcast %cst_37 : f32 to vector<8x8xf32>
    %91 = arith.mulf %89, %90 : vector<8x8xf32>
    %cst_38 = arith.constant -1.000000e+09 : f32
    %92 = vector.broadcast %cst_38 : f32 to vector<8x8xf32>
    %93 = arith.select %16, %91, %92 : vector<8x8xi1>, vector<8x8xf32>
    %cst_39 = arith.constant dense<0xFF800000> : vector<8xf32>
    %94 = vector.multi_reduction <maximumf>, %93, %cst_39 [1] : vector<8x8xf32> to vector<8xf32>
    %95 = vector.shape_cast %94 : vector<8xf32> to vector<8x1xf32>
    %96 = vector.broadcast %95 : vector<8x1xf32> to vector<8x8xf32>
    %97 = arith.subf %93, %96 : vector<8x8xf32>
    %98 = math.exp %97 : vector<8x8xf32>
    %cst_40 = arith.constant dense<0.000000e+00> : vector<8xf32>
    %99 = vector.multi_reduction <add>, %98, %cst_40 [1] : vector<8x8xf32> to vector<8xf32>
    %100 = vector.shape_cast %99 : vector<8xf32> to vector<8x1xf32>
    %101 = tpu.reciprocal %100 {approx = true} : vector<8x1xf32> -> vector<8x1xf32>
    %102 = vector.broadcast %101 : vector<8x1xf32> to vector<8x8xf32>
    %103 = arith.mulf %98, %102 : vector<8x8xf32>
    %cst_41 = arith.constant 0.000000e+00 : f32
    %104 = vector.broadcast %cst_41 : f32 to vector<8x8xf32>
    %105 = arith.select %16, %103, %104 : vector<8x8xi1>, vector<8x8xf32>
    %cst_42 = arith.constant dense<0.000000e+00> : vector<8x8xf32>
    %106 = tpu.matmul %105, %88, %cst_42 {dimension_numbers = #tpu.dot_dimension_numbers<[1], [0], [0], [1], [0, 0, 1, 1], [], []>} : vector<8x8xf32>, vector<8x8xf32>, vector<8x8xf32> -> vector<8x8xf32>
    %107 = vector.extract_strided_slice %61 {offsets = [8, 0], sizes = [8, 32], strides = [1, 1]} : vector<32x32xf32> to vector<8x32xf32>
    %cst_43 = arith.constant dense<0.000000e+00> : vector<8x32xf32>
    %108 = tpu.matmul %106, %107, %cst_43 {dimension_numbers = #tpu.dot_dimension_numbers<[1], [0], [0], [1], [0, 0, 1, 1], [], []>} : vector<8x8xf32>, vector<8x32xf32>, vector<8x32xf32> -> vector<8x32xf32>
    %109 = arith.addf %85, %108 : vector<8x32xf32>
    %110 = vector.extract_strided_slice %62 {offsets = [0, 16], sizes = [8, 8], strides = [1, 1]} : vector<8x96xf32> to vector<8x8xf32>
    %111 = vector.extract_strided_slice %62 {offsets = [0, 48], sizes = [8, 8], strides = [1, 1]} : vector<8x96xf32> to vector<8x8xf32>
    %112 = vector.extract_strided_slice %62 {offsets = [0, 80], sizes = [8, 8], strides = [1, 1]} : vector<8x96xf32> to vector<8x8xf32>
    %cst_44 = arith.constant dense<0.000000e+00> : vector<8x8xf32>
    %113 = tpu.matmul %110, %111, %cst_44 {dimension_numbers = #tpu.dot_dimension_numbers<[1], [1], [0], [0], [0, 0, 1, 0], [], []>} : vector<8x8xf32>, vector<8x8xf32>, vector<8x8xf32> -> vector<8x8xf32>
    %cst_45 = arith.constant 0.353553385 : f32
    %114 = vector.broadcast %cst_45 : f32 to vector<8x8xf32>
    %115 = arith.mulf %113, %114 : vector<8x8xf32>
    %cst_46 = arith.constant -1.000000e+09 : f32
    %116 = vector.broadcast %cst_46 : f32 to vector<8x8xf32>
    %117 = arith.select %16, %115, %116 : vector<8x8xi1>, vector<8x8xf32>
    %cst_47 = arith.constant dense<0xFF800000> : vector<8xf32>
    %118 = vector.multi_reduction <maximumf>, %117, %cst_47 [1] : vector<8x8xf32> to vector<8xf32>
    %119 = vector.shape_cast %118 : vector<8xf32> to vector<8x1xf32>
    %120 = vector.broadcast %119 : vector<8x1xf32> to vector<8x8xf32>
    %121 = arith.subf %117, %120 : vector<8x8xf32>
    %122 = math.exp %121 : vector<8x8xf32>
    %cst_48 = arith.constant dense<0.000000e+00> : vector<8xf32>
    %123 = vector.multi_reduction <add>, %122, %cst_48 [1] : vector<8x8xf32> to vector<8xf32>
    %124 = vector.shape_cast %123 : vector<8xf32> to vector<8x1xf32>
    %125 = tpu.reciprocal %124 {approx = true} : vector<8x1xf32> -> vector<8x1xf32>
    %126 = vector.broadcast %125 : vector<8x1xf32> to vector<8x8xf32>
    %127 = arith.mulf %122, %126 : vector<8x8xf32>
    %cst_49 = arith.constant 0.000000e+00 : f32
    %128 = vector.broadcast %cst_49 : f32 to vector<8x8xf32>
    %129 = arith.select %16, %127, %128 : vector<8x8xi1>, vector<8x8xf32>
    %cst_50 = arith.constant dense<0.000000e+00> : vector<8x8xf32>
    %130 = tpu.matmul %129, %112, %cst_50 {dimension_numbers = #tpu.dot_dimension_numbers<[1], [0], [0], [1], [0, 0, 1, 1], [], []>} : vector<8x8xf32>, vector<8x8xf32>, vector<8x8xf32> -> vector<8x8xf32>
    %131 = vector.extract_strided_slice %61 {offsets = [16, 0], sizes = [8, 32], strides = [1, 1]} : vector<32x32xf32> to vector<8x32xf32>
    %cst_51 = arith.constant dense<0.000000e+00> : vector<8x32xf32>
    %132 = tpu.matmul %130, %131, %cst_51 {dimension_numbers = #tpu.dot_dimension_numbers<[1], [0], [0], [1], [0, 0, 1, 1], [], []>} : vector<8x8xf32>, vector<8x32xf32>, vector<8x32xf32> -> vector<8x32xf32>
    %133 = arith.addf %109, %132 : vector<8x32xf32>
    %134 = vector.extract_strided_slice %62 {offsets = [0, 24], sizes = [8, 8], strides = [1, 1]} : vector<8x96xf32> to vector<8x8xf32>
    %135 = vector.extract_strided_slice %62 {offsets = [0, 56], sizes = [8, 8], strides = [1, 1]} : vector<8x96xf32> to vector<8x8xf32>
    %136 = vector.extract_strided_slice %62 {offsets = [0, 88], sizes = [8, 8], strides = [1, 1]} : vector<8x96xf32> to vector<8x8xf32>
    %cst_52 = arith.constant dense<0.000000e+00> : vector<8x8xf32>
    %137 = tpu.matmul %134, %135, %cst_52 {dimension_numbers = #tpu.dot_dimension_numbers<[1], [1], [0], [0], [0, 0, 1, 0], [], []>} : vector<8x8xf32>, vector<8x8xf32>, vector<8x8xf32> -> vector<8x8xf32>
    %cst_53 = arith.constant 0.353553385 : f32
    %138 = vector.broadcast %cst_53 : f32 to vector<8x8xf32>
    %139 = arith.mulf %137, %138 : vector<8x8xf32>
    %cst_54 = arith.constant -1.000000e+09 : f32
    %140 = vector.broadcast %cst_54 : f32 to vector<8x8xf32>
    %141 = arith.select %16, %139, %140 : vector<8x8xi1>, vector<8x8xf32>
    %cst_55 = arith.constant dense<0xFF800000> : vector<8xf32>
    %142 = vector.multi_reduction <maximumf>, %141, %cst_55 [1] : vector<8x8xf32> to vector<8xf32>
    %143 = vector.shape_cast %142 : vector<8xf32> to vector<8x1xf32>
    %144 = vector.broadcast %143 : vector<8x1xf32> to vector<8x8xf32>
    %145 = arith.subf %141, %144 : vector<8x8xf32>
    %146 = math.exp %145 : vector<8x8xf32>
    %cst_56 = arith.constant dense<0.000000e+00> : vector<8xf32>
    %147 = vector.multi_reduction <add>, %146, %cst_56 [1] : vector<8x8xf32> to vector<8xf32>
    %148 = vector.shape_cast %147 : vector<8xf32> to vector<8x1xf32>
    %149 = tpu.reciprocal %148 {approx = true} : vector<8x1xf32> -> vector<8x1xf32>
    %150 = vector.broadcast %149 : vector<8x1xf32> to vector<8x8xf32>
    %151 = arith.mulf %146, %150 : vector<8x8xf32>
    %cst_57 = arith.constant 0.000000e+00 : f32
    %152 = vector.broadcast %cst_57 : f32 to vector<8x8xf32>
    %153 = arith.select %16, %151, %152 : vector<8x8xi1>, vector<8x8xf32>
    %cst_58 = arith.constant dense<0.000000e+00> : vector<8x8xf32>
    %154 = tpu.matmul %153, %136, %cst_58 {dimension_numbers = #tpu.dot_dimension_numbers<[1], [0], [0], [1], [0, 0, 1, 1], [], []>} : vector<8x8xf32>, vector<8x8xf32>, vector<8x8xf32> -> vector<8x8xf32>
    %155 = vector.extract_strided_slice %61 {offsets = [24, 0], sizes = [8, 32], strides = [1, 1]} : vector<32x32xf32> to vector<8x32xf32>
    %cst_59 = arith.constant dense<0.000000e+00> : vector<8x32xf32>
    %156 = tpu.matmul %154, %155, %cst_59 {dimension_numbers = #tpu.dot_dimension_numbers<[1], [0], [0], [1], [0, 0, 1, 1], [], []>} : vector<8x8xf32>, vector<8x32xf32>, vector<8x32xf32> -> vector<8x32xf32>
    %157 = arith.addf %133, %156 : vector<8x32xf32>
    %c0_60 = arith.constant 0 : index
    %c0_61 = arith.constant 0 : index
    %158 = vector.load %arg8[%c0_60, %c0_61] : memref<16x32xf32, #tpu.memory_space<vmem>>, vector<8x32xf32>
    tpu.vector_store %arg8[%c0_60, %c0_61], %157 {strides = array<i32>} : memref<16x32xf32, #tpu.memory_space<vmem>>, vector<8x32xf32>,
    %159 = vector.extract_strided_slice %60 {offsets = [8, 0], sizes = [8, 96], strides = [1, 1]} : vector<16x96xf32> to vector<8x96xf32>
    %160 = vector.extract_strided_slice %159 {offsets = [0, 0], sizes = [8, 8], strides = [1, 1]} : vector<8x96xf32> to vector<8x8xf32>
    %161 = vector.extract_strided_slice %159 {offsets = [0, 32], sizes = [8, 8], strides = [1, 1]} : vector<8x96xf32> to vector<8x8xf32>
    %162 = vector.extract_strided_slice %159 {offsets = [0, 64], sizes = [8, 8], strides = [1, 1]} : vector<8x96xf32> to vector<8x8xf32>
    %cst_62 = arith.constant dense<0.000000e+00> : vector<8x8xf32>
    %163 = tpu.matmul %160, %161, %cst_62 {dimension_numbers = #tpu.dot_dimension_numbers<[1], [1], [0], [0], [0, 0, 1, 0], [], []>} : vector<8x8xf32>, vector<8x8xf32>, vector<8x8xf32> -> vector<8x8xf32>
    %cst_63 = arith.constant 0.353553385 : f32
    %164 = vector.broadcast %cst_63 : f32 to vector<8x8xf32>
    %165 = arith.mulf %163, %164 : vector<8x8xf32>
    %cst_64 = arith.constant -1.000000e+09 : f32
    %166 = vector.broadcast %cst_64 : f32 to vector<8x8xf32>
    %167 = arith.select %22, %165, %166 : vector<8x8xi1>, vector<8x8xf32>
    %cst_65 = arith.constant dense<0xFF800000> : vector<8xf32>
    %168 = vector.multi_reduction <maximumf>, %167, %cst_65 [1] : vector<8x8xf32> to vector<8xf32>
    %169 = vector.shape_cast %168 : vector<8xf32> to vector<8x1xf32>
    %170 = vector.broadcast %169 : vector<8x1xf32> to vector<8x8xf32>
    %171 = arith.subf %167, %170 : vector<8x8xf32>
    %172 = math.exp %171 : vector<8x8xf32>
    %cst_66 = arith.constant dense<0.000000e+00> : vector<8xf32>
    %173 = vector.multi_reduction <add>, %172, %cst_66 [1] : vector<8x8xf32> to vector<8xf32>
    %174 = vector.shape_cast %173 : vector<8xf32> to vector<8x1xf32>
    %175 = tpu.reciprocal %174 {approx = true} : vector<8x1xf32> -> vector<8x1xf32>
    %176 = vector.broadcast %175 : vector<8x1xf32> to vector<8x8xf32>
    %177 = arith.mulf %172, %176 : vector<8x8xf32>
    %cst_67 = arith.constant 0.000000e+00 : f32
    %178 = vector.broadcast %cst_67 : f32 to vector<8x8xf32>
    %179 = arith.select %22, %177, %178 : vector<8x8xi1>, vector<8x8xf32>
    %cst_68 = arith.constant dense<0.000000e+00> : vector<8x8xf32>
    %180 = tpu.matmul %179, %162, %cst_68 {dimension_numbers = #tpu.dot_dimension_numbers<[1], [0], [0], [1], [0, 0, 1, 1], [], []>} : vector<8x8xf32>, vector<8x8xf32>, vector<8x8xf32> -> vector<8x8xf32>
    %181 = vector.extract_strided_slice %61 {offsets = [0, 0], sizes = [8, 32], strides = [1, 1]} : vector<32x32xf32> to vector<8x32xf32>
    %cst_69 = arith.constant dense<0.000000e+00> : vector<8x32xf32>
    %182 = tpu.matmul %180, %181, %cst_69 {dimension_numbers = #tpu.dot_dimension_numbers<[1], [0], [0], [1], [0, 0, 1, 1], [], []>} : vector<8x8xf32>, vector<8x32xf32>, vector<8x32xf32> -> vector<8x32xf32>
    %183 = vector.extract_strided_slice %159 {offsets = [0, 8], sizes = [8, 8], strides = [1, 1]} : vector<8x96xf32> to vector<8x8xf32>
    %184 = vector.extract_strided_slice %159 {offsets = [0, 40], sizes = [8, 8], strides = [1, 1]} : vector<8x96xf32> to vector<8x8xf32>
    %185 = vector.extract_strided_slice %159 {offsets = [0, 72], sizes = [8, 8], strides = [1, 1]} : vector<8x96xf32> to vector<8x8xf32>
    %cst_70 = arith.constant dense<0.000000e+00> : vector<8x8xf32>
    %186 = tpu.matmul %183, %184, %cst_70 {dimension_numbers = #tpu.dot_dimension_numbers<[1], [1], [0], [0], [0, 0, 1, 0], [], []>} : vector<8x8xf32>, vector<8x8xf32>, vector<8x8xf32> -> vector<8x8xf32>
    %cst_71 = arith.constant 0.353553385 : f32
    %187 = vector.broadcast %cst_71 : f32 to vector<8x8xf32>
    %188 = arith.mulf %186, %187 : vector<8x8xf32>
    %cst_72 = arith.constant -1.000000e+09 : f32
    %189 = vector.broadcast %cst_72 : f32 to vector<8x8xf32>
    %190 = arith.select %22, %188, %189 : vector<8x8xi1>, vector<8x8xf32>
    %cst_73 = arith.constant dense<0xFF800000> : vector<8xf32>
    %191 = vector.multi_reduction <maximumf>, %190, %cst_73 [1] : vector<8x8xf32> to vector<8xf32>
    %192 = vector.shape_cast %191 : vector<8xf32> to vector<8x1xf32>
    %193 = vector.broadcast %192 : vector<8x1xf32> to vector<8x8xf32>
    %194 = arith.subf %190, %193 : vector<8x8xf32>
    %195 = math.exp %194 : vector<8x8xf32>
    %cst_74 = arith.constant dense<0.000000e+00> : vector<8xf32>
    %196 = vector.multi_reduction <add>, %195, %cst_74 [1] : vector<8x8xf32> to vector<8xf32>
    %197 = vector.shape_cast %196 : vector<8xf32> to vector<8x1xf32>
    %198 = tpu.reciprocal %197 {approx = true} : vector<8x1xf32> -> vector<8x1xf32>
    %199 = vector.broadcast %198 : vector<8x1xf32> to vector<8x8xf32>
    %200 = arith.mulf %195, %199 : vector<8x8xf32>
    %cst_75 = arith.constant 0.000000e+00 : f32
    %201 = vector.broadcast %cst_75 : f32 to vector<8x8xf32>
    %202 = arith.select %22, %200, %201 : vector<8x8xi1>, vector<8x8xf32>
    %cst_76 = arith.constant dense<0.000000e+00> : vector<8x8xf32>
    %203 = tpu.matmul %202, %185, %cst_76 {dimension_numbers = #tpu.dot_dimension_numbers<[1], [0], [0], [1], [0, 0, 1, 1], [], []>} : vector<8x8xf32>, vector<8x8xf32>, vector<8x8xf32> -> vector<8x8xf32>
    %204 = vector.extract_strided_slice %61 {offsets = [8, 0], sizes = [8, 32], strides = [1, 1]} : vector<32x32xf32> to vector<8x32xf32>
    %cst_77 = arith.constant dense<0.000000e+00> : vector<8x32xf32>
    %205 = tpu.matmul %203, %204, %cst_77 {dimension_numbers = #tpu.dot_dimension_numbers<[1], [0], [0], [1], [0, 0, 1, 1], [], []>} : vector<8x8xf32>, vector<8x32xf32>, vector<8x32xf32> -> vector<8x32xf32>
    %206 = arith.addf %182, %205 : vector<8x32xf32>
    %207 = vector.extract_strided_slice %159 {offsets = [0, 16], sizes = [8, 8], strides = [1, 1]} : vector<8x96xf32> to vector<8x8xf32>
    %208 = vector.extract_strided_slice %159 {offsets = [0, 48], sizes = [8, 8], strides = [1, 1]} : vector<8x96xf32> to vector<8x8xf32>
    %209 = vector.extract_strided_slice %159 {offsets = [0, 80], sizes = [8, 8], strides = [1, 1]} : vector<8x96xf32> to vector<8x8xf32>
    %cst_78 = arith.constant dense<0.000000e+00> : vector<8x8xf32>
    %210 = tpu.matmul %207, %208, %cst_78 {dimension_numbers = #tpu.dot_dimension_numbers<[1], [1], [0], [0], [0, 0, 1, 0], [], []>} : vector<8x8xf32>, vector<8x8xf32>, vector<8x8xf32> -> vector<8x8xf32>
    %cst_79 = arith.constant 0.353553385 : f32
    %211 = vector.broadcast %cst_79 : f32 to vector<8x8xf32>
    %212 = arith.mulf %210, %211 : vector<8x8xf32>
    %cst_80 = arith.constant -1.000000e+09 : f32
    %213 = vector.broadcast %cst_80 : f32 to vector<8x8xf32>
    %214 = arith.select %22, %212, %213 : vector<8x8xi1>, vector<8x8xf32>
    %cst_81 = arith.constant dense<0xFF800000> : vector<8xf32>
    %215 = vector.multi_reduction <maximumf>, %214, %cst_81 [1] : vector<8x8xf32> to vector<8xf32>
    %216 = vector.shape_cast %215 : vector<8xf32> to vector<8x1xf32>
    %217 = vector.broadcast %216 : vector<8x1xf32> to vector<8x8xf32>
    %218 = arith.subf %214, %217 : vector<8x8xf32>
    %219 = math.exp %218 : vector<8x8xf32>
    %cst_82 = arith.constant dense<0.000000e+00> : vector<8xf32>
    %220 = vector.multi_reduction <add>, %219, %cst_82 [1] : vector<8x8xf32> to vector<8xf32>
    %221 = vector.shape_cast %220 : vector<8xf32> to vector<8x1xf32>
    %222 = tpu.reciprocal %221 {approx = true} : vector<8x1xf32> -> vector<8x1xf32>
    %223 = vector.broadcast %222 : vector<8x1xf32> to vector<8x8xf32>
    %224 = arith.mulf %219, %223 : vector<8x8xf32>
    %cst_83 = arith.constant 0.000000e+00 : f32
    %225 = vector.broadcast %cst_83 : f32 to vector<8x8xf32>
    %226 = arith.select %22, %224, %225 : vector<8x8xi1>, vector<8x8xf32>
    %cst_84 = arith.constant dense<0.000000e+00> : vector<8x8xf32>
    %227 = tpu.matmul %226, %209, %cst_84 {dimension_numbers = #tpu.dot_dimension_numbers<[1], [0], [0], [1], [0, 0, 1, 1], [], []>} : vector<8x8xf32>, vector<8x8xf32>, vector<8x8xf32> -> vector<8x8xf32>
    %228 = vector.extract_strided_slice %61 {offsets = [16, 0], sizes = [8, 32], strides = [1, 1]} : vector<32x32xf32> to vector<8x32xf32>
    %cst_85 = arith.constant dense<0.000000e+00> : vector<8x32xf32>
    %229 = tpu.matmul %227, %228, %cst_85 {dimension_numbers = #tpu.dot_dimension_numbers<[1], [0], [0], [1], [0, 0, 1, 1], [], []>} : vector<8x8xf32>, vector<8x32xf32>, vector<8x32xf32> -> vector<8x32xf32>
    %230 = arith.addf %206, %229 : vector<8x32xf32>
    %231 = vector.extract_strided_slice %159 {offsets = [0, 24], sizes = [8, 8], strides = [1, 1]} : vector<8x96xf32> to vector<8x8xf32>
    %232 = vector.extract_strided_slice %159 {offsets = [0, 56], sizes = [8, 8], strides = [1, 1]} : vector<8x96xf32> to vector<8x8xf32>
    %233 = vector.extract_strided_slice %159 {offsets = [0, 88], sizes = [8, 8], strides = [1, 1]} : vector<8x96xf32> to vector<8x8xf32>
    %cst_86 = arith.constant dense<0.000000e+00> : vector<8x8xf32>
    %234 = tpu.matmul %231, %232, %cst_86 {dimension_numbers = #tpu.dot_dimension_numbers<[1], [1], [0], [0], [0, 0, 1, 0], [], []>} : vector<8x8xf32>, vector<8x8xf32>, vector<8x8xf32> -> vector<8x8xf32>
    %cst_87 = arith.constant 0.353553385 : f32
    %235 = vector.broadcast %cst_87 : f32 to vector<8x8xf32>
    %236 = arith.mulf %234, %235 : vector<8x8xf32>
    %cst_88 = arith.constant -1.000000e+09 : f32
    %237 = vector.broadcast %cst_88 : f32 to vector<8x8xf32>
    %238 = arith.select %22, %236, %237 : vector<8x8xi1>, vector<8x8xf32>
    %cst_89 = arith.constant dense<0xFF800000> : vector<8xf32>
    %239 = vector.multi_reduction <maximumf>, %238, %cst_89 [1] : vector<8x8xf32> to vector<8xf32>
    %240 = vector.shape_cast %239 : vector<8xf32> to vector<8x1xf32>
    %241 = vector.broadcast %240 : vector<8x1xf32> to vector<8x8xf32>
    %242 = arith.subf %238, %241 : vector<8x8xf32>
    %243 = math.exp %242 : vector<8x8xf32>
    %cst_90 = arith.constant dense<0.000000e+00> : vector<8xf32>
    %244 = vector.multi_reduction <add>, %243, %cst_90 [1] : vector<8x8xf32> to vector<8xf32>
    %245 = vector.shape_cast %244 : vector<8xf32> to vector<8x1xf32>
    %246 = tpu.reciprocal %245 {approx = true} : vector<8x1xf32> -> vector<8x1xf32>
    %247 = vector.broadcast %246 : vector<8x1xf32> to vector<8x8xf32>
    %248 = arith.mulf %243, %247 : vector<8x8xf32>
    %cst_91 = arith.constant 0.000000e+00 : f32
    %249 = vector.broadcast %cst_91 : f32 to vector<8x8xf32>
    %250 = arith.select %22, %248, %249 : vector<8x8xi1>, vector<8x8xf32>
    %cst_92 = arith.constant dense<0.000000e+00> : vector<8x8xf32>
    %251 = tpu.matmul %250, %233, %cst_92 {dimension_numbers = #tpu.dot_dimension_numbers<[1], [0], [0], [1], [0, 0, 1, 1], [], []>} : vector<8x8xf32>, vector<8x8xf32>, vector<8x8xf32> -> vector<8x8xf32>
    %252 = vector.extract_strided_slice %61 {offsets = [24, 0], sizes = [8, 32], strides = [1, 1]} : vector<32x32xf32> to vector<8x32xf32>
    %cst_93 = arith.constant dense<0.000000e+00> : vector<8x32xf32>
    %253 = tpu.matmul %251, %252, %cst_93 {dimension_numbers = #tpu.dot_dimension_numbers<[1], [0], [0], [1], [0, 0, 1, 1], [], []>} : vector<8x8xf32>, vector<8x32xf32>, vector<8x32xf32> -> vector<8x32xf32>
    %254 = arith.addf %230, %253 : vector<8x32xf32>
    %c8 = arith.constant 8 : index
    %c0_94 = arith.constant 0 : index
    %255 = vector.load %arg8[%c8, %c0_94] : memref<16x32xf32, #tpu.memory_space<vmem>>, vector<8x32xf32>
    tpu.vector_store %arg8[%c8, %c0_94], %254 {strides = array<i32>} : memref<16x32xf32, #tpu.memory_space<vmem>>, vector<8x32xf32>,
    %c0_95 = arith.constant 0 : index
    %c0_96 = arith.constant 0 : index
    %256 = vector.load %arg8[%c0_95, %c0_96] : memref<16x32xf32, #tpu.memory_space<vmem>>, vector<16x32xf32>
    %257 = arith.addf %11, %256 : vector<16x32xf32>
    %258 = vector.extract_strided_slice %31 {offsets = [7, 0], sizes = [1, 32], strides = [1, 1]} : vector<16x96xf32> to vector<1x32xf32>
    %259 = vector.broadcast %258 : vector<1x32xf32> to vector<16x32xf32>
    %260 = arith.addf %257, %259 : vector<16x32xf32>
    %261 = vector.extract_strided_slice %31 {offsets = [1, 0], sizes = [1, 32], strides = [1, 1]} : vector<16x96xf32> to vector<1x32xf32>
    %262 = vector.extract_strided_slice %31 {offsets = [4, 0], sizes = [1, 32], strides = [1, 1]} : vector<16x96xf32> to vector<1x32xf32>
    %cst_97 = arith.constant dense<0.000000e+00> : vector<16xf32>
    %263 = vector.multi_reduction <add>, %260, %cst_97 [1] : vector<16x32xf32> to vector<16xf32>
    %264 = vector.shape_cast %263 : vector<16xf32> to vector<16x1xf32>
    %cst_98 = arith.constant 3.200000e+01 : f32
    %265 = vector.broadcast %cst_98 : f32 to vector<16x1xf32>
    %266 = arith.divf %264, %265 : vector<16x1xf32>
    %267 = vector.broadcast %266 : vector<16x1xf32> to vector<16x32xf32>
    %268 = arith.subf %260, %267 : vector<16x32xf32>
    %269 = arith.mulf %268, %268 : vector<16x32xf32>
    %cst_99 = arith.constant dense<0.000000e+00> : vector<16xf32>
    %270 = vector.multi_reduction <add>, %269, %cst_99 [1] : vector<16x32xf32> to vector<16xf32>
    %271 = vector.shape_cast %270 : vector<16xf32> to vector<16x1xf32>
    %cst_100 = arith.constant 3.200000e+01 : f32
    %272 = vector.broadcast %cst_100 : f32 to vector<16x1xf32>
    %273 = arith.divf %271, %272 : vector<16x1xf32>
    %274 = vector.broadcast %266 : vector<16x1xf32> to vector<16x32xf32>
    %275 = arith.subf %260, %274 : vector<16x32xf32>
    %cst_101 = arith.constant 9.99999996E-13 : f32
    %276 = vector.broadcast %cst_101 : f32 to vector<16x1xf32>
    %277 = arith.addf %273, %276 : vector<16x1xf32>
    %278 = math.rsqrt %277 : vector<16x1xf32>
    %279 = vector.broadcast %278 : vector<16x1xf32> to vector<16x32xf32>
    %280 = arith.mulf %275, %279 : vector<16x32xf32>
    %281 = vector.broadcast %261 : vector<1x32xf32> to vector<16x32xf32>
    %282 = arith.mulf %280, %281 : vector<16x32xf32>
    %283 = vector.broadcast %262 : vector<1x32xf32> to vector<16x32xf32>
    %284 = arith.addf %282, %283 : vector<16x32xf32>
    %285 = vector.extract_strided_slice %27 {offsets = [0, 128], sizes = [32, 32], strides = [1, 1]} : vector<32x320xf32> to vector<32x32xf32>
    %cst_102 = arith.constant dense<0.000000e+00> : vector<16x32xf32>
    %286 = tpu.matmul %284, %285, %cst_102 {dimension_numbers = #tpu.dot_dimension_numbers<[1], [0], [0], [1], [0, 0, 1, 1], [], []>} : vector<16x32xf32>, vector<32x32xf32>, vector<16x32xf32> -> vector<16x32xf32>
    %287 = vector.extract_strided_slice %31 {offsets = [8, 0], sizes = [1, 32], strides = [1, 1]} : vector<16x96xf32> to vector<1x32xf32>
    %288 = vector.broadcast %287 : vector<1x32xf32> to vector<16x32xf32>
    %289 = arith.addf %286, %288 : vector<16x32xf32>
    %290 = vector.extract_strided_slice %27 {offsets = [0, 160], sizes = [32, 64], strides = [1, 1]} : vector<32x320xf32> to vector<32x64xf32>
    %cst_103 = arith.constant dense<0.000000e+00> : vector<32x64xf32>
    %291 = tpu.matmul %12, %290, %cst_103 {dimension_numbers = #tpu.dot_dimension_numbers<[1], [0], [0], [1], [0, 0, 1, 1], [], []>} : vector<32x32xf32>, vector<32x64xf32>, vector<32x64xf32> -> vector<32x64xf32>
    %292 = vector.extract_strided_slice %31 {offsets = [9, 0], sizes = [1, 64], strides = [1, 1]} : vector<16x96xf32> to vector<1x64xf32>
    %293 = vector.broadcast %292 : vector<1x64xf32> to vector<32x64xf32>
    %294 = arith.addf %291, %293 : vector<32x64xf32>
    %295 = vector.extract_strided_slice %289 {offsets = [0, 0], sizes = [8, 32], strides = [1, 1]} : vector<16x32xf32> to vector<8x32xf32>
    %296 = vector.extract_strided_slice %294 {offsets = [0, 0], sizes = [16, 32], strides = [1, 1]} : vector<32x64xf32> to vector<16x32xf32>
    %297 = vector.extract_strided_slice %294 {offsets = [0, 32], sizes = [16, 32], strides = [1, 1]} : vector<32x64xf32> to vector<16x32xf32>
    %cst_104 = arith.constant dense<0.000000e+00> : vector<8x16xf32>
    %298 = tpu.matmul %295, %296, %cst_104 {dimension_numbers = #tpu.dot_dimension_numbers<[1], [1], [0], [0], [0, 0, 1, 0], [], []>} : vector<8x32xf32>, vector<16x32xf32>, vector<8x16xf32> -> vector<8x16xf32>
    %cst_105 = arith.constant 0.176776692 : f32
    %299 = vector.broadcast %cst_105 : f32 to vector<8x16xf32>
    %300 = arith.mulf %298, %299 : vector<8x16xf32>
    %cst_106 = arith.constant -1.000000e+09 : f32
    %301 = vector.broadcast %cst_106 : f32 to vector<8x16xf32>
    %302 = arith.select %19, %300, %301 : vector<8x16xi1>, vector<8x16xf32>
    %cst_107 = arith.constant dense<0xFF800000> : vector<8xf32>
    %303 = vector.multi_reduction <maximumf>, %302, %cst_107 [1] : vector<8x16xf32> to vector<8xf32>
    %304 = vector.shape_cast %303 : vector<8xf32> to vector<8x1xf32>
    %305 = vector.broadcast %304 : vector<8x1xf32> to vector<8x16xf32>
    %306 = arith.subf %302, %305 : vector<8x16xf32>
    %307 = math.exp %306 : vector<8x16xf32>
    %cst_108 = arith.constant dense<0.000000e+00> : vector<8xf32>
    %308 = vector.multi_reduction <add>, %307, %cst_108 [1] : vector<8x16xf32> to vector<8xf32>
    %309 = vector.shape_cast %308 : vector<8xf32> to vector<8x1xf32>
    %310 = tpu.reciprocal %309 {approx = true} : vector<8x1xf32> -> vector<8x1xf32>
    %311 = vector.broadcast %310 : vector<8x1xf32> to vector<8x16xf32>
    %312 = arith.mulf %307, %311 : vector<8x16xf32>
    %cst_109 = arith.constant 0.000000e+00 : f32
    %313 = vector.broadcast %cst_109 : f32 to vector<8x16xf32>
    %314 = arith.select %19, %312, %313 : vector<8x16xi1>, vector<8x16xf32>
    %cst_110 = arith.constant dense<0.000000e+00> : vector<8x32xf32>
    %315 = tpu.matmul %314, %297, %cst_110 {dimension_numbers = #tpu.dot_dimension_numbers<[1], [0], [0], [1], [0, 0, 1, 1], [], []>} : vector<8x16xf32>, vector<16x32xf32>, vector<8x32xf32> -> vector<8x32xf32>
    %c0_111 = arith.constant 0 : index
    %c0_112 = arith.constant 0 : index
    %316 = vector.load %arg8[%c0_111, %c0_112] : memref<16x32xf32, #tpu.memory_space<vmem>>, vector<8x32xf32>
    tpu.vector_store %arg8[%c0_111, %c0_112], %315 {strides = array<i32>} : memref<16x32xf32, #tpu.memory_space<vmem>>, vector<8x32xf32>,
    %317 = vector.extract_strided_slice %289 {offsets = [8, 0], sizes = [8, 32], strides = [1, 1]} : vector<16x32xf32> to vector<8x32xf32>
    %318 = vector.extract_strided_slice %294 {offsets = [16, 0], sizes = [16, 32], strides = [1, 1]} : vector<32x64xf32> to vector<16x32xf32>
    %319 = vector.extract_strided_slice %294 {offsets = [16, 32], sizes = [16, 32], strides = [1, 1]} : vector<32x64xf32> to vector<16x32xf32>
    %cst_113 = arith.constant dense<0.000000e+00> : vector<8x16xf32>
    %320 = tpu.matmul %317, %318, %cst_113 {dimension_numbers = #tpu.dot_dimension_numbers<[1], [1], [0], [0], [0, 0, 1, 0], [], []>} : vector<8x32xf32>, vector<16x32xf32>, vector<8x16xf32> -> vector<8x16xf32>
    %cst_114 = arith.constant 0.176776692 : f32
    %321 = vector.broadcast %cst_114 : f32 to vector<8x16xf32>
    %322 = arith.mulf %320, %321 : vector<8x16xf32>
    %cst_115 = arith.constant -1.000000e+09 : f32
    %323 = vector.broadcast %cst_115 : f32 to vector<8x16xf32>
    %324 = arith.select %25, %322, %323 : vector<8x16xi1>, vector<8x16xf32>
    %cst_116 = arith.constant dense<0xFF800000> : vector<8xf32>
    %325 = vector.multi_reduction <maximumf>, %324, %cst_116 [1] : vector<8x16xf32> to vector<8xf32>
    %326 = vector.shape_cast %325 : vector<8xf32> to vector<8x1xf32>
    %327 = vector.broadcast %326 : vector<8x1xf32> to vector<8x16xf32>
    %328 = arith.subf %324, %327 : vector<8x16xf32>
    %329 = math.exp %328 : vector<8x16xf32>
    %cst_117 = arith.constant dense<0.000000e+00> : vector<8xf32>
    %330 = vector.multi_reduction <add>, %329, %cst_117 [1] : vector<8x16xf32> to vector<8xf32>
    %331 = vector.shape_cast %330 : vector<8xf32> to vector<8x1xf32>
    %332 = tpu.reciprocal %331 {approx = true} : vector<8x1xf32> -> vector<8x1xf32>
    %333 = vector.broadcast %332 : vector<8x1xf32> to vector<8x16xf32>
    %334 = arith.mulf %329, %333 : vector<8x16xf32>
    %cst_118 = arith.constant 0.000000e+00 : f32
    %335 = vector.broadcast %cst_118 : f32 to vector<8x16xf32>
    %336 = arith.select %25, %334, %335 : vector<8x16xi1>, vector<8x16xf32>
    %cst_119 = arith.constant dense<0.000000e+00> : vector<8x32xf32>
    %337 = tpu.matmul %336, %319, %cst_119 {dimension_numbers = #tpu.dot_dimension_numbers<[1], [0], [0], [1], [0, 0, 1, 1], [], []>} : vector<8x16xf32>, vector<16x32xf32>, vector<8x32xf32> -> vector<8x32xf32>
    %c8_120 = arith.constant 8 : index
    %c0_121 = arith.constant 0 : index
    %338 = vector.load %arg8[%c8_120, %c0_121] : memref<16x32xf32, #tpu.memory_space<vmem>>, vector<8x32xf32>
    tpu.vector_store %arg8[%c8_120, %c0_121], %337 {strides = array<i32>} : memref<16x32xf32, #tpu.memory_space<vmem>>, vector<8x32xf32>,
    %c0_122 = arith.constant 0 : index
    %c0_123 = arith.constant 0 : index
    %339 = vector.load %arg8[%c0_122, %c0_123] : memref<16x32xf32, #tpu.memory_space<vmem>>, vector<16x32xf32>
    %340 = vector.extract_strided_slice %27 {offsets = [0, 224], sizes = [32, 32], strides = [1, 1]} : vector<32x320xf32> to vector<32x32xf32>
    %cst_124 = arith.constant dense<0.000000e+00> : vector<16x32xf32>
    %341 = tpu.matmul %339, %340, %cst_124 {dimension_numbers = #tpu.dot_dimension_numbers<[1], [0], [0], [1], [0, 0, 1, 1], [], []>} : vector<16x32xf32>, vector<32x32xf32>, vector<16x32xf32> -> vector<16x32xf32>
    %342 = arith.addf %260, %341 : vector<16x32xf32>
    %343 = vector.extract_strided_slice %31 {offsets = [10, 0], sizes = [1, 32], strides = [1, 1]} : vector<16x96xf32> to vector<1x32xf32>
    %344 = vector.broadcast %343 : vector<1x32xf32> to vector<16x32xf32>
    %345 = arith.addf %342, %344 : vector<16x32xf32>
    %346 = vector.extract_strided_slice %31 {offsets = [2, 0], sizes = [1, 32], strides = [1, 1]} : vector<16x96xf32> to vector<1x32xf32>
    %347 = vector.extract_strided_slice %31 {offsets = [5, 0], sizes = [1, 32], strides = [1, 1]} : vector<16x96xf32> to vector<1x32xf32>
    %cst_125 = arith.constant dense<0.000000e+00> : vector<16xf32>
    %348 = vector.multi_reduction <add>, %345, %cst_125 [1] : vector<16x32xf32> to vector<16xf32>
    %349 = vector.shape_cast %348 : vector<16xf32> to vector<16x1xf32>
    %cst_126 = arith.constant 3.200000e+01 : f32
    %350 = vector.broadcast %cst_126 : f32 to vector<16x1xf32>
    %351 = arith.divf %349, %350 : vector<16x1xf32>
    %352 = vector.broadcast %351 : vector<16x1xf32> to vector<16x32xf32>
    %353 = arith.subf %345, %352 : vector<16x32xf32>
    %354 = arith.mulf %353, %353 : vector<16x32xf32>
    %cst_127 = arith.constant dense<0.000000e+00> : vector<16xf32>
    %355 = vector.multi_reduction <add>, %354, %cst_127 [1] : vector<16x32xf32> to vector<16xf32>
    %356 = vector.shape_cast %355 : vector<16xf32> to vector<16x1xf32>
    %cst_128 = arith.constant 3.200000e+01 : f32
    %357 = vector.broadcast %cst_128 : f32 to vector<16x1xf32>
    %358 = arith.divf %356, %357 : vector<16x1xf32>
    %359 = vector.broadcast %351 : vector<16x1xf32> to vector<16x32xf32>
    %360 = arith.subf %345, %359 : vector<16x32xf32>
    %cst_129 = arith.constant 9.99999996E-13 : f32
    %361 = vector.broadcast %cst_129 : f32 to vector<16x1xf32>
    %362 = arith.addf %358, %361 : vector<16x1xf32>
    %363 = math.rsqrt %362 : vector<16x1xf32>
    %364 = vector.broadcast %363 : vector<16x1xf32> to vector<16x32xf32>
    %365 = arith.mulf %360, %364 : vector<16x32xf32>
    %366 = vector.broadcast %346 : vector<1x32xf32> to vector<16x32xf32>
    %367 = arith.mulf %365, %366 : vector<16x32xf32>
    %368 = vector.broadcast %347 : vector<1x32xf32> to vector<16x32xf32>
    %369 = arith.addf %367, %368 : vector<16x32xf32>
    %370 = vector.extract_strided_slice %27 {offsets = [0, 256], sizes = [32, 64], strides = [1, 1]} : vector<32x320xf32> to vector<32x64xf32>
    %cst_130 = arith.constant dense<0.000000e+00> : vector<16x64xf32>
    %371 = tpu.matmul %369, %370, %cst_130 {dimension_numbers = #tpu.dot_dimension_numbers<[1], [0], [0], [1], [0, 0, 1, 1], [], []>} : vector<16x32xf32>, vector<32x64xf32>, vector<16x64xf32> -> vector<16x64xf32>
    %372 = vector.extract_strided_slice %31 {offsets = [11, 0], sizes = [1, 64], strides = [1, 1]} : vector<16x96xf32> to vector<1x64xf32>
    %373 = vector.broadcast %372 : vector<1x64xf32> to vector<16x64xf32>
    %374 = arith.addf %371, %373 : vector<16x64xf32>
    %cst_131 = arith.constant 0.000000e+00 : f32
    %375 = vector.broadcast %cst_131 : f32 to vector<16x64xf32>
    %376 = arith.maximumf %374, %375 : vector<16x64xf32>
    %cst_132 = arith.constant dense<0.000000e+00> : vector<16x32xf32>
    %377 = tpu.matmul %376, %29, %cst_132 {dimension_numbers = #tpu.dot_dimension_numbers<[1], [0], [0], [1], [0, 0, 1, 1], [], []>} : vector<16x64xf32>, vector<64x32xf32>, vector<16x32xf32> -> vector<16x32xf32>
    %378 = arith.addf %345, %377 : vector<16x32xf32>
    %379 = vector.extract_strided_slice %31 {offsets = [12, 0], sizes = [1, 32], strides = [1, 1]} : vector<16x96xf32> to vector<1x32xf32>
    %380 = vector.broadcast %379 : vector<1x32xf32> to vector<16x32xf32>
    %381 = arith.addf %378, %380 : vector<16x32xf32>
    %c1 = arith.constant 1 : index
    %c0_133 = arith.constant 0 : index
    %c0_134 = arith.constant 0 : index
    %382 = vector.load %arg4[%c1, %c0_133, %c0_134] : memref<2x32x320xf32, #tpu.memory_space<vmem>>, vector<1x32x320xf32>
    %383 = vector.shape_cast %382 : vector<1x32x320xf32> to vector<32x320xf32>
    %c1_135 = arith.constant 1 : index
    %c0_136 = arith.constant 0 : index
    %c0_137 = arith.constant 0 : index
    %384 = vector.load %arg5[%c1_135, %c0_136, %c0_137] : memref<2x64x32xf32, #tpu.memory_space<vmem>>, vector<1x64x32xf32>
    %385 = vector.shape_cast %384 : vector<1x64x32xf32> to vector<64x32xf32>
    %c1_138 = arith.constant 1 : index
    %c0_139 = arith.constant 0 : index
    %c0_140 = arith.constant 0 : index
    %386 = vector.load %arg6[%c1_138, %c0_139, %c0_140] : memref<2x16x96xf32, #tpu.memory_space<vmem>>, vector<1x16x96xf32>
    %387 = vector.shape_cast %386 : vector<1x16x96xf32> to vector<16x96xf32>
    %388 = vector.extract_strided_slice %387 {offsets = [0, 0], sizes = [1, 32], strides = [1, 1]} : vector<16x96xf32> to vector<1x32xf32>
    %389 = vector.extract_strided_slice %387 {offsets = [3, 0], sizes = [1, 32], strides = [1, 1]} : vector<16x96xf32> to vector<1x32xf32>
    %cst_141 = arith.constant dense<0.000000e+00> : vector<16xf32>
    %390 = vector.multi_reduction <add>, %381, %cst_141 [1] : vector<16x32xf32> to vector<16xf32>
    %391 = vector.shape_cast %390 : vector<16xf32> to vector<16x1xf32>
    %cst_142 = arith.constant 3.200000e+01 : f32
    %392 = vector.broadcast %cst_142 : f32 to vector<16x1xf32>
    %393 = arith.divf %391, %392 : vector<16x1xf32>
    %394 = vector.broadcast %393 : vector<16x1xf32> to vector<16x32xf32>
    %395 = arith.subf %381, %394 : vector<16x32xf32>
    %396 = arith.mulf %395, %395 : vector<16x32xf32>
    %cst_143 = arith.constant dense<0.000000e+00> : vector<16xf32>
    %397 = vector.multi_reduction <add>, %396, %cst_143 [1] : vector<16x32xf32> to vector<16xf32>
    %398 = vector.shape_cast %397 : vector<16xf32> to vector<16x1xf32>
    %cst_144 = arith.constant 3.200000e+01 : f32
    %399 = vector.broadcast %cst_144 : f32 to vector<16x1xf32>
    %400 = arith.divf %398, %399 : vector<16x1xf32>
    %401 = vector.broadcast %393 : vector<16x1xf32> to vector<16x32xf32>
    %402 = arith.subf %381, %401 : vector<16x32xf32>
    %cst_145 = arith.constant 9.99999996E-13 : f32
    %403 = vector.broadcast %cst_145 : f32 to vector<16x1xf32>
    %404 = arith.addf %400, %403 : vector<16x1xf32>
    %405 = math.rsqrt %404 : vector<16x1xf32>
    %406 = vector.broadcast %405 : vector<16x1xf32> to vector<16x32xf32>
    %407 = arith.mulf %402, %406 : vector<16x32xf32>
    %408 = vector.broadcast %388 : vector<1x32xf32> to vector<16x32xf32>
    %409 = arith.mulf %407, %408 : vector<16x32xf32>
    %410 = vector.broadcast %389 : vector<1x32xf32> to vector<16x32xf32>
    %411 = arith.addf %409, %410 : vector<16x32xf32>
    %412 = vector.extract_strided_slice %383 {offsets = [0, 0], sizes = [32, 96], strides = [1, 1]} : vector<32x320xf32> to vector<32x96xf32>
    %cst_146 = arith.constant dense<0.000000e+00> : vector<16x96xf32>
    %413 = tpu.matmul %411, %412, %cst_146 {dimension_numbers = #tpu.dot_dimension_numbers<[1], [0], [0], [1], [0, 0, 1, 1], [], []>} : vector<16x32xf32>, vector<32x96xf32>, vector<16x96xf32> -> vector<16x96xf32>
    %414 = vector.extract_strided_slice %387 {offsets = [6, 0], sizes = [1, 96], strides = [1, 1]} : vector<16x96xf32> to vector<1x96xf32>
    %415 = vector.broadcast %414 : vector<1x96xf32> to vector<16x96xf32>
    %416 = arith.addf %413, %415 : vector<16x96xf32>
    %417 = vector.extract_strided_slice %383 {offsets = [0, 96], sizes = [32, 32], strides = [1, 1]} : vector<32x320xf32> to vector<32x32xf32>
    %418 = vector.extract_strided_slice %416 {offsets = [0, 0], sizes = [8, 96], strides = [1, 1]} : vector<16x96xf32> to vector<8x96xf32>
    %419 = vector.extract_strided_slice %418 {offsets = [0, 0], sizes = [8, 8], strides = [1, 1]} : vector<8x96xf32> to vector<8x8xf32>
    %420 = vector.extract_strided_slice %418 {offsets = [0, 32], sizes = [8, 8], strides = [1, 1]} : vector<8x96xf32> to vector<8x8xf32>
    %421 = vector.extract_strided_slice %418 {offsets = [0, 64], sizes = [8, 8], strides = [1, 1]} : vector<8x96xf32> to vector<8x8xf32>
    %cst_147 = arith.constant dense<0.000000e+00> : vector<8x8xf32>
    %422 = tpu.matmul %419, %420, %cst_147 {dimension_numbers = #tpu.dot_dimension_numbers<[1], [1], [0], [0], [0, 0, 1, 0], [], []>} : vector<8x8xf32>, vector<8x8xf32>, vector<8x8xf32> -> vector<8x8xf32>
    %cst_148 = arith.constant 0.353553385 : f32
    %423 = vector.broadcast %cst_148 : f32 to vector<8x8xf32>
    %424 = arith.mulf %422, %423 : vector<8x8xf32>
    %cst_149 = arith.constant -1.000000e+09 : f32
    %425 = vector.broadcast %cst_149 : f32 to vector<8x8xf32>
    %426 = arith.select %16, %424, %425 : vector<8x8xi1>, vector<8x8xf32>
    %cst_150 = arith.constant dense<0xFF800000> : vector<8xf32>
    %427 = vector.multi_reduction <maximumf>, %426, %cst_150 [1] : vector<8x8xf32> to vector<8xf32>
    %428 = vector.shape_cast %427 : vector<8xf32> to vector<8x1xf32>
    %429 = vector.broadcast %428 : vector<8x1xf32> to vector<8x8xf32>
    %430 = arith.subf %426, %429 : vector<8x8xf32>
    %431 = math.exp %430 : vector<8x8xf32>
    %cst_151 = arith.constant dense<0.000000e+00> : vector<8xf32>
    %432 = vector.multi_reduction <add>, %431, %cst_151 [1] : vector<8x8xf32> to vector<8xf32>
    %433 = vector.shape_cast %432 : vector<8xf32> to vector<8x1xf32>
    %434 = tpu.reciprocal %433 {approx = true} : vector<8x1xf32> -> vector<8x1xf32>
    %435 = vector.broadcast %434 : vector<8x1xf32> to vector<8x8xf32>
    %436 = arith.mulf %431, %435 : vector<8x8xf32>
    %cst_152 = arith.constant 0.000000e+00 : f32
    %437 = vector.broadcast %cst_152 : f32 to vector<8x8xf32>
    %438 = arith.select %16, %436, %437 : vector<8x8xi1>, vector<8x8xf32>
    %cst_153 = arith.constant dense<0.000000e+00> : vector<8x8xf32>
    %439 = tpu.matmul %438, %421, %cst_153 {dimension_numbers = #tpu.dot_dimension_numbers<[1], [0], [0], [1], [0, 0, 1, 1], [], []>} : vector<8x8xf32>, vector<8x8xf32>, vector<8x8xf32> -> vector<8x8xf32>
    %440 = vector.extract_strided_slice %417 {offsets = [0, 0], sizes = [8, 32], strides = [1, 1]} : vector<32x32xf32> to vector<8x32xf32>
    %cst_154 = arith.constant dense<0.000000e+00> : vector<8x32xf32>
    %441 = tpu.matmul %439, %440, %cst_154 {dimension_numbers = #tpu.dot_dimension_numbers<[1], [0], [0], [1], [0, 0, 1, 1], [], []>} : vector<8x8xf32>, vector<8x32xf32>, vector<8x32xf32> -> vector<8x32xf32>
    %442 = vector.extract_strided_slice %418 {offsets = [0, 8], sizes = [8, 8], strides = [1, 1]} : vector<8x96xf32> to vector<8x8xf32>
    %443 = vector.extract_strided_slice %418 {offsets = [0, 40], sizes = [8, 8], strides = [1, 1]} : vector<8x96xf32> to vector<8x8xf32>
    %444 = vector.extract_strided_slice %418 {offsets = [0, 72], sizes = [8, 8], strides = [1, 1]} : vector<8x96xf32> to vector<8x8xf32>
    %cst_155 = arith.constant dense<0.000000e+00> : vector<8x8xf32>
    %445 = tpu.matmul %442, %443, %cst_155 {dimension_numbers = #tpu.dot_dimension_numbers<[1], [1], [0], [0], [0, 0, 1, 0], [], []>} : vector<8x8xf32>, vector<8x8xf32>, vector<8x8xf32> -> vector<8x8xf32>
    %cst_156 = arith.constant 0.353553385 : f32
    %446 = vector.broadcast %cst_156 : f32 to vector<8x8xf32>
    %447 = arith.mulf %445, %446 : vector<8x8xf32>
    %cst_157 = arith.constant -1.000000e+09 : f32
    %448 = vector.broadcast %cst_157 : f32 to vector<8x8xf32>
    %449 = arith.select %16, %447, %448 : vector<8x8xi1>, vector<8x8xf32>
    %cst_158 = arith.constant dense<0xFF800000> : vector<8xf32>
    %450 = vector.multi_reduction <maximumf>, %449, %cst_158 [1] : vector<8x8xf32> to vector<8xf32>
    %451 = vector.shape_cast %450 : vector<8xf32> to vector<8x1xf32>
    %452 = vector.broadcast %451 : vector<8x1xf32> to vector<8x8xf32>
    %453 = arith.subf %449, %452 : vector<8x8xf32>
    %454 = math.exp %453 : vector<8x8xf32>
    %cst_159 = arith.constant dense<0.000000e+00> : vector<8xf32>
    %455 = vector.multi_reduction <add>, %454, %cst_159 [1] : vector<8x8xf32> to vector<8xf32>
    %456 = vector.shape_cast %455 : vector<8xf32> to vector<8x1xf32>
    %457 = tpu.reciprocal %456 {approx = true} : vector<8x1xf32> -> vector<8x1xf32>
    %458 = vector.broadcast %457 : vector<8x1xf32> to vector<8x8xf32>
    %459 = arith.mulf %454, %458 : vector<8x8xf32>
    %cst_160 = arith.constant 0.000000e+00 : f32
    %460 = vector.broadcast %cst_160 : f32 to vector<8x8xf32>
    %461 = arith.select %16, %459, %460 : vector<8x8xi1>, vector<8x8xf32>
    %cst_161 = arith.constant dense<0.000000e+00> : vector<8x8xf32>
    %462 = tpu.matmul %461, %444, %cst_161 {dimension_numbers = #tpu.dot_dimension_numbers<[1], [0], [0], [1], [0, 0, 1, 1], [], []>} : vector<8x8xf32>, vector<8x8xf32>, vector<8x8xf32> -> vector<8x8xf32>
    %463 = vector.extract_strided_slice %417 {offsets = [8, 0], sizes = [8, 32], strides = [1, 1]} : vector<32x32xf32> to vector<8x32xf32>
    %cst_162 = arith.constant dense<0.000000e+00> : vector<8x32xf32>
    %464 = tpu.matmul %462, %463, %cst_162 {dimension_numbers = #tpu.dot_dimension_numbers<[1], [0], [0], [1], [0, 0, 1, 1], [], []>} : vector<8x8xf32>, vector<8x32xf32>, vector<8x32xf32> -> vector<8x32xf32>
    %465 = arith.addf %441, %464 : vector<8x32xf32>
    %466 = vector.extract_strided_slice %418 {offsets = [0, 16], sizes = [8, 8], strides = [1, 1]} : vector<8x96xf32> to vector<8x8xf32>
    %467 = vector.extract_strided_slice %418 {offsets = [0, 48], sizes = [8, 8], strides = [1, 1]} : vector<8x96xf32> to vector<8x8xf32>
    %468 = vector.extract_strided_slice %418 {offsets = [0, 80], sizes = [8, 8], strides = [1, 1]} : vector<8x96xf32> to vector<8x8xf32>
    %cst_163 = arith.constant dense<0.000000e+00> : vector<8x8xf32>
    %469 = tpu.matmul %466, %467, %cst_163 {dimension_numbers = #tpu.dot_dimension_numbers<[1], [1], [0], [0], [0, 0, 1, 0], [], []>} : vector<8x8xf32>, vector<8x8xf32>, vector<8x8xf32> -> vector<8x8xf32>
    %cst_164 = arith.constant 0.353553385 : f32
    %470 = vector.broadcast %cst_164 : f32 to vector<8x8xf32>
    %471 = arith.mulf %469, %470 : vector<8x8xf32>
    %cst_165 = arith.constant -1.000000e+09 : f32
    %472 = vector.broadcast %cst_165 : f32 to vector<8x8xf32>
    %473 = arith.select %16, %471, %472 : vector<8x8xi1>, vector<8x8xf32>
    %cst_166 = arith.constant dense<0xFF800000> : vector<8xf32>
    %474 = vector.multi_reduction <maximumf>, %473, %cst_166 [1] : vector<8x8xf32> to vector<8xf32>
    %475 = vector.shape_cast %474 : vector<8xf32> to vector<8x1xf32>
    %476 = vector.broadcast %475 : vector<8x1xf32> to vector<8x8xf32>
    %477 = arith.subf %473, %476 : vector<8x8xf32>
    %478 = math.exp %477 : vector<8x8xf32>
    %cst_167 = arith.constant dense<0.000000e+00> : vector<8xf32>
    %479 = vector.multi_reduction <add>, %478, %cst_167 [1] : vector<8x8xf32> to vector<8xf32>
    %480 = vector.shape_cast %479 : vector<8xf32> to vector<8x1xf32>
    %481 = tpu.reciprocal %480 {approx = true} : vector<8x1xf32> -> vector<8x1xf32>
    %482 = vector.broadcast %481 : vector<8x1xf32> to vector<8x8xf32>
    %483 = arith.mulf %478, %482 : vector<8x8xf32>
    %cst_168 = arith.constant 0.000000e+00 : f32
    %484 = vector.broadcast %cst_168 : f32 to vector<8x8xf32>
    %485 = arith.select %16, %483, %484 : vector<8x8xi1>, vector<8x8xf32>
    %cst_169 = arith.constant dense<0.000000e+00> : vector<8x8xf32>
    %486 = tpu.matmul %485, %468, %cst_169 {dimension_numbers = #tpu.dot_dimension_numbers<[1], [0], [0], [1], [0, 0, 1, 1], [], []>} : vector<8x8xf32>, vector<8x8xf32>, vector<8x8xf32> -> vector<8x8xf32>
    %487 = vector.extract_strided_slice %417 {offsets = [16, 0], sizes = [8, 32], strides = [1, 1]} : vector<32x32xf32> to vector<8x32xf32>
    %cst_170 = arith.constant dense<0.000000e+00> : vector<8x32xf32>
    %488 = tpu.matmul %486, %487, %cst_170 {dimension_numbers = #tpu.dot_dimension_numbers<[1], [0], [0], [1], [0, 0, 1, 1], [], []>} : vector<8x8xf32>, vector<8x32xf32>, vector<8x32xf32> -> vector<8x32xf32>
    %489 = arith.addf %465, %488 : vector<8x32xf32>
    %490 = vector.extract_strided_slice %418 {offsets = [0, 24], sizes = [8, 8], strides = [1, 1]} : vector<8x96xf32> to vector<8x8xf32>
    %491 = vector.extract_strided_slice %418 {offsets = [0, 56], sizes = [8, 8], strides = [1, 1]} : vector<8x96xf32> to vector<8x8xf32>
    %492 = vector.extract_strided_slice %418 {offsets = [0, 88], sizes = [8, 8], strides = [1, 1]} : vector<8x96xf32> to vector<8x8xf32>
    %cst_171 = arith.constant dense<0.000000e+00> : vector<8x8xf32>
    %493 = tpu.matmul %490, %491, %cst_171 {dimension_numbers = #tpu.dot_dimension_numbers<[1], [1], [0], [0], [0, 0, 1, 0], [], []>} : vector<8x8xf32>, vector<8x8xf32>, vector<8x8xf32> -> vector<8x8xf32>
    %cst_172 = arith.constant 0.353553385 : f32
    %494 = vector.broadcast %cst_172 : f32 to vector<8x8xf32>
    %495 = arith.mulf %493, %494 : vector<8x8xf32>
    %cst_173 = arith.constant -1.000000e+09 : f32
    %496 = vector.broadcast %cst_173 : f32 to vector<8x8xf32>
    %497 = arith.select %16, %495, %496 : vector<8x8xi1>, vector<8x8xf32>
    %cst_174 = arith.constant dense<0xFF800000> : vector<8xf32>
    %498 = vector.multi_reduction <maximumf>, %497, %cst_174 [1] : vector<8x8xf32> to vector<8xf32>
    %499 = vector.shape_cast %498 : vector<8xf32> to vector<8x1xf32>
    %500 = vector.broadcast %499 : vector<8x1xf32> to vector<8x8xf32>
    %501 = arith.subf %497, %500 : vector<8x8xf32>
    %502 = math.exp %501 : vector<8x8xf32>
    %cst_175 = arith.constant dense<0.000000e+00> : vector<8xf32>
    %503 = vector.multi_reduction <add>, %502, %cst_175 [1] : vector<8x8xf32> to vector<8xf32>
    %504 = vector.shape_cast %503 : vector<8xf32> to vector<8x1xf32>
    %505 = tpu.reciprocal %504 {approx = true} : vector<8x1xf32> -> vector<8x1xf32>
    %506 = vector.broadcast %505 : vector<8x1xf32> to vector<8x8xf32>
    %507 = arith.mulf %502, %506 : vector<8x8xf32>
    %cst_176 = arith.constant 0.000000e+00 : f32
    %508 = vector.broadcast %cst_176 : f32 to vector<8x8xf32>
    %509 = arith.select %16, %507, %508 : vector<8x8xi1>, vector<8x8xf32>
    %cst_177 = arith.constant dense<0.000000e+00> : vector<8x8xf32>
    %510 = tpu.matmul %509, %492, %cst_177 {dimension_numbers = #tpu.dot_dimension_numbers<[1], [0], [0], [1], [0, 0, 1, 1], [], []>} : vector<8x8xf32>, vector<8x8xf32>, vector<8x8xf32> -> vector<8x8xf32>
    %511 = vector.extract_strided_slice %417 {offsets = [24, 0], sizes = [8, 32], strides = [1, 1]} : vector<32x32xf32> to vector<8x32xf32>
    %cst_178 = arith.constant dense<0.000000e+00> : vector<8x32xf32>
    %512 = tpu.matmul %510, %511, %cst_178 {dimension_numbers = #tpu.dot_dimension_numbers<[1], [0], [0], [1], [0, 0, 1, 1], [], []>} : vector<8x8xf32>, vector<8x32xf32>, vector<8x32xf32> -> vector<8x32xf32>
    %513 = arith.addf %489, %512 : vector<8x32xf32>
    %c0_179 = arith.constant 0 : index
    %c0_180 = arith.constant 0 : index
    %514 = vector.load %arg8[%c0_179, %c0_180] : memref<16x32xf32, #tpu.memory_space<vmem>>, vector<8x32xf32>
    tpu.vector_store %arg8[%c0_179, %c0_180], %513 {strides = array<i32>} : memref<16x32xf32, #tpu.memory_space<vmem>>, vector<8x32xf32>,
    %515 = vector.extract_strided_slice %416 {offsets = [8, 0], sizes = [8, 96], strides = [1, 1]} : vector<16x96xf32> to vector<8x96xf32>
    %516 = vector.extract_strided_slice %515 {offsets = [0, 0], sizes = [8, 8], strides = [1, 1]} : vector<8x96xf32> to vector<8x8xf32>
    %517 = vector.extract_strided_slice %515 {offsets = [0, 32], sizes = [8, 8], strides = [1, 1]} : vector<8x96xf32> to vector<8x8xf32>
    %518 = vector.extract_strided_slice %515 {offsets = [0, 64], sizes = [8, 8], strides = [1, 1]} : vector<8x96xf32> to vector<8x8xf32>
    %cst_181 = arith.constant dense<0.000000e+00> : vector<8x8xf32>
    %519 = tpu.matmul %516, %517, %cst_181 {dimension_numbers = #tpu.dot_dimension_numbers<[1], [1], [0], [0], [0, 0, 1, 0], [], []>} : vector<8x8xf32>, vector<8x8xf32>, vector<8x8xf32> -> vector<8x8xf32>
    %cst_182 = arith.constant 0.353553385 : f32
    %520 = vector.broadcast %cst_182 : f32 to vector<8x8xf32>
    %521 = arith.mulf %519, %520 : vector<8x8xf32>
    %cst_183 = arith.constant -1.000000e+09 : f32
    %522 = vector.broadcast %cst_183 : f32 to vector<8x8xf32>
    %523 = arith.select %22, %521, %522 : vector<8x8xi1>, vector<8x8xf32>
    %cst_184 = arith.constant dense<0xFF800000> : vector<8xf32>
    %524 = vector.multi_reduction <maximumf>, %523, %cst_184 [1] : vector<8x8xf32> to vector<8xf32>
    %525 = vector.shape_cast %524 : vector<8xf32> to vector<8x1xf32>
    %526 = vector.broadcast %525 : vector<8x1xf32> to vector<8x8xf32>
    %527 = arith.subf %523, %526 : vector<8x8xf32>
    %528 = math.exp %527 : vector<8x8xf32>
    %cst_185 = arith.constant dense<0.000000e+00> : vector<8xf32>
    %529 = vector.multi_reduction <add>, %528, %cst_185 [1] : vector<8x8xf32> to vector<8xf32>
    %530 = vector.shape_cast %529 : vector<8xf32> to vector<8x1xf32>
    %531 = tpu.reciprocal %530 {approx = true} : vector<8x1xf32> -> vector<8x1xf32>
    %532 = vector.broadcast %531 : vector<8x1xf32> to vector<8x8xf32>
    %533 = arith.mulf %528, %532 : vector<8x8xf32>
    %cst_186 = arith.constant 0.000000e+00 : f32
    %534 = vector.broadcast %cst_186 : f32 to vector<8x8xf32>
    %535 = arith.select %22, %533, %534 : vector<8x8xi1>, vector<8x8xf32>
    %cst_187 = arith.constant dense<0.000000e+00> : vector<8x8xf32>
    %536 = tpu.matmul %535, %518, %cst_187 {dimension_numbers = #tpu.dot_dimension_numbers<[1], [0], [0], [1], [0, 0, 1, 1], [], []>} : vector<8x8xf32>, vector<8x8xf32>, vector<8x8xf32> -> vector<8x8xf32>
    %537 = vector.extract_strided_slice %417 {offsets = [0, 0], sizes = [8, 32], strides = [1, 1]} : vector<32x32xf32> to vector<8x32xf32>
    %cst_188 = arith.constant dense<0.000000e+00> : vector<8x32xf32>
    %538 = tpu.matmul %536, %537, %cst_188 {dimension_numbers = #tpu.dot_dimension_numbers<[1], [0], [0], [1], [0, 0, 1, 1], [], []>} : vector<8x8xf32>, vector<8x32xf32>, vector<8x32xf32> -> vector<8x32xf32>
    %539 = vector.extract_strided_slice %515 {offsets = [0, 8], sizes = [8, 8], strides = [1, 1]} : vector<8x96xf32> to vector<8x8xf32>
    %540 = vector.extract_strided_slice %515 {offsets = [0, 40], sizes = [8, 8], strides = [1, 1]} : vector<8x96xf32> to vector<8x8xf32>
    %541 = vector.extract_strided_slice %515 {offsets = [0, 72], sizes = [8, 8], strides = [1, 1]} : vector<8x96xf32> to vector<8x8xf32>
    %cst_189 = arith.constant dense<0.000000e+00> : vector<8x8xf32>
    %542 = tpu.matmul %539, %540, %cst_189 {dimension_numbers = #tpu.dot_dimension_numbers<[1], [1], [0], [0], [0, 0, 1, 0], [], []>} : vector<8x8xf32>, vector<8x8xf32>, vector<8x8xf32> -> vector<8x8xf32>
    %cst_190 = arith.constant 0.353553385 : f32
    %543 = vector.broadcast %cst_190 : f32 to vector<8x8xf32>
    %544 = arith.mulf %542, %543 : vector<8x8xf32>
    %cst_191 = arith.constant -1.000000e+09 : f32
    %545 = vector.broadcast %cst_191 : f32 to vector<8x8xf32>
    %546 = arith.select %22, %544, %545 : vector<8x8xi1>, vector<8x8xf32>
    %cst_192 = arith.constant dense<0xFF800000> : vector<8xf32>
    %547 = vector.multi_reduction <maximumf>, %546, %cst_192 [1] : vector<8x8xf32> to vector<8xf32>
    %548 = vector.shape_cast %547 : vector<8xf32> to vector<8x1xf32>
    %549 = vector.broadcast %548 : vector<8x1xf32> to vector<8x8xf32>
    %550 = arith.subf %546, %549 : vector<8x8xf32>
    %551 = math.exp %550 : vector<8x8xf32>
    %cst_193 = arith.constant dense<0.000000e+00> : vector<8xf32>
    %552 = vector.multi_reduction <add>, %551, %cst_193 [1] : vector<8x8xf32> to vector<8xf32>
    %553 = vector.shape_cast %552 : vector<8xf32> to vector<8x1xf32>
    %554 = tpu.reciprocal %553 {approx = true} : vector<8x1xf32> -> vector<8x1xf32>
    %555 = vector.broadcast %554 : vector<8x1xf32> to vector<8x8xf32>
    %556 = arith.mulf %551, %555 : vector<8x8xf32>
    %cst_194 = arith.constant 0.000000e+00 : f32
    %557 = vector.broadcast %cst_194 : f32 to vector<8x8xf32>
    %558 = arith.select %22, %556, %557 : vector<8x8xi1>, vector<8x8xf32>
    %cst_195 = arith.constant dense<0.000000e+00> : vector<8x8xf32>
    %559 = tpu.matmul %558, %541, %cst_195 {dimension_numbers = #tpu.dot_dimension_numbers<[1], [0], [0], [1], [0, 0, 1, 1], [], []>} : vector<8x8xf32>, vector<8x8xf32>, vector<8x8xf32> -> vector<8x8xf32>
    %560 = vector.extract_strided_slice %417 {offsets = [8, 0], sizes = [8, 32], strides = [1, 1]} : vector<32x32xf32> to vector<8x32xf32>
    %cst_196 = arith.constant dense<0.000000e+00> : vector<8x32xf32>
    %561 = tpu.matmul %559, %560, %cst_196 {dimension_numbers = #tpu.dot_dimension_numbers<[1], [0], [0], [1], [0, 0, 1, 1], [], []>} : vector<8x8xf32>, vector<8x32xf32>, vector<8x32xf32> -> vector<8x32xf32>
    %562 = arith.addf %538, %561 : vector<8x32xf32>
    %563 = vector.extract_strided_slice %515 {offsets = [0, 16], sizes = [8, 8], strides = [1, 1]} : vector<8x96xf32> to vector<8x8xf32>
    %564 = vector.extract_strided_slice %515 {offsets = [0, 48], sizes = [8, 8], strides = [1, 1]} : vector<8x96xf32> to vector<8x8xf32>
    %565 = vector.extract_strided_slice %515 {offsets = [0, 80], sizes = [8, 8], strides = [1, 1]} : vector<8x96xf32> to vector<8x8xf32>
    %cst_197 = arith.constant dense<0.000000e+00> : vector<8x8xf32>
    %566 = tpu.matmul %563, %564, %cst_197 {dimension_numbers = #tpu.dot_dimension_numbers<[1], [1], [0], [0], [0, 0, 1, 0], [], []>} : vector<8x8xf32>, vector<8x8xf32>, vector<8x8xf32> -> vector<8x8xf32>
    %cst_198 = arith.constant 0.353553385 : f32
    %567 = vector.broadcast %cst_198 : f32 to vector<8x8xf32>
    %568 = arith.mulf %566, %567 : vector<8x8xf32>
    %cst_199 = arith.constant -1.000000e+09 : f32
    %569 = vector.broadcast %cst_199 : f32 to vector<8x8xf32>
    %570 = arith.select %22, %568, %569 : vector<8x8xi1>, vector<8x8xf32>
    %cst_200 = arith.constant dense<0xFF800000> : vector<8xf32>
    %571 = vector.multi_reduction <maximumf>, %570, %cst_200 [1] : vector<8x8xf32> to vector<8xf32>
    %572 = vector.shape_cast %571 : vector<8xf32> to vector<8x1xf32>
    %573 = vector.broadcast %572 : vector<8x1xf32> to vector<8x8xf32>
    %574 = arith.subf %570, %573 : vector<8x8xf32>
    %575 = math.exp %574 : vector<8x8xf32>
    %cst_201 = arith.constant dense<0.000000e+00> : vector<8xf32>
    %576 = vector.multi_reduction <add>, %575, %cst_201 [1] : vector<8x8xf32> to vector<8xf32>
    %577 = vector.shape_cast %576 : vector<8xf32> to vector<8x1xf32>
    %578 = tpu.reciprocal %577 {approx = true} : vector<8x1xf32> -> vector<8x1xf32>
    %579 = vector.broadcast %578 : vector<8x1xf32> to vector<8x8xf32>
    %580 = arith.mulf %575, %579 : vector<8x8xf32>
    %cst_202 = arith.constant 0.000000e+00 : f32
    %581 = vector.broadcast %cst_202 : f32 to vector<8x8xf32>
    %582 = arith.select %22, %580, %581 : vector<8x8xi1>, vector<8x8xf32>
    %cst_203 = arith.constant dense<0.000000e+00> : vector<8x8xf32>
    %583 = tpu.matmul %582, %565, %cst_203 {dimension_numbers = #tpu.dot_dimension_numbers<[1], [0], [0], [1], [0, 0, 1, 1], [], []>} : vector<8x8xf32>, vector<8x8xf32>, vector<8x8xf32> -> vector<8x8xf32>
    %584 = vector.extract_strided_slice %417 {offsets = [16, 0], sizes = [8, 32], strides = [1, 1]} : vector<32x32xf32> to vector<8x32xf32>
    %cst_204 = arith.constant dense<0.000000e+00> : vector<8x32xf32>
    %585 = tpu.matmul %583, %584, %cst_204 {dimension_numbers = #tpu.dot_dimension_numbers<[1], [0], [0], [1], [0, 0, 1, 1], [], []>} : vector<8x8xf32>, vector<8x32xf32>, vector<8x32xf32> -> vector<8x32xf32>
    %586 = arith.addf %562, %585 : vector<8x32xf32>
    %587 = vector.extract_strided_slice %515 {offsets = [0, 24], sizes = [8, 8], strides = [1, 1]} : vector<8x96xf32> to vector<8x8xf32>
    %588 = vector.extract_strided_slice %515 {offsets = [0, 56], sizes = [8, 8], strides = [1, 1]} : vector<8x96xf32> to vector<8x8xf32>
    %589 = vector.extract_strided_slice %515 {offsets = [0, 88], sizes = [8, 8], strides = [1, 1]} : vector<8x96xf32> to vector<8x8xf32>
    %cst_205 = arith.constant dense<0.000000e+00> : vector<8x8xf32>
    %590 = tpu.matmul %587, %588, %cst_205 {dimension_numbers = #tpu.dot_dimension_numbers<[1], [1], [0], [0], [0, 0, 1, 0], [], []>} : vector<8x8xf32>, vector<8x8xf32>, vector<8x8xf32> -> vector<8x8xf32>
    %cst_206 = arith.constant 0.353553385 : f32
    %591 = vector.broadcast %cst_206 : f32 to vector<8x8xf32>
    %592 = arith.mulf %590, %591 : vector<8x8xf32>
    %cst_207 = arith.constant -1.000000e+09 : f32
    %593 = vector.broadcast %cst_207 : f32 to vector<8x8xf32>
    %594 = arith.select %22, %592, %593 : vector<8x8xi1>, vector<8x8xf32>
    %cst_208 = arith.constant dense<0xFF800000> : vector<8xf32>
    %595 = vector.multi_reduction <maximumf>, %594, %cst_208 [1] : vector<8x8xf32> to vector<8xf32>
    %596 = vector.shape_cast %595 : vector<8xf32> to vector<8x1xf32>
    %597 = vector.broadcast %596 : vector<8x1xf32> to vector<8x8xf32>
    %598 = arith.subf %594, %597 : vector<8x8xf32>
    %599 = math.exp %598 : vector<8x8xf32>
    %cst_209 = arith.constant dense<0.000000e+00> : vector<8xf32>
    %600 = vector.multi_reduction <add>, %599, %cst_209 [1] : vector<8x8xf32> to vector<8xf32>
    %601 = vector.shape_cast %600 : vector<8xf32> to vector<8x1xf32>
    %602 = tpu.reciprocal %601 {approx = true} : vector<8x1xf32> -> vector<8x1xf32>
    %603 = vector.broadcast %602 : vector<8x1xf32> to vector<8x8xf32>
    %604 = arith.mulf %599, %603 : vector<8x8xf32>
    %cst_210 = arith.constant 0.000000e+00 : f32
    %605 = vector.broadcast %cst_210 : f32 to vector<8x8xf32>
    %606 = arith.select %22, %604, %605 : vector<8x8xi1>, vector<8x8xf32>
    %cst_211 = arith.constant dense<0.000000e+00> : vector<8x8xf32>
    %607 = tpu.matmul %606, %589, %cst_211 {dimension_numbers = #tpu.dot_dimension_numbers<[1], [0], [0], [1], [0, 0, 1, 1], [], []>} : vector<8x8xf32>, vector<8x8xf32>, vector<8x8xf32> -> vector<8x8xf32>
    %608 = vector.extract_strided_slice %417 {offsets = [24, 0], sizes = [8, 32], strides = [1, 1]} : vector<32x32xf32> to vector<8x32xf32>
    %cst_212 = arith.constant dense<0.000000e+00> : vector<8x32xf32>
    %609 = tpu.matmul %607, %608, %cst_212 {dimension_numbers = #tpu.dot_dimension_numbers<[1], [0], [0], [1], [0, 0, 1, 1], [], []>} : vector<8x8xf32>, vector<8x32xf32>, vector<8x32xf32> -> vector<8x32xf32>
    %610 = arith.addf %586, %609 : vector<8x32xf32>
    %c8_213 = arith.constant 8 : index
    %c0_214 = arith.constant 0 : index
    %611 = vector.load %arg8[%c8_213, %c0_214] : memref<16x32xf32, #tpu.memory_space<vmem>>, vector<8x32xf32>
    tpu.vector_store %arg8[%c8_213, %c0_214], %610 {strides = array<i32>} : memref<16x32xf32, #tpu.memory_space<vmem>>, vector<8x32xf32>,
    %c0_215 = arith.constant 0 : index
    %c0_216 = arith.constant 0 : index
    %612 = vector.load %arg8[%c0_215, %c0_216] : memref<16x32xf32, #tpu.memory_space<vmem>>, vector<16x32xf32>
    %613 = arith.addf %381, %612 : vector<16x32xf32>
    %614 = vector.extract_strided_slice %387 {offsets = [7, 0], sizes = [1, 32], strides = [1, 1]} : vector<16x96xf32> to vector<1x32xf32>
    %615 = vector.broadcast %614 : vector<1x32xf32> to vector<16x32xf32>
    %616 = arith.addf %613, %615 : vector<16x32xf32>
    %617 = vector.extract_strided_slice %387 {offsets = [1, 0], sizes = [1, 32], strides = [1, 1]} : vector<16x96xf32> to vector<1x32xf32>
    %618 = vector.extract_strided_slice %387 {offsets = [4, 0], sizes = [1, 32], strides = [1, 1]} : vector<16x96xf32> to vector<1x32xf32>
    %cst_217 = arith.constant dense<0.000000e+00> : vector<16xf32>
    %619 = vector.multi_reduction <add>, %616, %cst_217 [1] : vector<16x32xf32> to vector<16xf32>
    %620 = vector.shape_cast %619 : vector<16xf32> to vector<16x1xf32>
    %cst_218 = arith.constant 3.200000e+01 : f32
    %621 = vector.broadcast %cst_218 : f32 to vector<16x1xf32>
    %622 = arith.divf %620, %621 : vector<16x1xf32>
    %623 = vector.broadcast %622 : vector<16x1xf32> to vector<16x32xf32>
    %624 = arith.subf %616, %623 : vector<16x32xf32>
    %625 = arith.mulf %624, %624 : vector<16x32xf32>
    %cst_219 = arith.constant dense<0.000000e+00> : vector<16xf32>
    %626 = vector.multi_reduction <add>, %625, %cst_219 [1] : vector<16x32xf32> to vector<16xf32>
    %627 = vector.shape_cast %626 : vector<16xf32> to vector<16x1xf32>
    %cst_220 = arith.constant 3.200000e+01 : f32
    %628 = vector.broadcast %cst_220 : f32 to vector<16x1xf32>
    %629 = arith.divf %627, %628 : vector<16x1xf32>
    %630 = vector.broadcast %622 : vector<16x1xf32> to vector<16x32xf32>
    %631 = arith.subf %616, %630 : vector<16x32xf32>
    %cst_221 = arith.constant 9.99999996E-13 : f32
    %632 = vector.broadcast %cst_221 : f32 to vector<16x1xf32>
    %633 = arith.addf %629, %632 : vector<16x1xf32>
    %634 = math.rsqrt %633 : vector<16x1xf32>
    %635 = vector.broadcast %634 : vector<16x1xf32> to vector<16x32xf32>
    %636 = arith.mulf %631, %635 : vector<16x32xf32>
    %637 = vector.broadcast %617 : vector<1x32xf32> to vector<16x32xf32>
    %638 = arith.mulf %636, %637 : vector<16x32xf32>
    %639 = vector.broadcast %618 : vector<1x32xf32> to vector<16x32xf32>
    %640 = arith.addf %638, %639 : vector<16x32xf32>
    %641 = vector.extract_strided_slice %383 {offsets = [0, 128], sizes = [32, 32], strides = [1, 1]} : vector<32x320xf32> to vector<32x32xf32>
    %cst_222 = arith.constant dense<0.000000e+00> : vector<16x32xf32>
    %642 = tpu.matmul %640, %641, %cst_222 {dimension_numbers = #tpu.dot_dimension_numbers<[1], [0], [0], [1], [0, 0, 1, 1], [], []>} : vector<16x32xf32>, vector<32x32xf32>, vector<16x32xf32> -> vector<16x32xf32>
    %643 = vector.extract_strided_slice %387 {offsets = [8, 0], sizes = [1, 32], strides = [1, 1]} : vector<16x96xf32> to vector<1x32xf32>
    %644 = vector.broadcast %643 : vector<1x32xf32> to vector<16x32xf32>
    %645 = arith.addf %642, %644 : vector<16x32xf32>
    %646 = vector.extract_strided_slice %383 {offsets = [0, 160], sizes = [32, 64], strides = [1, 1]} : vector<32x320xf32> to vector<32x64xf32>
    %cst_223 = arith.constant dense<0.000000e+00> : vector<32x64xf32>
    %647 = tpu.matmul %12, %646, %cst_223 {dimension_numbers = #tpu.dot_dimension_numbers<[1], [0], [0], [1], [0, 0, 1, 1], [], []>} : vector<32x32xf32>, vector<32x64xf32>, vector<32x64xf32> -> vector<32x64xf32>
    %648 = vector.extract_strided_slice %387 {offsets = [9, 0], sizes = [1, 64], strides = [1, 1]} : vector<16x96xf32> to vector<1x64xf32>
    %649 = vector.broadcast %648 : vector<1x64xf32> to vector<32x64xf32>
    %650 = arith.addf %647, %649 : vector<32x64xf32>
    %651 = vector.extract_strided_slice %645 {offsets = [0, 0], sizes = [8, 32], strides = [1, 1]} : vector<16x32xf32> to vector<8x32xf32>
    %652 = vector.extract_strided_slice %650 {offsets = [0, 0], sizes = [16, 32], strides = [1, 1]} : vector<32x64xf32> to vector<16x32xf32>
    %653 = vector.extract_strided_slice %650 {offsets = [0, 32], sizes = [16, 32], strides = [1, 1]} : vector<32x64xf32> to vector<16x32xf32>
    %cst_224 = arith.constant dense<0.000000e+00> : vector<8x16xf32>
    %654 = tpu.matmul %651, %652, %cst_224 {dimension_numbers = #tpu.dot_dimension_numbers<[1], [1], [0], [0], [0, 0, 1, 0], [], []>} : vector<8x32xf32>, vector<16x32xf32>, vector<8x16xf32> -> vector<8x16xf32>
    %cst_225 = arith.constant 0.176776692 : f32
    %655 = vector.broadcast %cst_225 : f32 to vector<8x16xf32>
    %656 = arith.mulf %654, %655 : vector<8x16xf32>
    %cst_226 = arith.constant -1.000000e+09 : f32
    %657 = vector.broadcast %cst_226 : f32 to vector<8x16xf32>
    %658 = arith.select %19, %656, %657 : vector<8x16xi1>, vector<8x16xf32>
    %cst_227 = arith.constant dense<0xFF800000> : vector<8xf32>
    %659 = vector.multi_reduction <maximumf>, %658, %cst_227 [1] : vector<8x16xf32> to vector<8xf32>
    %660 = vector.shape_cast %659 : vector<8xf32> to vector<8x1xf32>
    %661 = vector.broadcast %660 : vector<8x1xf32> to vector<8x16xf32>
    %662 = arith.subf %658, %661 : vector<8x16xf32>
    %663 = math.exp %662 : vector<8x16xf32>
    %cst_228 = arith.constant dense<0.000000e+00> : vector<8xf32>
    %664 = vector.multi_reduction <add>, %663, %cst_228 [1] : vector<8x16xf32> to vector<8xf32>
    %665 = vector.shape_cast %664 : vector<8xf32> to vector<8x1xf32>
    %666 = tpu.reciprocal %665 {approx = true} : vector<8x1xf32> -> vector<8x1xf32>
    %667 = vector.broadcast %666 : vector<8x1xf32> to vector<8x16xf32>
    %668 = arith.mulf %663, %667 : vector<8x16xf32>
    %cst_229 = arith.constant 0.000000e+00 : f32
    %669 = vector.broadcast %cst_229 : f32 to vector<8x16xf32>
    %670 = arith.select %19, %668, %669 : vector<8x16xi1>, vector<8x16xf32>
    %cst_230 = arith.constant dense<0.000000e+00> : vector<8x32xf32>
    %671 = tpu.matmul %670, %653, %cst_230 {dimension_numbers = #tpu.dot_dimension_numbers<[1], [0], [0], [1], [0, 0, 1, 1], [], []>} : vector<8x16xf32>, vector<16x32xf32>, vector<8x32xf32> -> vector<8x32xf32>
    %c0_231 = arith.constant 0 : index
    %c0_232 = arith.constant 0 : index
    %672 = vector.load %arg8[%c0_231, %c0_232] : memref<16x32xf32, #tpu.memory_space<vmem>>, vector<8x32xf32>
    tpu.vector_store %arg8[%c0_231, %c0_232], %671 {strides = array<i32>} : memref<16x32xf32, #tpu.memory_space<vmem>>, vector<8x32xf32>,
    %673 = vector.extract_strided_slice %645 {offsets = [8, 0], sizes = [8, 32], strides = [1, 1]} : vector<16x32xf32> to vector<8x32xf32>
    %674 = vector.extract_strided_slice %650 {offsets = [16, 0], sizes = [16, 32], strides = [1, 1]} : vector<32x64xf32> to vector<16x32xf32>
    %675 = vector.extract_strided_slice %650 {offsets = [16, 32], sizes = [16, 32], strides = [1, 1]} : vector<32x64xf32> to vector<16x32xf32>
    %cst_233 = arith.constant dense<0.000000e+00> : vector<8x16xf32>
    %676 = tpu.matmul %673, %674, %cst_233 {dimension_numbers = #tpu.dot_dimension_numbers<[1], [1], [0], [0], [0, 0, 1, 0], [], []>} : vector<8x32xf32>, vector<16x32xf32>, vector<8x16xf32> -> vector<8x16xf32>
    %cst_234 = arith.constant 0.176776692 : f32
    %677 = vector.broadcast %cst_234 : f32 to vector<8x16xf32>
    %678 = arith.mulf %676, %677 : vector<8x16xf32>
    %cst_235 = arith.constant -1.000000e+09 : f32
    %679 = vector.broadcast %cst_235 : f32 to vector<8x16xf32>
    %680 = arith.select %25, %678, %679 : vector<8x16xi1>, vector<8x16xf32>
    %cst_236 = arith.constant dense<0xFF800000> : vector<8xf32>
    %681 = vector.multi_reduction <maximumf>, %680, %cst_236 [1] : vector<8x16xf32> to vector<8xf32>
    %682 = vector.shape_cast %681 : vector<8xf32> to vector<8x1xf32>
    %683 = vector.broadcast %682 : vector<8x1xf32> to vector<8x16xf32>
    %684 = arith.subf %680, %683 : vector<8x16xf32>
    %685 = math.exp %684 : vector<8x16xf32>
    %cst_237 = arith.constant dense<0.000000e+00> : vector<8xf32>
    %686 = vector.multi_reduction <add>, %685, %cst_237 [1] : vector<8x16xf32> to vector<8xf32>
    %687 = vector.shape_cast %686 : vector<8xf32> to vector<8x1xf32>
    %688 = tpu.reciprocal %687 {approx = true} : vector<8x1xf32> -> vector<8x1xf32>
    %689 = vector.broadcast %688 : vector<8x1xf32> to vector<8x16xf32>
    %690 = arith.mulf %685, %689 : vector<8x16xf32>
    %cst_238 = arith.constant 0.000000e+00 : f32
    %691 = vector.broadcast %cst_238 : f32 to vector<8x16xf32>
    %692 = arith.select %25, %690, %691 : vector<8x16xi1>, vector<8x16xf32>
    %cst_239 = arith.constant dense<0.000000e+00> : vector<8x32xf32>
    %693 = tpu.matmul %692, %675, %cst_239 {dimension_numbers = #tpu.dot_dimension_numbers<[1], [0], [0], [1], [0, 0, 1, 1], [], []>} : vector<8x16xf32>, vector<16x32xf32>, vector<8x32xf32> -> vector<8x32xf32>
    %c8_240 = arith.constant 8 : index
    %c0_241 = arith.constant 0 : index
    %694 = vector.load %arg8[%c8_240, %c0_241] : memref<16x32xf32, #tpu.memory_space<vmem>>, vector<8x32xf32>
    tpu.vector_store %arg8[%c8_240, %c0_241], %693 {strides = array<i32>} : memref<16x32xf32, #tpu.memory_space<vmem>>, vector<8x32xf32>,
    %c0_242 = arith.constant 0 : index
    %c0_243 = arith.constant 0 : index
    %695 = vector.load %arg8[%c0_242, %c0_243] : memref<16x32xf32, #tpu.memory_space<vmem>>, vector<16x32xf32>
    %696 = vector.extract_strided_slice %383 {offsets = [0, 224], sizes = [32, 32], strides = [1, 1]} : vector<32x320xf32> to vector<32x32xf32>
    %cst_244 = arith.constant dense<0.000000e+00> : vector<16x32xf32>
    %697 = tpu.matmul %695, %696, %cst_244 {dimension_numbers = #tpu.dot_dimension_numbers<[1], [0], [0], [1], [0, 0, 1, 1], [], []>} : vector<16x32xf32>, vector<32x32xf32>, vector<16x32xf32> -> vector<16x32xf32>
    %698 = arith.addf %616, %697 : vector<16x32xf32>
    %699 = vector.extract_strided_slice %387 {offsets = [10, 0], sizes = [1, 32], strides = [1, 1]} : vector<16x96xf32> to vector<1x32xf32>
    %700 = vector.broadcast %699 : vector<1x32xf32> to vector<16x32xf32>
    %701 = arith.addf %698, %700 : vector<16x32xf32>
    %702 = vector.extract_strided_slice %387 {offsets = [2, 0], sizes = [1, 32], strides = [1, 1]} : vector<16x96xf32> to vector<1x32xf32>
    %703 = vector.extract_strided_slice %387 {offsets = [5, 0], sizes = [1, 32], strides = [1, 1]} : vector<16x96xf32> to vector<1x32xf32>
    %cst_245 = arith.constant dense<0.000000e+00> : vector<16xf32>
    %704 = vector.multi_reduction <add>, %701, %cst_245 [1] : vector<16x32xf32> to vector<16xf32>
    %705 = vector.shape_cast %704 : vector<16xf32> to vector<16x1xf32>
    %cst_246 = arith.constant 3.200000e+01 : f32
    %706 = vector.broadcast %cst_246 : f32 to vector<16x1xf32>
    %707 = arith.divf %705, %706 : vector<16x1xf32>
    %708 = vector.broadcast %707 : vector<16x1xf32> to vector<16x32xf32>
    %709 = arith.subf %701, %708 : vector<16x32xf32>
    %710 = arith.mulf %709, %709 : vector<16x32xf32>
    %cst_247 = arith.constant dense<0.000000e+00> : vector<16xf32>
    %711 = vector.multi_reduction <add>, %710, %cst_247 [1] : vector<16x32xf32> to vector<16xf32>
    %712 = vector.shape_cast %711 : vector<16xf32> to vector<16x1xf32>
    %cst_248 = arith.constant 3.200000e+01 : f32
    %713 = vector.broadcast %cst_248 : f32 to vector<16x1xf32>
    %714 = arith.divf %712, %713 : vector<16x1xf32>
    %715 = vector.broadcast %707 : vector<16x1xf32> to vector<16x32xf32>
    %716 = arith.subf %701, %715 : vector<16x32xf32>
    %cst_249 = arith.constant 9.99999996E-13 : f32
    %717 = vector.broadcast %cst_249 : f32 to vector<16x1xf32>
    %718 = arith.addf %714, %717 : vector<16x1xf32>
    %719 = math.rsqrt %718 : vector<16x1xf32>
    %720 = vector.broadcast %719 : vector<16x1xf32> to vector<16x32xf32>
    %721 = arith.mulf %716, %720 : vector<16x32xf32>
    %722 = vector.broadcast %702 : vector<1x32xf32> to vector<16x32xf32>
    %723 = arith.mulf %721, %722 : vector<16x32xf32>
    %724 = vector.broadcast %703 : vector<1x32xf32> to vector<16x32xf32>
    %725 = arith.addf %723, %724 : vector<16x32xf32>
    %726 = vector.extract_strided_slice %383 {offsets = [0, 256], sizes = [32, 64], strides = [1, 1]} : vector<32x320xf32> to vector<32x64xf32>
    %cst_250 = arith.constant dense<0.000000e+00> : vector<16x64xf32>
    %727 = tpu.matmul %725, %726, %cst_250 {dimension_numbers = #tpu.dot_dimension_numbers<[1], [0], [0], [1], [0, 0, 1, 1], [], []>} : vector<16x32xf32>, vector<32x64xf32>, vector<16x64xf32> -> vector<16x64xf32>
    %728 = vector.extract_strided_slice %387 {offsets = [11, 0], sizes = [1, 64], strides = [1, 1]} : vector<16x96xf32> to vector<1x64xf32>
    %729 = vector.broadcast %728 : vector<1x64xf32> to vector<16x64xf32>
    %730 = arith.addf %727, %729 : vector<16x64xf32>
    %cst_251 = arith.constant 0.000000e+00 : f32
    %731 = vector.broadcast %cst_251 : f32 to vector<16x64xf32>
    %732 = arith.maximumf %730, %731 : vector<16x64xf32>
    %cst_252 = arith.constant dense<0.000000e+00> : vector<16x32xf32>
    %733 = tpu.matmul %732, %385, %cst_252 {dimension_numbers = #tpu.dot_dimension_numbers<[1], [0], [0], [1], [0, 0, 1, 1], [], []>} : vector<16x64xf32>, vector<64x32xf32>, vector<16x32xf32> -> vector<16x32xf32>
    %734 = arith.addf %701, %733 : vector<16x32xf32>
    %735 = vector.extract_strided_slice %387 {offsets = [12, 0], sizes = [1, 32], strides = [1, 1]} : vector<16x96xf32> to vector<1x32xf32>
    %736 = vector.broadcast %735 : vector<1x32xf32> to vector<16x32xf32>
    %737 = arith.addf %734, %736 : vector<16x32xf32>
    %c32 = arith.constant 32 : index
    %c0_253 = arith.constant 0 : index
    %738 = vector.load %arg3[%c32, %c0_253] : memref<72x128xf32, #tpu.memory_space<vmem>>, vector<1x32xf32>
    %c33 = arith.constant 33 : index
    %c0_254 = arith.constant 0 : index
    %739 = vector.load %arg3[%c33, %c0_254] : memref<72x128xf32, #tpu.memory_space<vmem>>, vector<1x32xf32>
    %cst_255 = arith.constant dense<0.000000e+00> : vector<16xf32>
    %740 = vector.multi_reduction <add>, %737, %cst_255 [1] : vector<16x32xf32> to vector<16xf32>
    %741 = vector.shape_cast %740 : vector<16xf32> to vector<16x1xf32>
    %cst_256 = arith.constant 3.200000e+01 : f32
    %742 = vector.broadcast %cst_256 : f32 to vector<16x1xf32>
    %743 = arith.divf %741, %742 : vector<16x1xf32>
    %744 = vector.broadcast %743 : vector<16x1xf32> to vector<16x32xf32>
    %745 = arith.subf %737, %744 : vector<16x32xf32>
    %746 = arith.mulf %745, %745 : vector<16x32xf32>
    %cst_257 = arith.constant dense<0.000000e+00> : vector<16xf32>
    %747 = vector.multi_reduction <add>, %746, %cst_257 [1] : vector<16x32xf32> to vector<16xf32>
    %748 = vector.shape_cast %747 : vector<16xf32> to vector<16x1xf32>
    %cst_258 = arith.constant 3.200000e+01 : f32
    %749 = vector.broadcast %cst_258 : f32 to vector<16x1xf32>
    %750 = arith.divf %748, %749 : vector<16x1xf32>
    %751 = vector.broadcast %743 : vector<16x1xf32> to vector<16x32xf32>
    %752 = arith.subf %737, %751 : vector<16x32xf32>
    %cst_259 = arith.constant 9.99999996E-13 : f32
    %753 = vector.broadcast %cst_259 : f32 to vector<16x1xf32>
    %754 = arith.addf %750, %753 : vector<16x1xf32>
    %755 = math.rsqrt %754 : vector<16x1xf32>
    %756 = vector.broadcast %755 : vector<16x1xf32> to vector<16x32xf32>
    %757 = arith.mulf %752, %756 : vector<16x32xf32>
    %758 = vector.broadcast %738 : vector<1x32xf32> to vector<16x32xf32>
    %759 = arith.mulf %757, %758 : vector<16x32xf32>
    %760 = vector.broadcast %739 : vector<1x32xf32> to vector<16x32xf32>
    %761 = arith.addf %759, %760 : vector<16x32xf32>
    %c34 = arith.constant 34 : index
    %c0_260 = arith.constant 0 : index
    %762 = vector.load %arg3[%c34, %c0_260] : memref<72x128xf32, #tpu.memory_space<vmem>>, vector<32x128xf32>
    %cst_261 = arith.constant dense<0.000000e+00> : vector<16x128xf32>
    %763 = tpu.matmul %761, %762, %cst_261 {dimension_numbers = #tpu.dot_dimension_numbers<[1], [0], [0], [1], [0, 0, 1, 1], [], []>} : vector<16x32xf32>, vector<32x128xf32>, vector<16x128xf32> -> vector<16x128xf32>
    %c66 = arith.constant 66 : index
    %c0_262 = arith.constant 0 : index
    %764 = vector.load %arg3[%c66, %c0_262] : memref<72x128xf32, #tpu.memory_space<vmem>>, vector<1x128xf32>
    %765 = vector.broadcast %764 : vector<1x128xf32> to vector<16x128xf32>
    %766 = arith.addf %763, %765 : vector<16x128xf32>
    %c0_263 = arith.constant 0 : index
    %c0_264 = arith.constant 0 : index
    %767 = vector.load %arg7[%c0_263, %c0_264] : memref<16x128xf32, #tpu.memory_space<vmem>>, vector<16x128xf32>
    tpu.vector_store %arg7[%c0_263, %c0_264], %766 {strides = array<i32>} : memref<16x128xf32, #tpu.memory_space<vmem>>, vector<16x128xf32>,
    return
  }
}

</mosaic_0001>

<bundles_post_ra>
// kernel: tpu_custom_call.1
= control target key start
LH: loop header
LB: loop body
LE: loop exit
PB: predicated region body
PF: predicated region fallthrough
CT: control target
= control target key end

     0   :  { %12 = vsyncpa [#allocation4], 0  ;;  %s8506_s0 = inlined_call_operand.vmem [shape: s32[16,1], index: 0, kind: input, shape index: {}]   ;;  %s8507_s1 = inlined_call_operand.vmem [shape: f32[16,24], index: 1, kind: input, shape index: {}]   ;;  %s8508_s2 = inlined_call_operand.hbm [shape: f32[32,32], index: 2, kind: input, shape index: {}]   ;;  %s8509_s3 = inlined_call_operand.hbm [shape: f32[72,128], index: 3, kind: input, shape index: {}]   ;;  %s8510_s4 = inlined_call_operand.vmem [shape: f32[2,32,320], index: 4, kind: input, shape index: {}]   ;;  %s8511_s5 = inlined_call_operand.vmem [shape: f32[2,64,32], index: 5, kind: input, shape index: {}]   ;;  %s8512_s6 = inlined_call_operand.hbm [shape: f32[2,16,96], index: 6, kind: input, shape index: {}]   ;;  %s8513_s7 = inlined_call_operand.hbm [shape: f32[16,128], index: 7, kind: output, shape index: {}]  }
   0x1   :  { %13 = vsyncpa [#allocation7], 0 }
   0x2   :  { %14 = vsyncpa [#allocation5], 0  ;;  %s7421_s24 = smov [#allocation6]   ;;  %s7422_s26 = smov [#allocation3]  }
   0x3   :  { %s36_s25 = sshll.u32 %s7421_s24, 4  ;;  %s24_s27 = sshll.u32 %s7422_s26, 4  ;;  %s37_s25 = int_to_ptr.vmem [resolvable:$true] %s36_s25  ;;  %s25_s27 = int_to_ptr.vmem [resolvable:$true] %s24_s27 }
   0x4   :  { %s7343_s28 = scalar_lea.vmem %s37_s25, 1152  ;;  %p7348_p1 = scmp.lt.s32.totalorder %s37_s25, %s37_s25 }
   0x5   :  { %p7344_p0 = scmp.ne.s32.totalorder %s37_s25, %s7343_s28  ;;  %p7349_p2 = scmp.lt.s32.totalorder %s7343_s28, %s7343_s28 }
   0x7   :  { %p7350_p3 = por %p7349_p2, %p7348_p1 }
   0x9   :  { %p7351_p4 = pnand %p7350_p3, %p7344_p0 }
   0xb   :  { %7354 = shalt.err (!%p7351_p4)
}
   0xc   :  { %s7423_s29 = smov 128   ;;  %s7424_s30 = smov 8  }
   0xd   :  { %42 = dma.hbm_to_vmem [thread:$0]  %s8509_s3, 1152, %s37_s25, [#allocation7], %s7423_s29, %s7423_s29, %s7424_s30  }
   0xe   :  { %s7363_s10 = scalar_lea.vmem %s25_s27, 512  ;;  %p7368_p6 = scmp.lt.s32.totalorder %s25_s27, %s25_s27 }
   0xf   :  { %p7364_p5 = scmp.ne.s32.totalorder %s25_s27, %s7363_s10  ;;  %p7369_p7 = scmp.lt.s32.totalorder %s7363_s10, %s7363_s10 }
  0x11   :  { %p7370_p8 = por %p7369_p7, %p7368_p6 }
  0x13   :  { %p7371_p9 = pnand %p7370_p8, %p7364_p5 }
  0x15   :  { %7374 = shalt.err (!%p7371_p9)
}
  0x16   :  { %30 = dma.hbm_to_vmem [thread:$0]  %s8508_s2, 512, %s25_s27, [#allocation4], %s7423_s29, %s7423_s29, %s7424_s30  }
  0x17   :  { %s7425_s13 = smov [#allocation8]  }
  0x18   :  { %s52_s14 = sshll.u32 %s7425_s13, 4  ;;  %s53_s14 = int_to_ptr.vmem [resolvable:$true] %s52_s14 }
  0x19   :  { %s7383_s15 = scalar_lea.vmem %s53_s14, 512  ;;  %p7388_p11 = scmp.lt.s32.totalorder %s53_s14, %s53_s14 }
  0x1a   :  { %p7384_p10 = scmp.ne.s32.totalorder %s53_s14, %s7383_s15  ;;  %p7389_p12 = scmp.lt.s32.totalorder %s7383_s15, %s7383_s15 }
  0x1c   :  { %p7390_p13 = por %p7389_p12, %p7388_p11 }
  0x1e   :  { %p7391_p0 = pnand %p7390_p13, %p7384_p10 }
  0x20   :  { %7394 = shalt.err (!%p7391_p0)
}
  0x21   :  { %58 = dma.hbm_to_vmem [thread:$0]  %s8512_s6, 512, %s53_s14, [#allocation7], %s7423_s29, %s7423_s29, %s7424_s30  }
  0x22   :  { %7415 = dma.done.wait [#allocation4], 512  }
  0x23   :  { %7416 = vsyncadd [#allocation4], 4294966784 }
  0x24   :  { %7417 = dma.done.wait [#allocation7], 1664  }
  0x25   :  { %7418 = vsyncadd [#allocation7], 4294965632  ;;  %v7426_v0 = vmov 0   ;;  %v68_v1 = vld [vmem:[%s8506_s0] sm:$0xff]  ;;  %v85_v2 = vld [vmem:[#allocation6 + $0x8] sm:$0xff]  ;;  %v7427_v5 = vmov 0.0   ;;  %v70_v6 = vlaneseq }
  0x26   :  { %7220 = vset.pattern.permute.xlu0 %v7426_v0  ;;  %6731 = vmatprep.subr.mxu0 %v85_v2  ;;  %v84_v3 = vld [vmem:[#allocation6] sm:$0xff]  ;;  %v69_v4 = vld [vmem:[%s8506_s0 + $0x8] sm:$0xff]  ;;  %vm88_vm0 = vcmask 130048   ;;  %v86_v13 = vld [vmem:[#allocation6 + $0x10] sm:$0xff]  ;;  %vm204_vm3 = vcmask 261120   ;;  %vm7428_vm4 = vmmov 0  }
  0x27   :  { %73 = vperm.xlu0 %7220, %v68_v1   ;;  %6732 = vmatpush3.msra.mxu0 %v85_v2  ;;  %v71_v7 = vand.u32 127, %v70_v6  ;;  %v87_v17 = vld [vmem:[#allocation6 + $0x18] sm:$0xff]  ;;  %v7531_v33 = vld [vmem:[%s8510_s4 + $0x30] sm:$0xff]  ;;  %v7538_v34 = vld [vmem:[%s8510_s4 + $0x18] sm:$0xff]  ;;  %v7552_v42 = vshrl.u32 %v70_v6, 7  ;;  %s7429_s26 = smov 96  }
  0x28   :  { %6733 = vmatprep.subr.mxu0 %v84_v3  ;;  %v7526_v32 = vld [vmem:[%s8510_s4 + $0x48] sm:$0xff]  ;;  %v7547_v35 = vld [vmem:[%s8510_s4] sm:$0xff]  ;;  %v7557_v44 = vld [vmem:[#allocation8] sm:$0xff]  ;;  %s7430_s27 = smov 88   ;;  %s7431_s28 = smov 120   ;;  %vm332_vm5 = vcmask 64512  }
  0x29   :  { %6734 = vmatpush3.msra.mxu0 %v84_v3  ;;  %6738 = vmatprep.subr.mxu1 %v7526_v32  ;;  %v7555_v43 = vsub.s32 0, %v7552_v42  ;;  %v7560_v45 = vsub.s32 3, %v7552_v42  ;;  %v246_v56 = vsub.s32 6, %v7552_v42  ;;  %v7600_v1 = vld [vmem:[%s8507_s1] sm:$0xff]  ;;  %s7432_s10 = smov 64   ;;  %s7433_s11 = smov 56  }
  0x2a   :  { %6749 = vmatprep.subr.mxu0 %v7427_v5  ;;  %6739 = vmatpush3.msra.mxu1 %v7526_v32  ;;  %vm180_vm6 = vcmp.gt.f32.partialorder %v7600_v1, 0.0  ;;  %s7434_s12 = smov 80   ;;  %s7435_s13 = smov 32   ;;  %vm2613_vm8 = vcmask 195648   ;;  %vm3123_vm9 = vcmask 523264  }
  0x2b   :  { %76 = vperm.xlu0 %7220, %v69_v4   ;;  %6740 = vmatprep.subr.mxu1 %v7531_v33  ;;  %v235_v46 = vrot.slane %v7557_v44, %v7555_v43  ;;  %v241_v49 = vrot.slane %v7557_v44, %v7560_v45  ;;  %v247_v57 = vrot.slane %v7557_v44, %v246_v56  ;;  %s7436_s14 = smov 112   ;;  %s7437_s15 = smov 72  }
  0x2c   :  { %6741 = vmatpush3.msra.mxu1 %v7531_v33  ;;  %s7438_s3 = smov 104   ;;  %s7439_s16 = smov 48  }
  0x2d   :  { %6742 = vmatprep.subr.mxu1 %v7538_v34  ;;  %s7440_s2 = smov 40  }
  0x2e   :  { %6743 = vmatpush3.msra.mxu1 %v7538_v34 }
  0x2f   :  { %6744 = vmatprep.subr.mxu1 %v7547_v35 }
  0x30   :  { %6745 = vmatpush3.msra.mxu1 %v7547_v35 }
  0x31   :  { %6759 = vmatprep.subr.mxu1 %v7427_v5 }
  0xa2   :  { %v74_v8 = vpop.permute.xlu0 %73 }
  0xa3   :  { %vm78_vm1 = vcmp.eq.s32.totalorder %v74_v8, %v71_v7 }
  0xa4   :  { %v6380_v9 = vsel %vm78_vm1, 1.0, %v7427_v5 }
  0xa5   :  { %6735 = vmatprep.mubr.msk.f32.mxu0 %vm88_vm0, %v6380_v9 }
  0xa6   :  { %v77_v10 = vpop.permute.xlu0 %76 }
  0xa7   :  { %vm79_vm2 = vcmp.eq.s32.totalorder %v77_v10, %v71_v7 }
  0xa8   :  { %v6381_v11 = vsel %vm79_vm2, 1.0, %v7427_v5 }
  0xa9   :  { %6736 = vmatmul.mubr.msk.f32.vlgmr.msra.gmra.mxu0 %vm88_vm0, %v6381_v11 }
  0xaa   :  { %6751 = vmatprep.mubr.msk.f32.mxu0 %vm7428_vm4, %v7427_v5 }
 0x169   :  { %v6737_v12 = vpop.f32.mrf.mxu0 }
 0x16a   :  { %v171_v15 = vmul.f32 5.656854, %v6737_v12 }
 0x16b   :  { %v161_v14 = vpop.f32.mrf.mxu0 }
 0x16c   :  { %v170_v16 = vmul.f32 5.656854, %v161_v14  ;;  %v7513_v19 = vadd.f32 %v171_v15, %v87_v17 }
 0x16e   :  { %v7511_v18 = vadd.f32 %v170_v16, %v86_v13  ;;  %v208_v21 = vsel %vm204_vm3, %v7513_v19, 0.0 }
 0x170   :  { %v205_v20 = vsel %vm204_vm3, %v7511_v18, 0.0 }
 0x171   :  { %206 = vadd.xlane.f32.xlu1 %v205_v20 }
 0x175   :  { %209 = vadd.xlane.f32.xlu1 %v208_v21 }
 0x1fa   :  { %v207_v22 = vpop.xlane.xlu1 %206 }
 0x1fb   :  { %v212_v23 = vmul.f32 0.03125, %v207_v22 }
 0x1fd   :  { %v214_v24 = vsub.f32 %v7511_v18, %v212_v23 }
 0x1fe   :  { %v210_v25 = vpop.xlane.xlu1 %209 }
 0x1ff   :  { %v213_v26 = vmul.f32 0.03125, %v210_v25  ;;  %v216_v27 = vmul.f32 %v214_v24, %v214_v24 }
 0x201   :  { %v215_v28 = vsub.f32 %v7513_v19, %v213_v26  ;;  %v218_v29 = vsel %vm204_vm3, %v216_v27, 0.0 }
 0x202   :  { %219 = vadd.xlane.f32.xlu0 %v218_v29 }
 0x203   :  { %v217_v30 = vmul.f32 %v215_v28, %v215_v28 }
 0x205   :  { %v221_v31 = vsel %vm204_vm3, %v217_v30, 0.0 }
 0x206   :  { %222 = vadd.xlane.f32.xlu1 %v221_v31 }
 0x28b   :  { %v220_v36 = vpop.xlane.xlu0 %219 }
 0x28c   :  { %v224_v37 = vmul.f32 0.03125, %v220_v36 }
 0x28e   :  { %v226_v38 = vadd.f32 1e-12, %v224_v37 }
 0x28f   :  { %v223_v39 = vpop.xlane.xlu1 %222 }
 0x290   :  { %7221 = vrsqrt.f32 %v226_v38  ;;  %v225_v40 = vmul.f32 0.03125, %v223_v39 }
 0x292   :  { %v227_v41 = vadd.f32 1e-12, %v225_v40 }
 0x294   :  { %7223 = vrsqrt.f32 %v227_v41 }
 0x29d   :  { %v7222_v47 = vpop.eup %7221 }
 0x29e   :  { %v230_v48 = vmul.f32 %v7222_v47, %v214_v24 }
 0x2a0   :  { %v236_v50 = vmul.f32 %v235_v46, %v230_v48 }
 0x2a1   :  { %v7224_v51 = vpop.eup %7223 }
 0x2a2   :  { %v231_v52 = vmul.f32 %v7224_v51, %v215_v28  ;;  %v242_v53 = vadd.f32 %v241_v49, %v236_v50 }
 0x2a4   :  { %v237_v54 = vmul.f32 %v235_v46, %v231_v52  ;;  %6746 = vmatprep.mubr.msk.f32.mxu1 %vm204_vm3, %v242_v53 }
 0x2a6   :  { %v243_v55 = vadd.f32 %v241_v49, %v237_v54 }
 0x2a8   :  { %6747 = vmatmul.mubr.msk.f32.vlgmr.msra.gmra.mxu1 %vm204_vm3, %v243_v55 }
 0x2a9   :  { %6761 = vmatprep.mubr.msk.f32.mxu1 %vm7428_vm4, %v7427_v5 }
 0x368   :  { %v6748_v58 = vpop.f32.mrf.mxu1 }
 0x369   :  { %v7576_v59 = vadd.f32 %v6748_v58, %v247_v57 }
 0x36a   :  { %v320_v60 = vpop.f32.mrf.mxu1 }
 0x36b   :  { %v7578_v61 = vadd.f32 %v320_v60, %v247_v57 }
 0x36d   :  { %330 = vrot.lane.b32.xlu1 %v7578_v61, %s7429_s26 }
 0x371   :  { %499 = vrot.lane.b32.xlu1 %v7578_v61, %s7430_s27 }
 0x375   :  { %497 = vrot.lane.b32.xlu1 %v7578_v61, %s7431_s28 }
 0x3df   :  { %v331_v62 = vpop.permute.xlu1 %330 }
 0x3e0   :  { %6750 = vmatpush3.xpose.msk.msra.mxu0 %vm332_vm5, %v331_v62 }
 0x3e1   :  { %6754 = vmatprep.subr.mxu0 %v7427_v5 }
 0x3e3   :  { %6752 = vmatmul.mubr.msk.f32.vlgmr.msra.gmra.mxu0 %vm332_vm5, %v7578_v61  ;;  %v500_v63 = vpop.permute.xlu1 %499 }
 0x3e4   :  { %6760 = vmatpush3.xpose.msk.msra.mxu1 %vm332_vm5, %v500_v63  ;;  %6756 = vmatprep.mubr.msk.f32.mxu0 %vm7428_vm4, %v7427_v5 }
 0x3e5   :  { %6769 = vmatprep.subr.mxu1 %v7427_v5 }
 0x3e7   :  { %v498_v0 = vpop.permute.xlu1 %497 }
 0x3e8   :  { %6762 = vmatmul.mubr.msk.f32.vlgmr.msra.gmra.mxu1 %vm332_vm5, %v498_v0 }
 0x3e9   :  { %6771 = vmatprep.mubr.msk.f32.mxu1 %vm7428_vm4, %v7427_v5 }
 0x4a3   :  { %v403_v2 = vpop.f32.mrf.mxu0 }
 0x4a4   :  { %v407_v3 = vmul.f32 0.35355338, %v403_v2 }
 0x4a5   :  { %v6753_v4 = vpop.f32.mrf.mxu0 }
 0x4a6   :  { %v408_v6 = vsel %vm180_vm6, %v407_v3, -1e+09 }
 0x4a7   :  { %v409_v7 = vsel %vm332_vm5, %v408_v6, -inf }
 0x4a8   :  { %410 = vmax.xlane.f32.xlu1 %v409_v7  ;;  %v571_v8 = vpop.f32.mrf.mxu1 }
 0x4a9   :  { %v575_v9 = vmul.f32 0.35355338, %v571_v8 }
 0x4aa   :  { %v6763_v10 = vpop.f32.mrf.mxu1 }
 0x4ab   :  { %v576_v11 = vsel %vm180_vm6, %v575_v9, -1e+09 }
 0x4ac   :  { %v577_v12 = vsel %vm332_vm5, %v576_v11, -inf }
 0x4ad   :  { %578 = vmax.xlane.f32.xlu0 %v577_v12 }
 0x4b9   :  { %666 = vrot.lane.b32.xlu1 %v7538_v34, %s7435_s13 }
 0x4c3   :  { %421 = vrot.lane.b32.xlu0 %v7578_v61, %s7432_s10 }
 0x531   :  { %v411_v13 = vpop.xlane.xlu1 %410 }
 0x532   :  { %v412_v14 = vsub.f32 %v408_v6, %v411_v13 }
 0x534   :  { %v413_v15 = vmul.f32 1.442695, %v412_v14 }
 0x535   :  { %v7633_v38 = vpop.permute.xlu1 %666 }
 0x536   :  { %7225 = vpow2.f32 %v413_v15  ;;  %v579_v16 = vpop.xlane.xlu0 %578  ;;  %6770 = vmatpush3.msra.mxu1 %v7633_v38 }
 0x537   :  { %v580_v17 = vsub.f32 %v576_v11, %v579_v16  ;;  %6779 = vmatprep.subr.mxu1 %v7427_v5 }
 0x539   :  { %v581_v20 = vmul.f32 1.442695, %v580_v17 }
 0x53a   :  { %v422_v21 = vpop.permute.xlu0 %421 }
 0x53b   :  { %7227 = vpow2.f32 %v581_v20  ;;  %6755 = vmatpush3.msra.mxu0 %v422_v21 }
 0x53c   :  { %6764 = vmatprep.subr.mxu0 %v7427_v5 }
 0x543   :  { %v7226_v22 = vpop.eup %7225 }
 0x544   :  { %v415_v23 = vsel %vm332_vm5, %v7226_v22, 0.0 }
 0x545   :  { %416 = vadd.xlane.f32.xlu0 %v415_v23 }
 0x548   :  { %v7228_v24 = vpop.eup %7227 }
 0x549   :  { %v583_v25 = vsel %vm332_vm5, %v7228_v24, 0.0 }
 0x54a   :  { %584 = vadd.xlane.f32.xlu0 %v583_v25 }
 0x560   :  { %589 = vrot.lane.b32.xlu0 %v7578_v61, %s7433_s11 }
 0x564   :  { %821 = vrot.lane.b32.xlu0 %v7578_v61, %s7434_s12 }
 0x568   :  { %819 = vrot.lane.b32.xlu0 %v7578_v61, %s7436_s14 }
 0x5ce   :  { %v417_v26 = vpop.xlane.xlu0 %416 }
 0x5cf   :  { %7229 = vrcp.f32 %v417_v26 }
 0x5d3   :  { %v585_v27 = vpop.xlane.xlu0 %584 }
 0x5d4   :  { %7231 = vrcp.f32 %v585_v27 }
 0x5d7   :  { %v590_v31 = vpop.permute.xlu0 %589 }
 0x5db   :  { %v822_v41 = vpop.permute.xlu0 %821 }
 0x5dc   :  { %v7230_v28 = vpop.eup %7229 }
 0x5dd   :  { %v419_v29 = vmul.f32 %v7230_v28, %v7226_v22 }
 0x5df   :  { %v420_v30 = vsel %vm180_vm6, %v419_v29, 0.0  ;;  %v820_v48 = vpop.permute.xlu0 %819 }
 0x5e0   :  { %6757 = vmatmul.mubr.msk.f32.vlgmr.msra.gmra.mxu0 %vm332_vm5, %v420_v30 }
 0x5e1   :  { %v7232_v36 = vpop.eup %7231  ;;  %6765 = vmatpush3.msra.mxu0 %v590_v31  ;;  %6766 = vmatprep.mubr.msk.f32.mxu0 %vm7428_vm4, %v7427_v5 }
 0x5e2   :  { %v587_v34 = vmul.f32 %v7232_v36, %v7228_v24  ;;  %6774 = vmatprep.subr.mxu0 %v7427_v5 }
 0x5e4   :  { %v588_v37 = vsel %vm180_vm6, %v587_v34, 0.0 }
 0x5e5   :  { %6767 = vmatmul.mubr.msk.f32.vlgmr.msra.gmra.mxu0 %vm332_vm5, %v588_v37 }
 0x5e6   :  { %6776 = vmatprep.mubr.msk.f32.mxu0 %vm7428_vm4, %v7427_v5 }
 0x6a0   :  { %v493_v39 = vpop.f32.mrf.mxu0 }
 0x6a2   :  { %v6758_v40 = vpop.f32.mrf.mxu0 }
 0x6a5   :  { %v661_v46 = vpop.f32.mrf.mxu0 }
 0x6a6   :  { %6772 = vmatmul.mubr.msk.f32.vlgmr.msra.gmra.mxu1 %vm332_vm5, %v661_v46 }
 0x6a7   :  { %6780 = vmatpush3.xpose.msk.msra.mxu1 %vm332_vm5, %v822_v41  ;;  %v6768_v47 = vpop.f32.mrf.mxu0  ;;  %6781 = vmatprep.mubr.msk.f32.mxu1 %vm7428_vm4, %v7427_v5  ;;  %v7723_v41 = vld [vmem:[%s8507_s1 + $0x8] sm:$0xff] }
 0x6a8   :  { %6789 = vmatprep.subr.mxu1 %v7427_v5  ;;  %vm181_vm7 = vcmp.gt.f32.partialorder %v7723_v41, 0.0 }
 0x6aa   :  { %6782 = vmatmul.mubr.msk.f32.vlgmr.msra.gmra.mxu1 %vm332_vm5, %v820_v48 }
 0x6ab   :  { %6791 = vmatprep.mubr.msk.f32.mxu1 %vm7428_vm4, %v7427_v5 }
 0x766   :  { %v7645_v49 = vpop.f32.mrf.mxu1 }
 0x768   :  { %v6773_v50 = vpop.f32.mrf.mxu1 }
 0x76a   :  { %v893_v51 = vpop.f32.mrf.mxu1 }
 0x76b   :  { %v897_v52 = vmul.f32 0.35355338, %v893_v51 }
 0x76c   :  { %v6783_v53 = vpop.f32.mrf.mxu1 }
 0x76d   :  { %v898_v54 = vsel %vm180_vm6, %v897_v52, -1e+09 }
 0x76e   :  { %v899_v55 = vsel %vm332_vm5, %v898_v54, -inf }
 0x76f   :  { %900 = vmax.xlane.f32.xlu0 %v899_v55 }
 0x785   :  { %743 = vrot.lane.b32.xlu0 %v7547_v35, %s7435_s13 }
 0x789   :  { %1067 = vrot.lane.b32.xlu0 %v7578_v61, %s7437_s15 }
 0x78d   :  { %1065 = vrot.lane.b32.xlu0 %v7578_v61, %s7438_s3 }
 0x7f8   :  { %v901_v57 = vpop.xlane.xlu0 %900 }
 0x7f9   :  { %v902_v58 = vsub.f32 %v898_v54, %v901_v57 }
 0x7fb   :  { %v903_v60 = vmul.f32 1.442695, %v902_v58 }
 0x7fc   :  { %v7656_v62 = vpop.permute.xlu0 %743 }
 0x7fd   :  { %7233 = vpow2.f32 %v903_v60  ;;  %6775 = vmatpush3.msra.mxu0 %v7656_v62 }
 0x7fe   :  { %6777 = vmatmul.mubr.msk.f32.vlgmr.msra.gmra.mxu0 %vm332_vm5, %v493_v39  ;;  %6784 = vmatprep.subr.mxu0 %v7427_v5 }
 0x7ff   :  { %6786 = vmatprep.mubr.msk.f32.mxu0 %vm7428_vm4, %v7427_v5 }
 0x800   :  { %v1068_v4 = vpop.permute.xlu0 %1067 }
 0x804   :  { %v1066_v8 = vpop.permute.xlu0 %1065 }
 0x80a   :  { %v7234_v35 = vpop.eup %7233 }
 0x80b   :  { %v905_v63 = vsel %vm332_vm5, %v7234_v35, 0.0 }
 0x80c   :  { %906 = vadd.xlane.f32.xlu1 %v905_v63 }
 0x81d   :  { %911 = vrot.lane.b32.xlu1 %v7578_v61, %s7439_s16 }
 0x895   :  { %v907_v0 = vpop.xlane.xlu1 %906 }
 0x896   :  { %7235 = vrcp.f32 %v907_v0 }
 0x899   :  { %v912_v2 = vpop.permute.xlu1 %911 }
 0x89a   :  { %6785 = vmatpush3.msra.mxu0 %v912_v2 }
 0x89b   :  { %6794 = vmatprep.subr.mxu0 %v7427_v5 }
 0x8a3   :  { %v7236_v3 = vpop.eup %7235 }
 0x8a4   :  { %v909_v6 = vmul.f32 %v7236_v3, %v7234_v35 }
 0x8a6   :  { %v910_v7 = vsel %vm180_vm6, %v909_v6, 0.0 }
 0x8a7   :  { %6787 = vmatmul.mubr.msk.f32.vlgmr.msra.gmra.mxu0 %vm332_vm5, %v910_v7 }
 0x8a8   :  { %6795 = vmatpush3.xpose.msk.msra.mxu0 %vm332_vm5, %v1068_v4  ;;  %6796 = vmatprep.mubr.msk.f32.mxu0 %vm7428_vm4, %v7427_v5 }
 0x8a9   :  { %6804 = vmatprep.subr.mxu0 %v7427_v5 }
 0x8ab   :  { %6797 = vmatmul.mubr.msk.f32.vlgmr.msra.gmra.mxu0 %vm332_vm5, %v1066_v8 }
 0x8ac   :  { %6806 = vmatprep.mubr.msk.f32.mxu0 %vm7428_vm4, %v7427_v5 }
 0x8be   :  { %v815_v9 = vpop.f32.mrf.mxu0 }
 0x8bf   :  { %v816_v36 = vadd.f32 %v815_v9, %v7645_v49 }
 0x8c0   :  { %v6778_v10 = vpop.f32.mrf.mxu0 }
 0x967   :  { %v983_v11 = vpop.f32.mrf.mxu0 }
 0x969   :  { %v6788_v12 = vpop.f32.mrf.mxu0 }
 0x96b   :  { %v1139_v13 = vpop.f32.mrf.mxu0 }
 0x96c   :  { %v1143_v14 = vmul.f32 0.35355338, %v1139_v13 }
 0x96d   :  { %v6798_v15 = vpop.f32.mrf.mxu0 }
 0x96e   :  { %v1144_v16 = vsel %vm180_vm6, %v1143_v14, -1e+09 }
 0x96f   :  { %v1145_v17 = vsel %vm332_vm5, %v1144_v16, -inf }
 0x970   :  { %1146 = vmax.xlane.f32.xlu1 %v1145_v17 }
 0x981   :  { %1157 = vrot.lane.b32.xlu1 %v7578_v61, %s7440_s2 }
 0x985   :  { %1313 = vrot.lane.b32.xlu1 %v7576_v59, %s7429_s26 }
 0x989   :  { %1479 = vrot.lane.b32.xlu1 %v7576_v59, %s7431_s28 }
 0x9f9   :  { %v1147_v20 = vpop.xlane.xlu1 %1146 }
 0x9fa   :  { %v1148_v21 = vsub.f32 %v1144_v16, %v1147_v20 }
 0x9fc   :  { %v1149_v22 = vmul.f32 1.442695, %v1148_v21 }
 0x9fd   :  { %v1158_v26 = vpop.permute.xlu1 %1157 }
 0x9fe   :  { %7237 = vpow2.f32 %v1149_v22 }
 0xa01   :  { %v1314_v29 = vpop.permute.xlu1 %1313 }
 0xa05   :  { %v1480_v31 = vpop.permute.xlu1 %1479 }
 0xa0b   :  { %v7238_v23 = vpop.eup %7237 }
 0xa0c   :  { %v1151_v24 = vsel %vm332_vm5, %v7238_v23, 0.0 }
 0xa0d   :  { %1152 = vadd.xlane.f32.xlu0 %v1151_v24 }
 0xa23   :  { %988 = vrot.lane.b32.xlu0 %v7531_v33, %s7435_s13 }
 0xa27   :  { %1481 = vrot.lane.b32.xlu0 %v7576_v59, %s7430_s27 }
 0xa96   :  { %v1153_v61 = vpop.xlane.xlu0 %1152 }
 0xa97   :  { %7239 = vrcp.f32 %v1153_v61 }
 0xa9a   :  { %v7691_v25 = vpop.permute.xlu0 %988 }
 0xa9b   :  { %6790 = vmatpush3.msra.mxu1 %v7691_v25 }
 0xa9c   :  { %6792 = vmatmul.mubr.msk.f32.vlgmr.msra.gmra.mxu1 %vm332_vm5, %v983_v11  ;;  %6799 = vmatprep.subr.mxu1 %v7427_v5 }
 0xa9d   :  { %6800 = vmatpush3.msra.mxu1 %v1158_v26  ;;  %6801 = vmatprep.mubr.msk.f32.mxu1 %vm7428_vm4, %v7427_v5 }
 0xa9e   :  { %6809 = vmatprep.subr.mxu1 %v7427_v5  ;;  %v1482_v30 = vpop.permute.xlu0 %1481 }
 0xaa4   :  { %v7240_v33 = vpop.eup %7239 }
 0xaa5   :  { %v1155_v27 = vmul.f32 %v7240_v33, %v7238_v23 }
 0xaa7   :  { %v1156_v28 = vsel %vm180_vm6, %v1155_v27, 0.0 }
 0xaa8   :  { %6802 = vmatmul.mubr.msk.f32.vlgmr.msra.gmra.mxu1 %vm332_vm5, %v1156_v28 }
 0xaa9   :  { %6810 = vmatpush3.xpose.msk.msra.mxu1 %vm332_vm5, %v1314_v29  ;;  %6811 = vmatprep.mubr.msk.f32.mxu1 %vm7428_vm4, %v7427_v5 }
 0xaaa   :  { %6819 = vmatprep.subr.mxu1 %v7427_v5 }
 0xaac   :  { %6812 = vmatmul.mubr.msk.f32.vlgmr.msra.gmra.mxu1 %vm332_vm5, %v7576_v59 }
 0xaad   :  { %6820 = vmatpush3.xpose.msk.msra.mxu1 %vm332_vm5, %v1482_v30  ;;  %6821 = vmatprep.mubr.msk.f32.mxu1 %vm7428_vm4, %v7427_v5 }
 0xaae   :  { %6829 = vmatprep.subr.mxu1 %v7427_v5 }
 0xab0   :  { %6822 = vmatmul.mubr.msk.f32.vlgmr.msra.gmra.mxu1 %vm332_vm5, %v1480_v31 }
 0xab1   :  { %6830 = vmatpush3.msra.mxu1 %v7633_v38  ;;  %6831 = vmatprep.mubr.msk.f32.mxu1 %vm7428_vm4, %v7427_v5 }
 0xab2   :  { %6839 = vmatprep.subr.mxu1 %v7427_v5 }
 0xb5c   :  { %v1060_v34 = vpop.f32.mrf.mxu1 }
 0xb5d   :  { %v7718_v37 = vadd.f32 %v1060_v34, %v816_v36 }
 0xb5e   :  { %v6793_v39 = vpop.f32.mrf.mxu1 }
 0xb68   :  { %v1229_v40 = vpop.f32.mrf.mxu1 }
 0xb6a   :  { %v6803_v46 = vpop.f32.mrf.mxu1 }
 0xb6c   :  { %v1385_v47 = vpop.f32.mrf.mxu1 }
 0xb6d   :  { %v1389_v38 = vmul.f32 0.35355338, %v1385_v47 }
 0xb6e   :  { %v6813_v48 = vpop.f32.mrf.mxu1 }
 0xb6f   :  { %v1390_v50 = vsel %vm181_vm7, %v1389_v38, -1e+09 }
 0xb70   :  { %v1553_v49 = vpop.f32.mrf.mxu1  ;;  %v1391_v51 = vsel %vm332_vm5, %v1390_v50, -inf }
 0xb71   :  { %v1557_v52 = vmul.f32 0.35355338, %v1553_v49  ;;  %1392 = vmax.xlane.f32.xlu0 %v1391_v51 }
 0xb72   :  { %v6823_v53 = vpop.f32.mrf.mxu1 }
 0xb73   :  { %v1558_v54 = vsel %vm181_vm7, %v1557_v52, -1e+09 }
 0xb74   :  { %v1559_v55 = vsel %vm332_vm5, %v1558_v54, -inf }
 0xb75   :  { %1560 = vmax.xlane.f32.xlu1 %v1559_v55 }
 0xb86   :  { %1234 = vrot.lane.b32.xlu1 %v7526_v32, %s7435_s13 }
 0xb8a   :  { %1571 = vrot.lane.b32.xlu1 %v7576_v59, %s7433_s11 }
 0xb8e   :  { %1795 = vrot.lane.b32.xlu1 %v7576_v59, %s7434_s12 }
 0xbfa   :  { %v1393_v57 = vpop.xlane.xlu0 %1392 }
 0xbfb   :  { %v1394_v58 = vsub.f32 %v1390_v50, %v1393_v57 }
 0xbfd   :  { %v1395_v60 = vmul.f32 1.442695, %v1394_v58 }
 0xbfe   :  { %v1561_v35 = vpop.xlane.xlu1 %1560 }
 0xbff   :  { %7241 = vpow2.f32 %v1395_v60  ;;  %v1562_v63 = vsub.f32 %v1558_v54, %v1561_v35 }
 0xc01   :  { %v1563_v0 = vmul.f32 1.442695, %v1562_v63 }
 0xc02   :  { %v7738_v2 = vpop.permute.xlu1 %1234 }
 0xc03   :  { %7243 = vpow2.f32 %v1563_v0  ;;  %6805 = vmatpush3.msra.mxu0 %v7738_v2 }
 0xc04   :  { %6807 = vmatmul.mubr.msk.f32.vlgmr.msra.gmra.mxu0 %vm332_vm5, %v1229_v40  ;;  %6814 = vmatprep.subr.mxu0 %v7427_v5 }
 0xc05   :  { %6816 = vmatprep.mubr.msk.f32.mxu0 %vm7428_vm4, %v7427_v5 }
 0xc06   :  { %v1572_v14 = vpop.permute.xlu1 %1571 }
 0xc0c   :  { %v7242_v32 = vpop.eup %7241 }
 0xc0d   :  { %v1397_v3 = vsel %vm332_vm5, %v7242_v32, 0.0 }
 0xc0e   :  { %1398 = vadd.xlane.f32.xlu0 %v1397_v3 }
 0xc10   :  { %v7244_v4 = vpop.eup %7243 }
 0xc11   :  { %v1565_v6 = vsel %vm332_vm5, %v7244_v4, 0.0 }
 0xc12   :  { %1566 = vadd.xlane.f32.xlu0 %v1565_v6  ;;  %v2284_v6 = vsub.s32 7, %v7552_v42 }
 0xc28   :  { %1403 = vrot.lane.b32.xlu0 %v7576_v59, %s7432_s10 }
 0xc2c   :  { %1793 = vrot.lane.b32.xlu0 %v7576_v59, %s7436_s14 }
 0xc97   :  { %v1399_v7 = vpop.xlane.xlu0 %1398 }
 0xc98   :  { %7245 = vrcp.f32 %v1399_v7 }
 0xc9b   :  { %v1567_v8 = vpop.xlane.xlu0 %1566 }
 0xc9c   :  { %7247 = vrcp.f32 %v1567_v8 }
 0xc9f   :  { %v1404_v9 = vpop.permute.xlu0 %1403 }
 0xca0   :  { %6815 = vmatpush3.msra.mxu0 %v1404_v9  ;;  %v2285_v9 = vrot.slane %v7557_v44, %v2284_v6 }
 0xca1   :  { %6824 = vmatprep.subr.mxu0 %v7427_v5 }
 0xca3   :  { %v1794_v26 = vpop.permute.xlu0 %1793 }
 0xca5   :  { %v7246_v10 = vpop.eup %7245 }
 0xca6   :  { %v1401_v11 = vmul.f32 %v7246_v10, %v7242_v32 }
 0xca8   :  { %v1402_v12 = vsel %vm181_vm7, %v1401_v11, 0.0 }
 0xca9   :  { %v7248_v13 = vpop.eup %7247  ;;  %6817 = vmatmul.mubr.msk.f32.vlgmr.msra.gmra.mxu0 %vm332_vm5, %v1402_v12 }
 0xcaa   :  { %6825 = vmatpush3.msra.mxu0 %v1572_v14  ;;  %6826 = vmatprep.mubr.msk.f32.mxu0 %vm7428_vm4, %v7427_v5  ;;  %v1569_v15 = vmul.f32 %v7248_v13, %v7244_v4 }
 0xcab   :  { %6834 = vmatprep.subr.mxu0 %v7427_v5 }
 0xcac   :  { %v1570_v16 = vsel %vm181_vm7, %v1569_v15, 0.0 }
 0xcad   :  { %6827 = vmatmul.mubr.msk.f32.vlgmr.msra.gmra.mxu0 %vm332_vm5, %v1570_v16 }
 0xcae   :  { %6835 = vmatpush3.msra.mxu0 %v7656_v62  ;;  %6836 = vmatprep.mubr.msk.f32.mxu0 %vm7428_vm4, %v7427_v5  ;;  %v1796_v62 = vpop.permute.xlu1 %1795 }
 0xcaf   :  { %6844 = vmatprep.subr.mxu0 %v7427_v5 }
 0xcc4   :  { %v1306_v17 = vpop.f32.mrf.mxu0 }
 0xcc5   :  { %v1310_v20 = vadd.f32 %v1306_v17, %v7718_v37 }
 0xcc6   :  { %v6808_v21 = vpop.f32.mrf.mxu0 }
 0xcc7   :  { %1311 = vst.msk [vmem:[#allocation2] sm:$0xff] %vm204_vm3, %v1310_v20 }
 0xcce   :  { %v2278_v7 = vld [vmem:[#allocation2] sm:$0xff] }
 0xccf   :  { %v2280_v8 = vadd.f32 %v2278_v7, %v7511_v18  ;;  %v175_v7 = vld [vmem:[#allocation3 + $0x8] sm:$0xff] }
 0xcd1   :  { %v7818_v12 = vadd.f32 %v2285_v9, %v2280_v8  ;;  %v176_v8 = vld [vmem:[#allocation3 + $0x10] sm:$0xff] }
 0xd69   :  { %v1475_v22 = vpop.f32.mrf.mxu0 }
 0xd6a   :  { %6837 = vmatmul.mubr.msk.f32.vlgmr.msra.gmra.mxu0 %vm332_vm5, %v1475_v22 }
 0xd6b   :  { %v6818_v23 = vpop.f32.mrf.mxu0  ;;  %6846 = vmatprep.mubr.msk.f32.mxu0 %vm7428_vm4, %v7427_v5 }
 0xd6d   :  { %v1643_v24 = vpop.f32.mrf.mxu0 }
 0xd6e   :  { %6832 = vmatmul.mubr.msk.f32.vlgmr.msra.gmra.mxu1 %vm332_vm5, %v1643_v24 }
 0xd6f   :  { %6840 = vmatpush3.xpose.msk.msra.mxu1 %vm332_vm5, %v1796_v62  ;;  %v6828_v61 = vpop.f32.mrf.mxu0  ;;  %6841 = vmatprep.mubr.msk.f32.mxu1 %vm7428_vm4, %v7427_v5 }
 0xd70   :  { %6849 = vmatprep.subr.mxu1 %v7427_v5 }
 0xd72   :  { %6842 = vmatmul.mubr.msk.f32.vlgmr.msra.gmra.mxu1 %vm332_vm5, %v1794_v26 }
 0xd73   :  { %6850 = vmatpush3.msra.mxu1 %v7691_v25  ;;  %6851 = vmatprep.mubr.msk.f32.mxu1 %vm7428_vm4, %v7427_v5 }
 0xd74   :  { %6859 = vmatprep.subr.mxu1 %v7427_v5 }
 0xe2a   :  { %v1789_v33 = vpop.f32.mrf.mxu0 }
 0xe2c   :  { %v6838_v27 = vpop.f32.mrf.mxu0 }
 0xe2e   :  { %v1716_v28 = vpop.f32.mrf.mxu1 }
 0xe2f   :  { %v7780_v29 = vadd.f32 %v1789_v33, %v1716_v28 }
 0xe30   :  { %v6833_v30 = vpop.f32.mrf.mxu1 }
 0xe32   :  { %v1867_v31 = vpop.f32.mrf.mxu1 }
 0xe33   :  { %v1871_v36 = vmul.f32 0.35355338, %v1867_v31 }
 0xe34   :  { %v6843_v34 = vpop.f32.mrf.mxu1 }
 0xe35   :  { %v1872_v37 = vsel %vm181_vm7, %v1871_v36, -1e+09  ;;  %v7838_v34 = vld [vmem:[%s8510_s4 + $0x50] sm:$0xff] }
 0xe36   :  { %v1873_v39 = vsel %vm332_vm5, %v1872_v37, -inf }
 0xe37   :  { %1874 = vmax.xlane.f32.xlu1 %v1873_v39  ;;  %v7862_v39 = vld [vmem:[%s8510_s4 + $0x8] sm:$0xff] }
 0xe48   :  { %2037 = vrot.lane.b32.xlu1 %v7576_v59, %s7437_s15 }
 0xe4c   :  { %2035 = vrot.lane.b32.xlu1 %v7576_v59, %s7438_s3 }
 0xec0   :  { %v1875_v25 = vpop.xlane.xlu1 %1874 }
 0xec1   :  { %v1876_v40 = vsub.f32 %v1872_v37, %v1875_v25  ;;  %v7851_v37 = vld [vmem:[%s8510_s4 + $0x38] sm:$0xff] }
 0xec3   :  { %v1877_v46 = vmul.f32 1.442695, %v1876_v40 }
 0xec4   :  { %v2038_v51 = vpop.permute.xlu1 %2037 }
 0xec5   :  { %7249 = vpow2.f32 %v1877_v46 }
 0xec8   :  { %v2036_v54 = vpop.permute.xlu1 %2035 }
 0xed2   :  { %v7250_v47 = vpop.eup %7249 }
 0xed3   :  { %v1879_v38 = vsel %vm332_vm5, %v7250_v47, 0.0 }
 0xed4   :  { %1880 = vadd.xlane.f32.xlu0 %v1879_v38 }
 0xeea   :  { %1885 = vrot.lane.b32.xlu0 %v7576_v59, %s7439_s16 }
 0xf5d   :  { %v1881_v48 = vpop.xlane.xlu0 %1880 }
 0xf5e   :  { %7251 = vrcp.f32 %v1881_v48 }
 0xf61   :  { %v1886_v50 = vpop.permute.xlu0 %1885 }
 0xf62   :  { %6845 = vmatpush3.msra.mxu0 %v1886_v50 }
 0xf63   :  { %6854 = vmatprep.subr.mxu0 %v7427_v5 }
 0xf6b   :  { %v7252_v49 = vpop.eup %7251 }
 0xf6c   :  { %v1883_v52 = vmul.f32 %v7252_v49, %v7250_v47 }
 0xf6e   :  { %v1884_v53 = vsel %vm181_vm7, %v1883_v52, 0.0  ;;  %v7876_v52 = vsub.s32 4, %v7552_v42 }
 0xf6f   :  { %6847 = vmatmul.mubr.msk.f32.vlgmr.msra.gmra.mxu0 %vm332_vm5, %v1884_v53 }
 0xf70   :  { %6855 = vmatpush3.xpose.msk.msra.mxu0 %vm332_vm5, %v2038_v51  ;;  %6856 = vmatprep.mubr.msk.f32.mxu0 %vm7428_vm4, %v7427_v5  ;;  %v7873_v51 = vsub.s32 1, %v7552_v42 }
 0xf71   :  { %6864 = vmatprep.subr.mxu0 %v7427_v5 }
 0xf72   :  { %v2317_v53 = vrot.slane %v7557_v44, %v7873_v51 }
 0xf73   :  { %6857 = vmatmul.mubr.msk.f32.vlgmr.msra.gmra.mxu0 %vm332_vm5, %v2036_v54 }
 0xf74   :  { %6865 = vmatpush3.msra.mxu0 %v7738_v2  ;;  %6866 = vmatprep.mubr.msk.f32.mxu0 %vm7428_vm4, %v7427_v5 }
0x102f   :  { %v1957_v55 = vpop.f32.mrf.mxu0 }
0x1030   :  { %6852 = vmatmul.mubr.msk.f32.vlgmr.msra.gmra.mxu1 %vm332_vm5, %v1957_v55 }
0x1031   :  { %v6848_v57 = vpop.f32.mrf.mxu0  ;;  %6861 = vmatprep.mubr.msk.f32.mxu1 %vm7428_vm4, %v7427_v5 }
0x1033   :  { %v2109_v58 = vpop.f32.mrf.mxu0 }
0x1034   :  { %v2113_v60 = vmul.f32 0.35355338, %v2109_v58  ;;  %v2323_v58 = vrot.slane %v7557_v44, %v7876_v52 }
0x1035   :  { %v6858_v35 = vpop.f32.mrf.mxu0 }
0x1036   :  { %v2114_v63 = vsel %vm181_vm7, %v2113_v60, -1e+09 }
0x1037   :  { %v2115_v0 = vsel %vm332_vm5, %v2114_v63, -inf }
0x1038   :  { %2116 = vmax.xlane.f32.xlu0 %v2115_v0 }
0x104e   :  { %2127 = vrot.lane.b32.xlu0 %v7576_v59, %s7440_s2  ;;  %v2288_v59 = vsel %vm204_vm3, %v7818_v12, 0.0 }
0x1052   :  { %2425 = vrot.lane.b32.xlu0 %v7838_v34, %s7429_s26 }
0x10c1   :  { %v2117_v2 = vpop.xlane.xlu0 %2116 }
0x10c2   :  { %v2118_v32 = vsub.f32 %v2114_v63, %v2117_v2  ;;  %v174_v63 = vld [vmem:[#allocation3] sm:$0xff] }
0x10c4   :  { %v2119_v3 = vmul.f32 1.442695, %v2118_v32 }
0x10c5   :  { %v2128_v4 = vpop.permute.xlu0 %2127 }
0x10c6   :  { %7253 = vpow2.f32 %v2119_v3  ;;  %6860 = vmatpush3.msra.mxu1 %v2128_v4 }
0x10c7   :  { %6869 = vmatprep.subr.mxu1 %v7838_v34 }
0x10c9   :  { %v2426_v55 = vpop.permute.xlu0 %2425 }
0x10ca   :  { %6880 = vmatprep.subr.mxu0 %v2426_v55 }
0x10d3   :  { %v7254_v10 = vpop.eup %7253 }
0x10d4   :  { %v2121_v11 = vsel %vm332_vm5, %v7254_v10, 0.0 }
0x10d5   :  { %2122 = vadd.xlane.f32.xlu1 %v2121_v11 }
0x10d9   :  { %2289 = vadd.xlane.f32.xlu1 %v2288_v59 }
0x10f0   :  { %v2030_v13 = vpop.f32.mrf.mxu1 }
0x10f1   :  { %v2034_v14 = vadd.f32 %v2030_v13, %v7780_v29 }
0x10f2   :  { %v6853_v15 = vpop.f32.mrf.mxu1 }
0x115e   :  { %v2123_v16 = vpop.xlane.xlu1 %2122 }
0x115f   :  { %7255 = vrcp.f32 %v2123_v16 }
0x1162   :  { %v2290_v61 = vpop.xlane.xlu1 %2289 }
0x1163   :  { %v2294_v26 = vmul.f32 0.03125, %v2290_v61 }
0x1165   :  { %v2296_v27 = vsub.f32 %v7818_v12, %v2294_v26 }
0x1167   :  { %v2298_v31 = vmul.f32 %v2296_v27, %v2296_v27 }
0x1169   :  { %v2300_v36 = vsel %vm204_vm3, %v2298_v31, 0.0 }
0x116c   :  { %v7256_v18 = vpop.eup %7255 }
0x116d   :  { %v2125_v17 = vmul.f32 %v7256_v18, %v7254_v10 }
0x116f   :  { %v2126_v20 = vsel %vm181_vm7, %v2125_v17, 0.0 }
0x1170   :  { %6862 = vmatmul.mubr.msk.f32.vlgmr.msra.gmra.mxu1 %vm332_vm5, %v2126_v20 }
0x1171   :  { %6870 = vmatpush3.msra.mxu1 %v7838_v34 }
0x1172   :  { %6871 = vmatprep.subr.mxu1 %v7851_v37 }
0x1173   :  { %6872 = vmatpush3.msra.mxu1 %v7851_v37 }
0x1230   :  { %v2199_v21 = vpop.f32.mrf.mxu1 }
0x1231   :  { %6867 = vmatmul.mubr.msk.f32.vlgmr.msra.gmra.mxu0 %vm332_vm5, %v2199_v21 }
0x1232   :  { %v6863_v22 = vpop.f32.mrf.mxu1  ;;  %6881 = vmatpush3.msra.mxu0 %v2426_v55  ;;  %6888 = vmatprep.mubr.msk.f32.mxu0 %vm204_vm3, %v174_v63 }
0x12f1   :  { %v2272_v23 = vpop.f32.mrf.mxu0 }
0x12f2   :  { %v2276_v24 = vadd.f32 %v2272_v23, %v2034_v14  ;;  %v7895_v14 = vld [vmem:[#allocation8 + $0x8] sm:$0xff] }
0x12f3   :  { %v6868_v62 = vpop.f32.mrf.mxu0  ;;  %v2414_v15 = vrot.slane %v7895_v14, %v7873_v51  ;;  %v2329_v22 = vrot.slane %v7895_v14, %v7555_v43 }
0x12f4   :  { %2277 = vst.msk [vmem:[#allocation2 + $0x8] sm:$0xff] %vm204_vm3, %v2276_v24 }
0x12fb   :  { %v2279_v33 = vld [vmem:[#allocation2 + $0x8] sm:$0xff] }
0x12fc   :  { %v2281_v28 = vadd.f32 %v2279_v33, %v7513_v19  ;;  %v7846_v19 = vld [vmem:[%s8510_s4 + $0x20] sm:$0xff] }
0x12fd   :  { %2421 = vrot.lane.b32.xlu0 %v7846_v19, %s7429_s26  ;;  %6873 = vmatprep.subr.mxu1 %v7846_v19 }
0x12fe   :  { %v7830_v29 = vadd.f32 %v2285_v9, %v2281_v28  ;;  %6874 = vmatpush3.msra.mxu1 %v7846_v19  ;;  %v177_v9 = vld [vmem:[#allocation3 + $0x18] sm:$0xff] }
0x12ff   :  { %6875 = vmatprep.subr.mxu1 %v7862_v39 }
0x1300   :  { %v2291_v30 = vsel %vm204_vm3, %v7830_v29, 0.0  ;;  %6876 = vmatpush3.msra.mxu1 %v7862_v39 }
0x1301   :  { %2292 = vadd.xlane.f32.xlu1 %v2291_v30  ;;  %2419 = vrot.lane.b32.xlu0 %v7862_v39, %s7429_s26 }
0x1302   :  { %6894 = vmatprep.subr.mxu1 %v7427_v5 }
0x1305   :  { %2301 = vadd.xlane.f32.xlu1 %v2300_v36 }
0x136f   :  { %v2422_v2 = vpop.permute.xlu0 %2421 }
0x1373   :  { %v2420_v44 = vpop.permute.xlu0 %2419 }
0x138a   :  { %v2293_v25 = vpop.xlane.xlu1 %2292 }
0x138b   :  { %v2295_v40 = vmul.f32 0.03125, %v2293_v25 }
0x138d   :  { %v2297_v46 = vsub.f32 %v7830_v29, %v2295_v40 }
0x138e   :  { %v2302_v47 = vpop.xlane.xlu1 %2301 }
0x138f   :  { %v2306_v38 = vmul.f32 0.03125, %v2302_v47  ;;  %v2299_v48 = vmul.f32 %v2297_v46, %v2297_v46 }
0x1391   :  { %v2308_v50 = vadd.f32 1e-12, %v2306_v38  ;;  %v2303_v49 = vsel %vm204_vm3, %v2299_v48, 0.0 }
0x1392   :  { %2304 = vadd.xlane.f32.xlu1 %v2303_v49 }
0x1393   :  { %7257 = vrsqrt.f32 %v2308_v50 }
0x13a0   :  { %v7258_v54 = vpop.eup %7257 }
0x13a1   :  { %v2312_v57 = vmul.f32 %v7258_v54, %v2296_v27 }
0x13a3   :  { %v2318_v60 = vmul.f32 %v2317_v53, %v2312_v57  ;;  %2423 = vrot.lane.b32.xlu1 %v7851_v37, %s7429_s26 }
0x13a5   :  { %v2324_v35 = vadd.f32 %v2323_v58, %v2318_v60 }
0x13a7   :  { %6877 = vmatprep.mubr.msk.f32.mxu1 %vm204_vm3, %v2324_v35 }
0x141b   :  { %v2305_v0 = vpop.xlane.xlu1 %2304 }
0x141c   :  { %v2307_v32 = vmul.f32 0.03125, %v2305_v0 }
0x141e   :  { %v2309_v3 = vadd.f32 1e-12, %v2307_v32 }
0x141f   :  { %v2424_v4 = vpop.permute.xlu1 %2423 }
0x1420   :  { %7259 = vrsqrt.f32 %v2309_v3  ;;  %6882 = vmatprep.subr.mxu0 %v2424_v4 }
0x1421   :  { %6883 = vmatpush3.msra.mxu0 %v2424_v4 }
0x1422   :  { %6884 = vmatprep.subr.mxu0 %v2422_v2 }
0x1423   :  { %6885 = vmatpush3.msra.mxu0 %v2422_v2 }
0x1424   :  { %6886 = vmatprep.subr.mxu0 %v2420_v44 }
0x1425   :  { %6887 = vmatpush3.msra.mxu0 %v2420_v44 }
0x1426   :  { %6889 = vmatmul.mubr.msk.f32.vlgmr.msra.gmra.mxu0 %vm204_vm3, %v175_v7  ;;  %6901 = vmatprep.subr.mxu0 %v7427_v5 }
0x1427   :  { %6891 = vmatprep.mubr.msk.f32.mxu0 %vm204_vm3, %v176_v8 }
0x142a   :  { %6892 = vmatmul.mubr.msk.f32.gmra.mxu0 %vm204_vm3, %v177_v9 }
0x142b   :  { %6905 = vmatprep.mubr.msk.f32.mxu0 %vm7428_vm4, %v7427_v5 }
0x142d   :  { %v7260_v10 = vpop.eup %7259 }
0x142e   :  { %v2313_v11 = vmul.f32 %v7260_v10, %v2297_v46 }
0x1430   :  { %v2319_v59 = vmul.f32 %v2317_v53, %v2313_v11 }
0x1432   :  { %v2325_v13 = vadd.f32 %v2323_v58, %v2319_v59 }
0x1434   :  { %6878 = vmatmul.mubr.msk.f32.vlgmr.msra.gmra.mxu1 %vm204_vm3, %v2325_v13 }
0x1435   :  { %6898 = vmatprep.mubr.msk.f32.mxu1 %vm7428_vm4, %v7427_v5 }
0x14e6   :  { %v6890_v16 = vpop.f32.mrf.mxu0 }
0x14e7   :  { %v2515_v18 = vadd.f32 %v6890_v16, %v2414_v15 }
0x14e8   :  { %v2509_v17 = vpop.f32.mrf.mxu0 }
0x14e9   :  { %6895 = vmatpush3.xpose.msk.msra.mxu1 %vm204_vm3, %v2515_v18  ;;  %v2510_v20 = vadd.f32 %v2509_v17, %v2414_v15 }
0x14ea   :  { %6896 = vmatprep.subr.mxu1 %v7427_v5  ;;  %v6893_v23 = vpop.f32.mrf.mxu0 }
0x14eb   :  { %v2525_v24 = vadd.f32 %v6893_v23, %v2414_v15 }
0x14ec   :  { %v2519_v26 = vpop.f32.mrf.mxu0 }
0x14ed   :  { %6897 = vmatpush3.xpose.msk.msra.mxu1 %vm204_vm3, %v2510_v20  ;;  %v2520_v33 = vadd.f32 %v2519_v26, %v2414_v15  ;;  %v7954_v26 = vsub.s32 2, %v7552_v42 }
0x14ee   :  { %6908 = vmatprep.subr.mxu1 %v7427_v5 }
0x14f4   :  { %v6879_v21 = vpop.f32.mrf.mxu1 }
0x14f5   :  { %v2408_v27 = vadd.f32 %v6879_v21, %v2329_v22 }
0x14f6   :  { %v2402_v62 = vpop.f32.mrf.mxu1 }
0x14f7   :  { %v2403_v61 = vadd.f32 %v2402_v62, %v2329_v22 }
0x14f9   :  { %6899 = vmatmul.mubr.msk.f32.vlgmr.msra.gmra.mxu1 %vm204_vm3, %v2403_v61 }
0x14fa   :  { %6909 = vmatpush3.xpose.msk.msra.mxu1 %vm204_vm3, %v2525_v24  ;;  %6912 = vmatprep.mubr.msk.f32.mxu1 %vm7428_vm4, %v7427_v5 }
0x14fb   :  { %6910 = vmatprep.subr.mxu1 %v7427_v5 }
0x14fe   :  { %6911 = vmatpush3.xpose.msk.msra.mxu1 %vm204_vm3, %v2520_v33 }
0x1501   :  { %6913 = vmatmul.mubr.msk.f32.vlgmr.msra.gmra.mxu1 %vm204_vm3, %v2408_v27 }
0x15b9   :  { %v2603_v28 = vpop.f32.mrf.mxu1 }
0x15ba   :  { %v2607_v30 = vmul.f32 0.17677669, %v2603_v28 }
0x15bb   :  { %v6900_v31 = vpop.f32.mrf.mxu1 }
0x15bc   :  { %2609 = vrot.lane.b32.xlu0 %v2607_v30, %s7424_s30 }
0x15c1   :  { %v2787_v36 = vpop.f32.mrf.mxu1 }
0x15c2   :  { %v2791_v25 = vmul.f32 0.17677669, %v2787_v36 }
0x15c3   :  { %v6914_v40 = vpop.f32.mrf.mxu1 }
0x15c4   :  { %2793 = vrot.lane.b32.xlu0 %v2791_v25, %s7424_s30 }
0x162e   :  { %v2610_v46 = vpop.permute.xlu0 %2609 }
0x162f   :  { %v2612_v47 = vsel %vm180_vm6, %v2610_v46, -1e+09 }
0x1630   :  { %v2614_v38 = vsel %vm2613_vm8, %v2612_v47, -inf }
0x1631   :  { %2615 = vmax.xlane.f32.xlu1 %v2614_v38 }
0x1636   :  { %v2794_v48 = vpop.permute.xlu0 %2793 }
0x1637   :  { %v2796_v50 = vsel %vm181_vm7, %v2794_v48, -1e+09 }
0x1638   :  { %v2797_v49 = vsel %vm2613_vm8, %v2796_v50, -inf }
0x1639   :  { %2798 = vmax.xlane.f32.xlu0 %v2797_v49 }
0x16ba   :  { %v2616_v53 = vpop.xlane.xlu1 %2615 }
0x16bb   :  { %v2617_v54 = vsub.f32 %v2612_v47, %v2616_v53 }
0x16bd   :  { %v2618_v55 = vmul.f32 1.442695, %v2617_v54 }
0x16bf   :  { %7261 = vpow2.f32 %v2618_v55 }
0x16c2   :  { %v2799_v57 = vpop.xlane.xlu0 %2798 }
0x16c3   :  { %v2800_v58 = vsub.f32 %v2796_v50, %v2799_v57  ;;  %v193_v57 = vld [vmem:[%s8510_s4 + $0x58] sm:$0xff] }
0x16c4   :  { %6933 = vmatprep.subr.mxu1 %v193_v57 }
0x16c5   :  { %v2801_v60 = vmul.f32 1.442695, %v2800_v58  ;;  %v190_v58 = vld [vmem:[%s8510_s4 + $0x40] sm:$0xff]  ;;  %6934 = vmatpush3.msra.mxu1 %v193_v57 }
0x16c6   :  { %6935 = vmatprep.subr.mxu1 %v190_v58 }
0x16c7   :  { %7263 = vpow2.f32 %v2801_v60  ;;  %v187_v60 = vld [vmem:[%s8510_s4 + $0x28] sm:$0xff]  ;;  %6936 = vmatpush3.msra.mxu1 %v190_v58 }
0x16c8   :  { %6937 = vmatprep.subr.mxu1 %v187_v60 }
0x16c9   :  { %6938 = vmatpush3.msra.mxu1 %v187_v60 }
0x16cc   :  { %v7262_v35 = vpop.eup %7261 }
0x16cd   :  { %2621 = vrot.lane.b32.xlu0 %v7262_v35, %s7431_s28 }
0x16d4   :  { %v7264_v63 = vpop.eup %7263 }
0x16d5   :  { %2804 = vrot.lane.b32.xlu1 %v7264_v63, %s7431_s28 }
0x173f   :  { %v2622_v0 = vpop.permute.xlu0 %2621 }
0x1740   :  { %v2624_v2 = vsel %vm88_vm0, %v2622_v0, 0.0  ;;  %v200_v0 = vld [vmem:[%s8511_s5 + $0x30] sm:$0xff] }
0x1741   :  { %2625 = vadd.xlane.f32.xlu1 %v2624_v2  ;;  %v199_v2 = vld [vmem:[%s8511_s5 + $0x28] sm:$0xff] }
0x1747   :  { %v2805_v32 = vpop.permute.xlu1 %2804 }
0x1748   :  { %v2807_v3 = vsel %vm88_vm0, %v2805_v32, 0.0  ;;  %v198_v32 = vld [vmem:[%s8511_s5 + $0x20] sm:$0xff] }
0x1749   :  { %2808 = vadd.xlane.f32.xlu0 %v2807_v3 }
0x1752   :  { %2633 = vrot.lane.b32.xlu1 %v2510_v20, %s7429_s26 }
0x175f   :  { %2635 = vrot.lane.b32.xlu0 %v2515_v18, %s7429_s26 }
0x1763   :  { %2818 = vrot.lane.b32.xlu0 %v2525_v24, %s7429_s26 }
0x17ca   :  { %v2626_v4 = vpop.xlane.xlu1 %2625 }
0x17cb   :  { %7265 = vrcp.f32 %v2626_v4 }
0x17ce   :  { %v2634_v9 = vpop.permute.xlu1 %2633 }
0x17d2   :  { %v2809_v44 = vpop.xlane.xlu0 %2808 }
0x17d3   :  { %7267 = vrcp.f32 %v2809_v44 }
0x17d6   :  { %v2636_v7 = vpop.permute.xlu0 %2635 }
0x17d7   :  { %6902 = vmatpush3.msra.mxu0 %v2636_v7 }
0x17d8   :  { %v7266_v8 = vpop.eup %7265  ;;  %6903 = vmatprep.subr.mxu0 %v7427_v5 }
0x17d9   :  { %6904 = vmatpush3.msra.mxu0 %v2634_v9  ;;  %v2628_v10 = vmul.f32 %v7266_v8, %v7262_v35  ;;  %v184_v35 = vld [vmem:[%s8510_s4 + $0x10] sm:$0xff] }
0x17da   :  { %6915 = vmatprep.subr.mxu0 %v7427_v5  ;;  %v2819_v18 = vpop.permute.xlu0 %2818  ;;  %6939 = vmatprep.subr.mxu1 %v184_v35 }
0x17db   :  { %v2629_v11 = vsel %vm180_vm6, %v2628_v10, 0.0  ;;  %6940 = vmatpush3.msra.mxu1 %v184_v35  ;;  %v8040_v35 = vld [vmem:[%s8510_s4 + $0xa8] sm:$0xff] }
0x17dc   :  { %2631 = vrot.lane.b32.xlu1 %v2629_v11, %s7431_s28  ;;  %v7329_v11 = vld [vmem:[#allocation8] sm:$0xff]  ;;  %6963 = vmatprep.subr.mxu1 %v8040_v35 }
0x17e0   :  { %v7268_v59 = vpop.eup %7267  ;;  %2816 = vrot.lane.b32.xlu1 %v2520_v33, %s7429_s26  ;;  %v2995_v33 = vrot.slane %v7895_v14, %v7954_v26 }
0x17e1   :  { %v2811_v13 = vmul.f32 %v7268_v59, %v7264_v63  ;;  %v201_v63 = vld [vmem:[%s8511_s5 + $0x38] sm:$0xff]  ;;  %v3027_v59 = vrot.slane %v7329_v11, %v7954_v26 }
0x17e3   :  { %v2812_v15 = vsel %vm181_vm7, %v2811_v13, 0.0  ;;  %v3032_v13 = vsub.s32 5, %v7552_v42  ;;  %v6451_v42 = vld [vmem:[%s8511_s5 + $0x48] sm:$0xff] }
0x17e4   :  { %2814 = vrot.lane.b32.xlu0 %v2812_v15, %s7431_s28  ;;  %2903 = vrot.lane.b32.xlu1 %v7838_v34, %s7435_s13 }
0x17e8   :  { %2901 = vrot.lane.b32.xlu0 %v7851_v37, %s7435_s13  ;;  %2899 = vrot.lane.b32.xlu1 %v7846_v19, %s7435_s13 }
0x17ec   :  { %2897 = vrot.lane.b32.xlu0 %v7862_v39, %s7435_s13 }
0x184e   :  { %v2632_v16 = vpop.permute.xlu1 %2631 }
0x184f   :  { %6906 = vmatmul.mubr.msk.f32.vlgmr.msra.gmra.mxu0 %vm88_vm0, %v2632_v16 }
0x1850   :  { %6916 = vmatpush3.msra.mxu0 %v2819_v18  ;;  %6919 = vmatprep.mubr.msk.f32.mxu0 %vm7428_vm4, %v7427_v5 }
0x1851   :  { %6917 = vmatprep.subr.mxu0 %v7427_v5 }
0x1852   :  { %v2817_v34 = vpop.permute.xlu1 %2816 }
0x1853   :  { %6918 = vmatpush3.msra.mxu0 %v2817_v34 }
0x1856   :  { %v2815_v17 = vpop.permute.xlu0 %2814  ;;  %v2904_v37 = vpop.permute.xlu1 %2903 }
0x1857   :  { %6920 = vmatmul.mubr.msk.f32.vlgmr.msra.gmra.mxu0 %vm88_vm0, %v2815_v17  ;;  %6922 = vmatprep.subr.mxu0 %v2904_v37  ;;  %v3033_v17 = vrot.slane %v7329_v11, %v3032_v13 }
0x1858   :  { %6923 = vmatpush3.msra.mxu0 %v2904_v37 }
0x185a   :  { %v2902_v19 = vpop.permute.xlu0 %2901  ;;  %v2900_v39 = vpop.permute.xlu1 %2899 }
0x185b   :  { %6924 = vmatprep.subr.mxu0 %v2902_v19 }
0x185c   :  { %6925 = vmatpush3.msra.mxu0 %v2902_v19 }
0x185d   :  { %6926 = vmatprep.subr.mxu0 %v2900_v39 }
0x185e   :  { %6927 = vmatpush3.msra.mxu0 %v2900_v39  ;;  %v2898_v20 = vpop.permute.xlu0 %2897 }
0x185f   :  { %6928 = vmatprep.subr.mxu0 %v2898_v20 }
0x1860   :  { %6929 = vmatpush3.msra.mxu0 %v2898_v20  ;;  %v197_v20 = vld [vmem:[%s8511_s5 + $0x18] sm:$0xff] }
0x1861   :  { %6944 = vmatprep.subr.mxu0 %v201_v63 }
0x190f   :  { %v2707_v21 = vpop.f32.mrf.mxu0 }
0x1910   :  { %2711 = vst.msk [vmem:[#allocation2] sm:$0xff] %vm204_vm3, %v2707_v21  ;;  %v196_v21 = vld [vmem:[%s8511_s5 + $0x10] sm:$0xff] }
0x1911   :  { %v6907_v22 = vpop.f32.mrf.mxu0 }
0x1912   :  { %v195_v22 = vld [vmem:[%s8511_s5 + $0x8] sm:$0xff] }
0x1917   :  { %v2890_v23 = vpop.f32.mrf.mxu0  ;;  %v2895_v24 = vld [vmem:[#allocation2] sm:$0xff] }
0x1918   :  { %2894 = vst.msk [vmem:[#allocation2 + $0x8] sm:$0xff] %vm204_vm3, %v2890_v23  ;;  %6930 = vmatprep.mubr.msk.f32.mxu0 %vm204_vm3, %v2895_v24  ;;  %v194_v23 = vld [vmem:[%s8511_s5] sm:$0xff]  ;;  %v3039_v24 = vrot.slane %v7895_v14, %v7560_v45 }
0x1919   :  { %v6921_v62 = vpop.f32.mrf.mxu0 }
0x191f   :  { %v2896_v61 = vld [vmem:[#allocation2 + $0x8] sm:$0xff] }
0x1920   :  { %6931 = vmatmul.mubr.msk.f32.vlgmr.msra.gmra.mxu0 %vm204_vm3, %v2896_v61 }
0x1921   :  { %6945 = vmatpush3.msra.mxu0 %v201_v63  ;;  %v8045_v63 = vld [vmem:[%s8510_s4 + $0x90] sm:$0xff] }
0x1922   :  { %6946 = vmatprep.subr.mxu0 %v200_v0 }
0x1923   :  { %6947 = vmatpush3.msra.mxu0 %v200_v0  ;;  %v6441_v0 = vld [vmem:[%s8510_s4 + $0x78] sm:$0xff] }
0x1924   :  { %6948 = vmatprep.subr.mxu0 %v199_v2 }
0x1925   :  { %6949 = vmatpush3.msra.mxu0 %v199_v2  ;;  %v8057_v2 = vld [vmem:[%s8510_s4 + $0x60] sm:$0xff] }
0x1926   :  { %6950 = vmatprep.subr.mxu0 %v198_v32 }
0x1927   :  { %6951 = vmatpush3.msra.mxu0 %v198_v32 }
0x1928   :  { %6952 = vmatprep.subr.mxu0 %v197_v20 }
0x1929   :  { %6953 = vmatpush3.msra.mxu0 %v197_v20 }
0x192a   :  { %6954 = vmatprep.subr.mxu0 %v196_v21 }
0x192b   :  { %6955 = vmatpush3.msra.mxu0 %v196_v21 }
0x192c   :  { %6956 = vmatprep.subr.mxu0 %v195_v22 }
0x192d   :  { %6957 = vmatpush3.msra.mxu0 %v195_v22 }
0x192e   :  { %6958 = vmatprep.subr.mxu0 %v194_v23 }
0x192f   :  { %6959 = vmatpush3.msra.mxu0 %v194_v23 }
0x1930   :  { %6984 = vmatprep.subr.mxu0 %v7427_v5 }
0x19e0   :  { %v6932_v27 = vpop.f32.mrf.mxu0 }
0x19e1   :  { %v2991_v28 = vadd.f32 %v6932_v27, %v7830_v29 }
0x19e2   :  { %v2981_v30 = vpop.f32.mrf.mxu0 }
0x19e3   :  { %v7959_v31 = vadd.f32 %v2995_v33, %v2991_v28  ;;  %v2990_v36 = vadd.f32 %v2981_v30, %v7818_v12 }
0x19e5   :  { %v7962_v25 = vadd.f32 %v2995_v33, %v2990_v36  ;;  %v3001_v40 = vsel %vm204_vm3, %v7959_v31, 0.0  ;;  %v3210_v36 = vrot.slane %v7895_v14, %v7876_v52 }
0x19e6   :  { %3002 = vadd.xlane.f32.xlu0 %v3001_v40 }
0x19e7   :  { %v2998_v46 = vsel %vm204_vm3, %v7962_v25, 0.0 }
0x19e8   :  { %2999 = vadd.xlane.f32.xlu1 %v2998_v46 }
0x1a6f   :  { %v3003_v47 = vpop.xlane.xlu0 %3002 }
0x1a70   :  { %v3005_v38 = vmul.f32 0.03125, %v3003_v47 }
0x1a71   :  { %v3000_v48 = vpop.xlane.xlu1 %2999 }
0x1a72   :  { %v3007_v29 = vsub.f32 %v7959_v31, %v3005_v38  ;;  %v3004_v50 = vmul.f32 0.03125, %v3000_v48 }
0x1a74   :  { %v3006_v49 = vsub.f32 %v7962_v25, %v3004_v50  ;;  %v3009_v53 = vmul.f32 %v3007_v29, %v3007_v29 }
0x1a76   :  { %v3013_v12 = vsel %vm204_vm3, %v3009_v53, 0.0  ;;  %v3008_v54 = vmul.f32 %v3006_v49, %v3006_v49 }
0x1a77   :  { %3014 = vadd.xlane.f32.xlu1 %v3013_v12 }
0x1a78   :  { %v3010_v55 = vsel %vm204_vm3, %v3008_v54, 0.0 }
0x1a79   :  { %3011 = vadd.xlane.f32.xlu0 %v3010_v55 }
0x1b00   :  { %v3015_v3 = vpop.xlane.xlu1 %3014 }
0x1b01   :  { %v3017_v4 = vmul.f32 0.03125, %v3015_v3 }
0x1b02   :  { %v3012_v44 = vpop.xlane.xlu0 %3011 }
0x1b03   :  { %v3019_v7 = vadd.f32 1e-12, %v3017_v4  ;;  %v3016_v8 = vmul.f32 0.03125, %v3012_v44 }
0x1b05   :  { %7269 = vrsqrt.f32 %v3019_v7  ;;  %v3018_v9 = vadd.f32 1e-12, %v3016_v8 }
0x1b07   :  { %7271 = vrsqrt.f32 %v3018_v9  ;;  %v8062_v9 = vld [vmem:[#allocation8 + $0x10] sm:$0xff] }
0x1b08   :  { %v3267_v11 = vrot.slane %v8062_v9, %v7555_v43 }
0x1b12   :  { %v7270_v10 = vpop.eup %7269 }
0x1b13   :  { %v3023_v15 = vmul.f32 %v7270_v10, %v3007_v29 }
0x1b14   :  { %v7272_v16 = vpop.eup %7271 }
0x1b15   :  { %v3022_v18 = vmul.f32 %v7272_v16, %v3006_v49  ;;  %v3029_v34 = vmul.f32 %v3027_v59, %v3023_v15 }
0x1b17   :  { %v3028_v37 = vmul.f32 %v3027_v59, %v3022_v18  ;;  %v3035_v39 = vadd.f32 %v3033_v17, %v3029_v34  ;;  %v3273_v34 = vrot.slane %v8062_v9, %v7560_v45 }
0x1b19   :  { %v3034_v19 = vadd.f32 %v3033_v17, %v3028_v37 }
0x1b1b   :  { %6941 = vmatprep.mubr.msk.f32.mxu1 %vm204_vm3, %v3034_v19 }
0x1b1c   :  { %6942 = vmatmul.mubr.msk.f32.vlgmr.msra.gmra.mxu1 %vm204_vm3, %v3035_v39  ;;  %v3279_v39 = vrot.slane %v8062_v9, %v246_v56 }
0x1b1d   :  { %6964 = vmatpush3.msra.mxu1 %v8040_v35 }
0x1b1e   :  { %6965 = vmatprep.subr.mxu1 %v8045_v63 }
0x1b1f   :  { %6966 = vmatpush3.msra.mxu1 %v8045_v63 }
0x1b20   :  { %6967 = vmatprep.subr.mxu1 %v6441_v0 }
0x1b21   :  { %6968 = vmatpush3.msra.mxu1 %v6441_v0 }
0x1b22   :  { %6969 = vmatprep.subr.mxu1 %v8057_v2 }
0x1b23   :  { %6970 = vmatpush3.msra.mxu1 %v8057_v2 }
0x1b24   :  { %6974 = vmatprep.subr.mxu1 %v7427_v5 }
0x1bdc   :  { %v6943_v62 = vpop.f32.mrf.mxu1 }
0x1bdd   :  { %v3118_v61 = vadd.f32 %v6943_v62, %v3039_v24 }
0x1bde   :  { %v3112_v33 = vpop.f32.mrf.mxu1 }
0x1bdf   :  { %v3113_v27 = vadd.f32 %v3112_v33, %v3039_v24  ;;  %v3122_v30 = vmax.f32 %v3118_v61, 0.0 }
0x1be1   :  { %v3121_v28 = vmax.f32 %v3113_v27, 0.0 }
0x1be3   :  { %6960 = vmatprep.mubr.msk.f32.mxu0 %vm3123_vm9, %v3121_v28 }
0x1be4   :  { %6961 = vmatmul.mubr.msk.f32.vlgmr.msra.gmra.mxu0 %vm3123_vm9, %v3122_v30 }
0x1be5   :  { %6986 = vmatprep.mubr.msk.f32.mxu0 %vm7428_vm4, %v7427_v5 }
0x1ca4   :  { %v6962_v40 = vpop.f32.mrf.mxu0 }
0x1ca5   :  { %v3206_v46 = vadd.f32 %v6962_v40, %v7959_v31 }
0x1ca6   :  { %v3196_v47 = vpop.f32.mrf.mxu0 }
0x1ca7   :  { %v8024_v38 = vadd.f32 %v3210_v36, %v3206_v46  ;;  %v3205_v48 = vadd.f32 %v3196_v47, %v7962_v25 }
0x1ca9   :  { %v8027_v29 = vadd.f32 %v3210_v36, %v3205_v48  ;;  %v3241_v50 = vsel %vm204_vm3, %v8024_v38, 0.0 }
0x1caa   :  { %3242 = vadd.xlane.f32.xlu1 %v3241_v50 }
0x1cab   :  { %v3238_v49 = vsel %vm204_vm3, %v8027_v29, 0.0 }
0x1cac   :  { %3239 = vadd.xlane.f32.xlu0 %v3238_v49 }
0x1d33   :  { %v3243_v53 = vpop.xlane.xlu1 %3242 }
0x1d34   :  { %v3245_v14 = vmul.f32 0.03125, %v3243_v53 }
0x1d35   :  { %v3240_v12 = vpop.xlane.xlu0 %3239 }
0x1d36   :  { %v3247_v31 = vsub.f32 %v8024_v38, %v3245_v14  ;;  %v3244_v54 = vmul.f32 0.03125, %v3240_v12 }
0x1d38   :  { %v3246_v55 = vsub.f32 %v8027_v29, %v3244_v54  ;;  %v3249_v57 = vmul.f32 %v3247_v31, %v3247_v31 }
0x1d3a   :  { %v3253_v25 = vsel %vm204_vm3, %v3249_v57, 0.0  ;;  %v3248_v58 = vmul.f32 %v3246_v55, %v3246_v55 }
0x1d3b   :  { %3254 = vadd.xlane.f32.xlu1 %v3253_v25 }
0x1d3c   :  { %v3250_v60 = vsel %vm204_vm3, %v3248_v58, 0.0 }
0x1d3d   :  { %3251 = vadd.xlane.f32.xlu0 %v3250_v60 }
0x1dc4   :  { %v3255_v32 = vpop.xlane.xlu1 %3254 }
0x1dc5   :  { %v3257_v3 = vmul.f32 0.03125, %v3255_v32 }
0x1dc6   :  { %v3252_v4 = vpop.xlane.xlu0 %3251 }
0x1dc7   :  { %v3259_v44 = vadd.f32 1e-12, %v3257_v3  ;;  %v3256_v7 = vmul.f32 0.03125, %v3252_v4 }
0x1dc9   :  { %7273 = vrsqrt.f32 %v3259_v44  ;;  %v3258_v8 = vadd.f32 1e-12, %v3256_v7 }
0x1dcb   :  { %7275 = vrsqrt.f32 %v3258_v8 }
0x1dd6   :  { %v7274_v10 = vpop.eup %7273 }
0x1dd7   :  { %v3263_v59 = vmul.f32 %v7274_v10, %v3247_v31 }
0x1dd8   :  { %v7276_v15 = vpop.eup %7275 }
0x1dd9   :  { %v3262_v16 = vmul.f32 %v7276_v15, %v3246_v55  ;;  %v3269_v18 = vmul.f32 %v3267_v11, %v3263_v59 }
0x1ddb   :  { %v3268_v17 = vmul.f32 %v3267_v11, %v3262_v16  ;;  %v3275_v19 = vadd.f32 %v3273_v34, %v3269_v18 }
0x1ddd   :  { %v3274_v37 = vadd.f32 %v3273_v34, %v3268_v17 }
0x1ddf   :  { %6971 = vmatprep.mubr.msk.f32.mxu1 %vm204_vm3, %v3274_v37 }
0x1de0   :  { %6972 = vmatmul.mubr.msk.f32.vlgmr.msra.gmra.mxu1 %vm204_vm3, %v3275_v19 }
0x1de1   :  { %6976 = vmatprep.mubr.msk.f32.mxu1 %vm7428_vm4, %v7427_v5 }
0x1ea0   :  { %v6973_v20 = vpop.f32.mrf.mxu1 }
0x1ea1   :  { %v8075_v21 = vadd.f32 %v6973_v20, %v3279_v39 }
0x1ea2   :  { %v3352_v22 = vpop.f32.mrf.mxu1 }
0x1ea3   :  { %v8077_v23 = vadd.f32 %v3352_v22, %v3279_v39 }
0x1ea5   :  { %3530 = vrot.lane.b32.xlu1 %v8077_v23, %s7430_s27  ;;  %3362 = vrot.lane.b32.xlu0 %v8077_v23, %s7429_s26 }
0x1ea9   :  { %3528 = vrot.lane.b32.xlu1 %v8077_v23, %s7431_s28 }
0x1f17   :  { %v3531_v24 = vpop.permute.xlu1 %3530  ;;  %v3363_v62 = vpop.permute.xlu0 %3362 }
0x1f18   :  { %6975 = vmatpush3.xpose.msk.msra.mxu1 %vm332_vm5, %v3363_v62  ;;  %6985 = vmatpush3.xpose.msk.msra.mxu0 %vm332_vm5, %v3531_v24 }
0x1f19   :  { %6979 = vmatprep.subr.mxu1 %v7427_v5  ;;  %6994 = vmatprep.subr.mxu0 %v7427_v5 }
0x1f1b   :  { %v3529_v56 = vpop.permute.xlu1 %3528  ;;  %6977 = vmatmul.mubr.msk.f32.vlgmr.msra.gmra.mxu1 %vm332_vm5, %v8077_v23 }
0x1f1c   :  { %6987 = vmatmul.mubr.msk.f32.vlgmr.msra.gmra.mxu0 %vm332_vm5, %v3529_v56  ;;  %6981 = vmatprep.mubr.msk.f32.mxu1 %vm7428_vm4, %v7427_v5 }
0x1f1d   :  { %6996 = vmatprep.mubr.msk.f32.mxu0 %vm7428_vm4, %v7427_v5 }
0x1fdb   :  { %v3434_v61 = vpop.f32.mrf.mxu1 }
0x1fdc   :  { %v3438_v33 = vmul.f32 0.35355338, %v3434_v61  ;;  %v3602_v27 = vpop.f32.mrf.mxu0 }
0x1fdd   :  { %v3606_v28 = vmul.f32 0.35355338, %v3602_v27  ;;  %v6978_v30 = vpop.f32.mrf.mxu1 }
0x1fde   :  { %v6988_v36 = vpop.f32.mrf.mxu0  ;;  %v3439_v40 = vsel %vm180_vm6, %v3438_v33, -1e+09 }
0x1fdf   :  { %v3440_v46 = vsel %vm332_vm5, %v3439_v40, -inf  ;;  %v3607_v47 = vsel %vm180_vm6, %v3606_v28, -1e+09 }
0x1fe0   :  { %3441 = vmax.xlane.f32.xlu0 %v3440_v46  ;;  %v3608_v48 = vsel %vm332_vm5, %v3607_v47, -inf }
0x1fe1   :  { %3609 = vmax.xlane.f32.xlu1 %v3608_v48 }
0x1ff2   :  { %3452 = vrot.lane.b32.xlu1 %v8077_v23, %s7432_s10 }
0x1ff6   :  { %3697 = vrot.lane.b32.xlu1 %v6441_v0, %s7435_s13 }
0x1ffa   :  { %3852 = vrot.lane.b32.xlu1 %v8077_v23, %s7434_s12 }
0x2069   :  { %v3442_v50 = vpop.xlane.xlu0 %3441 }
0x206a   :  { %v3443_v49 = vsub.f32 %v3439_v40, %v3442_v50  ;;  %v3610_v53 = vpop.xlane.xlu1 %3609 }
0x206b   :  { %v3611_v14 = vsub.f32 %v3607_v47, %v3610_v53 }
0x206c   :  { %v3444_v12 = vmul.f32 1.442695, %v3443_v49 }
0x206d   :  { %v3612_v31 = vmul.f32 1.442695, %v3611_v14 }
0x206e   :  { %7277 = vpow2.f32 %v3444_v12  ;;  %v3453_v54 = vpop.permute.xlu1 %3452 }
0x206f   :  { %6980 = vmatpush3.msra.mxu1 %v3453_v54  ;;  %7279 = vpow2.f32 %v3612_v31 }
0x2070   :  { %6989 = vmatprep.subr.mxu1 %v7427_v5 }
0x2072   :  { %v8108_v55 = vpop.permute.xlu1 %3697 }
0x2073   :  { %6995 = vmatpush3.msra.mxu0 %v8108_v55 }
0x2074   :  { %7004 = vmatprep.subr.mxu0 %v7427_v5 }
0x2076   :  { %v3853_v18 = vpop.permute.xlu1 %3852 }
0x207b   :  { %v7278_v57 = vpop.eup %7277 }
0x207c   :  { %v3446_v25 = vsel %vm332_vm5, %v7278_v57, 0.0  ;;  %v7280_v58 = vpop.eup %7279 }
0x207d   :  { %3447 = vadd.xlane.f32.xlu0 %v3446_v25  ;;  %v3614_v60 = vsel %vm332_vm5, %v7280_v58, 0.0 }
0x2081   :  { %3615 = vadd.xlane.f32.xlu0 %v3614_v60 }
0x2097   :  { %3620 = vrot.lane.b32.xlu0 %v8077_v23, %s7433_s11 }
0x209b   :  { %3850 = vrot.lane.b32.xlu0 %v8077_v23, %s7436_s14 }
0x2106   :  { %v3448_v0 = vpop.xlane.xlu0 %3447 }
0x2107   :  { %7281 = vrcp.f32 %v3448_v0 }
0x210a   :  { %v3616_v32 = vpop.xlane.xlu0 %3615 }
0x210b   :  { %7283 = vrcp.f32 %v3616_v32 }
0x210e   :  { %v3621_v8 = vpop.permute.xlu0 %3620 }
0x2112   :  { %v3851_v17 = vpop.permute.xlu0 %3850 }
0x2114   :  { %v7282_v3 = vpop.eup %7281 }
0x2115   :  { %v3450_v4 = vmul.f32 %v7282_v3, %v7278_v57 }
0x2117   :  { %v3451_v44 = vsel %vm180_vm6, %v3450_v4, 0.0 }
0x2118   :  { %v7284_v7 = vpop.eup %7283  ;;  %6982 = vmatmul.mubr.msk.f32.vlgmr.msra.gmra.mxu1 %vm332_vm5, %v3451_v44 }
0x2119   :  { %6990 = vmatpush3.msra.mxu1 %v3621_v8  ;;  %6991 = vmatprep.mubr.msk.f32.mxu1 %vm7428_vm4, %v7427_v5  ;;  %v3618_v10 = vmul.f32 %v7284_v7, %v7280_v58 }
0x211a   :  { %6999 = vmatprep.subr.mxu1 %v7427_v5 }
0x211b   :  { %v3619_v11 = vsel %vm180_vm6, %v3618_v10, 0.0 }
0x211c   :  { %6992 = vmatmul.mubr.msk.f32.vlgmr.msra.gmra.mxu1 %vm332_vm5, %v3619_v11 }
0x211d   :  { %7001 = vmatprep.mubr.msk.f32.mxu1 %vm7428_vm4, %v7427_v5 }
0x21d8   :  { %v3524_v59 = vpop.f32.mrf.mxu1 }
0x21da   :  { %v6983_v15 = vpop.f32.mrf.mxu1 }
0x21dc   :  { %v3692_v16 = vpop.f32.mrf.mxu1 }
0x21dd   :  { %6997 = vmatmul.mubr.msk.f32.vlgmr.msra.gmra.mxu0 %vm332_vm5, %v3692_v16 }
0x21de   :  { %7005 = vmatpush3.xpose.msk.msra.mxu0 %vm332_vm5, %v3853_v18  ;;  %v6993_v34 = vpop.f32.mrf.mxu1  ;;  %7006 = vmatprep.mubr.msk.f32.mxu0 %vm7428_vm4, %v7427_v5 }
0x21df   :  { %7014 = vmatprep.subr.mxu0 %v7427_v5 }
0x21e1   :  { %7007 = vmatmul.mubr.msk.f32.vlgmr.msra.gmra.mxu0 %vm332_vm5, %v3851_v17 }
0x21e2   :  { %7016 = vmatprep.mubr.msk.f32.mxu0 %vm7428_vm4, %v7427_v5 }
0x229d   :  { %v8137_v37 = vpop.f32.mrf.mxu0 }
0x229f   :  { %v6998_v19 = vpop.f32.mrf.mxu0 }
0x22a1   :  { %v3924_v39 = vpop.f32.mrf.mxu0 }
0x22a2   :  { %v3928_v20 = vmul.f32 0.35355338, %v3924_v39 }
0x22a3   :  { %v7008_v22 = vpop.f32.mrf.mxu0 }
0x22a4   :  { %v3929_v24 = vsel %vm180_vm6, %v3928_v20, -1e+09 }
0x22a5   :  { %v3930_v62 = vsel %vm332_vm5, %v3929_v24, -inf }
0x22a6   :  { %3931 = vmax.xlane.f32.xlu1 %v3930_v62 }
0x22b7   :  { %3942 = vrot.lane.b32.xlu1 %v8077_v23, %s7439_s16 }
0x22bb   :  { %4098 = vrot.lane.b32.xlu1 %v8077_v23, %s7437_s15 }
0x232f   :  { %v3932_v56 = vpop.xlane.xlu1 %3931 }
0x2330   :  { %v3933_v61 = vsub.f32 %v3929_v24, %v3932_v56 }
0x2332   :  { %v3934_v33 = vmul.f32 1.442695, %v3933_v61 }
0x2333   :  { %v3943_v40 = vpop.permute.xlu1 %3942 }
0x2334   :  { %7285 = vpow2.f32 %v3934_v33 }
0x2337   :  { %v4099_v48 = vpop.permute.xlu1 %4098 }
0x2341   :  { %v7286_v27 = vpop.eup %7285 }
0x2342   :  { %v3936_v28 = vsel %vm332_vm5, %v7286_v27, 0.0 }
0x2343   :  { %3937 = vadd.xlane.f32.xlu0 %v3936_v28 }
0x2359   :  { %3774 = vrot.lane.b32.xlu0 %v8057_v2, %s7435_s13 }
0x235d   :  { %4096 = vrot.lane.b32.xlu0 %v8077_v23, %s7438_s3 }
0x23cc   :  { %v3938_v30 = vpop.xlane.xlu0 %3937 }
0x23cd   :  { %7287 = vrcp.f32 %v3938_v30 }
0x23d0   :  { %v8151_v36 = vpop.permute.xlu0 %3774 }
0x23d1   :  { %7000 = vmatpush3.msra.mxu1 %v8151_v36 }
0x23d2   :  { %7002 = vmatmul.mubr.msk.f32.vlgmr.msra.gmra.mxu1 %vm332_vm5, %v3524_v59  ;;  %7009 = vmatprep.subr.mxu1 %v7427_v5 }
0x23d3   :  { %7010 = vmatpush3.msra.mxu1 %v3943_v40  ;;  %7011 = vmatprep.mubr.msk.f32.mxu1 %vm7428_vm4, %v7427_v5 }
0x23d4   :  { %7019 = vmatprep.subr.mxu1 %v7427_v5  ;;  %v4097_v50 = vpop.permute.xlu0 %4096 }
0x23da   :  { %v7288_v2 = vpop.eup %7287 }
0x23db   :  { %v3940_v46 = vmul.f32 %v7288_v2, %v7286_v27 }
0x23dd   :  { %v3941_v47 = vsel %vm180_vm6, %v3940_v46, 0.0 }
0x23de   :  { %7012 = vmatmul.mubr.msk.f32.vlgmr.msra.gmra.mxu1 %vm332_vm5, %v3941_v47 }
0x23df   :  { %7020 = vmatpush3.xpose.msk.msra.mxu1 %vm332_vm5, %v4099_v48  ;;  %7021 = vmatprep.mubr.msk.f32.mxu1 %vm7428_vm4, %v7427_v5 }
0x23e0   :  { %7029 = vmatprep.subr.mxu1 %v7427_v5 }
0x23e2   :  { %7022 = vmatmul.mubr.msk.f32.vlgmr.msra.gmra.mxu1 %vm332_vm5, %v4097_v50 }
0x23e3   :  { %7031 = vmatprep.mubr.msk.f32.mxu1 %vm7428_vm4, %v7427_v5 }
0x2492   :  { %v3846_v49 = vpop.f32.mrf.mxu1 }
0x2493   :  { %v3847_v16 = vadd.f32 %v3846_v49, %v8137_v37 }
0x2494   :  { %v7003_v53 = vpop.f32.mrf.mxu1 }
0x249e   :  { %v4014_v14 = vpop.f32.mrf.mxu1 }
0x24a0   :  { %v7013_v12 = vpop.f32.mrf.mxu1 }
0x24a2   :  { %v4170_v31 = vpop.f32.mrf.mxu1 }
0x24a3   :  { %v4174_v54 = vmul.f32 0.35355338, %v4170_v31 }
0x24a4   :  { %v7023_v57 = vpop.f32.mrf.mxu1 }
0x24a5   :  { %v4175_v25 = vsel %vm180_vm6, %v4174_v54, -1e+09 }
0x24a6   :  { %v4176_v58 = vsel %vm332_vm5, %v4175_v25, -inf }
0x24a7   :  { %4177 = vmax.xlane.f32.xlu1 %v4176_v58 }
0x24b8   :  { %4188 = vrot.lane.b32.xlu1 %v8077_v23, %s7440_s2 }
0x24bc   :  { %4344 = vrot.lane.b32.xlu1 %v8075_v21, %s7429_s26 }
0x24c0   :  { %4510 = vrot.lane.b32.xlu1 %v8075_v21, %s7431_s28 }
0x2530   :  { %v4178_v60 = vpop.xlane.xlu1 %4177 }
0x2531   :  { %v4179_v0 = vsub.f32 %v4175_v25, %v4178_v60 }
0x2533   :  { %v4180_v32 = vmul.f32 1.442695, %v4179_v0 }
0x2534   :  { %v4189_v7 = vpop.permute.xlu1 %4188 }
0x2535   :  { %7289 = vpow2.f32 %v4180_v32 }
0x2538   :  { %v4345_v11 = vpop.permute.xlu1 %4344 }
0x253c   :  { %v4511_v15 = vpop.permute.xlu1 %4510 }
0x2542   :  { %v7290_v3 = vpop.eup %7289 }
0x2543   :  { %v4182_v4 = vsel %vm332_vm5, %v7290_v3, 0.0 }
0x2544   :  { %4183 = vadd.xlane.f32.xlu0 %v4182_v4 }
0x255a   :  { %4019 = vrot.lane.b32.xlu0 %v8045_v63, %s7435_s13 }
0x255e   :  { %4512 = vrot.lane.b32.xlu0 %v8075_v21, %s7430_s27 }
0x25cd   :  { %v4184_v23 = vpop.xlane.xlu0 %4183 }
0x25ce   :  { %7291 = vrcp.f32 %v4184_v23 }
0x25d1   :  { %v8183_v44 = vpop.permute.xlu0 %4019 }
0x25d2   :  { %7015 = vmatpush3.msra.mxu0 %v8183_v44 }
0x25d3   :  { %7017 = vmatmul.mubr.msk.f32.vlgmr.msra.gmra.mxu0 %vm332_vm5, %v4014_v14  ;;  %7024 = vmatprep.subr.mxu0 %v7427_v5 }
0x25d4   :  { %7025 = vmatpush3.msra.mxu0 %v4189_v7  ;;  %7026 = vmatprep.mubr.msk.f32.mxu0 %vm7428_vm4, %v7427_v5 }
0x25d5   :  { %7034 = vmatprep.subr.mxu0 %v7427_v5  ;;  %v4513_v59 = vpop.permute.xlu0 %4512 }
0x25db   :  { %v7292_v63 = vpop.eup %7291 }
0x25dc   :  { %v4186_v8 = vmul.f32 %v7292_v63, %v7290_v3 }
0x25de   :  { %v4187_v10 = vsel %vm180_vm6, %v4186_v8, 0.0 }
0x25df   :  { %7027 = vmatmul.mubr.msk.f32.vlgmr.msra.gmra.mxu0 %vm332_vm5, %v4187_v10 }
0x25e0   :  { %7035 = vmatpush3.xpose.msk.msra.mxu0 %vm332_vm5, %v4345_v11  ;;  %7036 = vmatprep.mubr.msk.f32.mxu0 %vm7428_vm4, %v7427_v5 }
0x25e1   :  { %7044 = vmatprep.subr.mxu0 %v7427_v5 }
0x25e3   :  { %7037 = vmatmul.mubr.msk.f32.vlgmr.msra.gmra.mxu0 %vm332_vm5, %v8075_v21 }
0x25e4   :  { %7045 = vmatpush3.xpose.msk.msra.mxu0 %vm332_vm5, %v4513_v59  ;;  %7046 = vmatprep.mubr.msk.f32.mxu0 %vm7428_vm4, %v7427_v5 }
0x25e5   :  { %7054 = vmatprep.subr.mxu0 %v7427_v5 }
0x25e7   :  { %7047 = vmatmul.mubr.msk.f32.vlgmr.msra.gmra.mxu0 %vm332_vm5, %v4511_v15 }
0x25e8   :  { %7055 = vmatpush3.msra.mxu0 %v8108_v55  ;;  %7056 = vmatprep.mubr.msk.f32.mxu0 %vm7428_vm4, %v7427_v5 }
0x25e9   :  { %7064 = vmatprep.subr.mxu0 %v7427_v5 }
0x2693   :  { %v4091_v18 = vpop.f32.mrf.mxu0 }
0x2694   :  { %v8210_v34 = vadd.f32 %v4091_v18, %v3847_v16 }
0x2695   :  { %v7018_v17 = vpop.f32.mrf.mxu0 }
0x269f   :  { %v4260_v19 = vpop.f32.mrf.mxu0 }
0x26a1   :  { %v7028_v39 = vpop.f32.mrf.mxu0 }
0x26a3   :  { %v4416_v20 = vpop.f32.mrf.mxu0 }
0x26a4   :  { %v4420_v22 = vmul.f32 0.35355338, %v4416_v20 }
0x26a5   :  { %v7038_v24 = vpop.f32.mrf.mxu0 }
0x26a6   :  { %v4421_v62 = vsel %vm181_vm7, %v4420_v22, -1e+09 }
0x26a7   :  { %v4584_v55 = vpop.f32.mrf.mxu0  ;;  %v4422_v56 = vsel %vm332_vm5, %v4421_v62, -inf }
0x26a8   :  { %v4588_v61 = vmul.f32 0.35355338, %v4584_v55  ;;  %4423 = vmax.xlane.f32.xlu0 %v4422_v56 }
0x26a9   :  { %v7048_v33 = vpop.f32.mrf.mxu0 }
0x26aa   :  { %v4589_v37 = vsel %vm181_vm7, %v4588_v61, -1e+09 }
0x26ab   :  { %v4590_v27 = vsel %vm332_vm5, %v4589_v37, -inf }
0x26ac   :  { %4591 = vmax.xlane.f32.xlu1 %v4590_v27 }
0x26bd   :  { %4265 = vrot.lane.b32.xlu1 %v8040_v35, %s7435_s13 }
0x26c1   :  { %4602 = vrot.lane.b32.xlu1 %v8075_v21, %s7433_s11 }
0x26c5   :  { %4826 = vrot.lane.b32.xlu1 %v8075_v21, %s7434_s12 }
0x2731   :  { %v4424_v28 = vpop.xlane.xlu0 %4423 }
0x2732   :  { %v4425_v30 = vsub.f32 %v4421_v62, %v4424_v28 }
0x2734   :  { %v4426_v40 = vmul.f32 1.442695, %v4425_v30 }
0x2735   :  { %v4592_v2 = vpop.xlane.xlu1 %4591 }
0x2736   :  { %7293 = vpow2.f32 %v4426_v40  ;;  %v4593_v46 = vsub.f32 %v4589_v37, %v4592_v2 }
0x2738   :  { %v4594_v47 = vmul.f32 1.442695, %v4593_v46 }
0x2739   :  { %v8224_v48 = vpop.permute.xlu1 %4265 }
0x273a   :  { %7295 = vpow2.f32 %v4594_v47  ;;  %7030 = vmatpush3.msra.mxu1 %v8224_v48 }
0x273b   :  { %7032 = vmatmul.mubr.msk.f32.vlgmr.msra.gmra.mxu1 %vm332_vm5, %v4260_v19  ;;  %7039 = vmatprep.subr.mxu1 %v7427_v5 }
0x273c   :  { %7041 = vmatprep.mubr.msk.f32.mxu1 %vm7428_vm4, %v7427_v5 }
0x273d   :  { %v4603_v60 = vpop.permute.xlu1 %4602 }
0x2743   :  { %v7294_v35 = vpop.eup %7293 }
0x2744   :  { %v4428_v50 = vsel %vm332_vm5, %v7294_v35, 0.0 }
0x2745   :  { %4429 = vadd.xlane.f32.xlu0 %v4428_v50 }
0x2747   :  { %v7296_v49 = vpop.eup %7295 }
0x2748   :  { %v4596_v53 = vsel %vm332_vm5, %v7296_v49, 0.0 }
0x2749   :  { %4597 = vadd.xlane.f32.xlu0 %v4596_v53 }
0x275f   :  { %4434 = vrot.lane.b32.xlu0 %v8075_v21, %s7432_s10 }
0x2763   :  { %4824 = vrot.lane.b32.xlu0 %v8075_v21, %s7436_s14 }
0x27ce   :  { %v4430_v14 = vpop.xlane.xlu0 %4429 }
0x27cf   :  { %7297 = vrcp.f32 %v4430_v14 }
0x27d2   :  { %v4598_v12 = vpop.xlane.xlu0 %4597 }
0x27d3   :  { %7299 = vrcp.f32 %v4598_v12 }
0x27d6   :  { %v4435_v31 = vpop.permute.xlu0 %4434 }
0x27d7   :  { %7040 = vmatpush3.msra.mxu1 %v4435_v31 }
0x27d8   :  { %7049 = vmatprep.subr.mxu1 %v7427_v5 }
0x27da   :  { %v4825_v11 = vpop.permute.xlu0 %4824 }
0x27dc   :  { %v7298_v54 = vpop.eup %7297 }
0x27dd   :  { %v4432_v57 = vmul.f32 %v7298_v54, %v7294_v35 }
0x27df   :  { %v4433_v25 = vsel %vm181_vm7, %v4432_v57, 0.0 }
0x27e0   :  { %v7300_v58 = vpop.eup %7299  ;;  %7042 = vmatmul.mubr.msk.f32.vlgmr.msra.gmra.mxu1 %vm332_vm5, %v4433_v25  ;;  %v5316_v25 = vrot.slane %v8062_v9, %v2284_v6 }
0x27e1   :  { %7050 = vmatpush3.msra.mxu1 %v4603_v60  ;;  %7051 = vmatprep.mubr.msk.f32.mxu1 %vm7428_vm4, %v7427_v5  ;;  %v4600_v0 = vmul.f32 %v7300_v58, %v7296_v49 }
0x27e2   :  { %7059 = vmatprep.subr.mxu1 %v7427_v5 }
0x27e3   :  { %v4601_v32 = vsel %vm181_vm7, %v4600_v0, 0.0 }
0x27e4   :  { %7052 = vmatmul.mubr.msk.f32.vlgmr.msra.gmra.mxu1 %vm332_vm5, %v4601_v32 }
0x27e5   :  { %7060 = vmatpush3.msra.mxu1 %v8151_v36  ;;  %7061 = vmatprep.mubr.msk.f32.mxu1 %vm7428_vm4, %v7427_v5  ;;  %v4827_v36 = vpop.permute.xlu1 %4826 }
0x27e6   :  { %7069 = vmatprep.subr.mxu1 %v7427_v5 }
0x27fb   :  { %v4337_v3 = vpop.f32.mrf.mxu1 }
0x27fc   :  { %v4341_v4 = vadd.f32 %v4337_v3, %v8210_v34 }
0x27fd   :  { %v7033_v23 = vpop.f32.mrf.mxu1 }
0x27fe   :  { %4342 = vst.msk [vmem:[#allocation2] sm:$0xff] %vm204_vm3, %v4341_v4 }
0x2805   :  { %v5309_v54 = vld [vmem:[#allocation2] sm:$0xff] }
0x2806   :  { %v5311_v57 = vadd.f32 %v5309_v54, %v8027_v29 }
0x2808   :  { %v8301_v0 = vadd.f32 %v5316_v25, %v5311_v57  ;;  %v7332_v57 = vld [vmem:[#allocation3 + $0x10] sm:$0xff] }
0x28a0   :  { %v4506_v7 = vpop.f32.mrf.mxu1 }
0x28a1   :  { %7062 = vmatmul.mubr.msk.f32.vlgmr.msra.gmra.mxu1 %vm332_vm5, %v4506_v7 }
0x28a2   :  { %v7043_v63 = vpop.f32.mrf.mxu1  ;;  %7071 = vmatprep.mubr.msk.f32.mxu1 %vm7428_vm4, %v7427_v5 }
0x28a4   :  { %v4674_v8 = vpop.f32.mrf.mxu1 }
0x28a5   :  { %7057 = vmatmul.mubr.msk.f32.vlgmr.msra.gmra.mxu0 %vm332_vm5, %v4674_v8 }
0x28a6   :  { %7065 = vmatpush3.xpose.msk.msra.mxu0 %vm332_vm5, %v4827_v36  ;;  %v7053_v10 = vpop.f32.mrf.mxu1  ;;  %7066 = vmatprep.mubr.msk.f32.mxu0 %vm7428_vm4, %v7427_v5  ;;  %v7330_v36 = vld [vmem:[#allocation3] sm:$0xff] }
0x28a7   :  { %7074 = vmatprep.subr.mxu0 %v7427_v5 }
0x28a9   :  { %7067 = vmatmul.mubr.msk.f32.vlgmr.msra.gmra.mxu0 %vm332_vm5, %v4825_v11 }
0x28aa   :  { %7075 = vmatpush3.msra.mxu0 %v8183_v44  ;;  %7076 = vmatprep.mubr.msk.f32.mxu0 %vm7428_vm4, %v7427_v5 }
0x28ab   :  { %7084 = vmatprep.subr.mxu0 %v7427_v5 }
0x2961   :  { %v4820_v59 = vpop.f32.mrf.mxu1 }
0x2963   :  { %v7063_v15 = vpop.f32.mrf.mxu1 }
0x2965   :  { %v4747_v16 = vpop.f32.mrf.mxu0 }
0x2966   :  { %v4821_v18 = vadd.f32 %v4820_v59, %v4747_v16 }
0x2967   :  { %v7058_v34 = vpop.f32.mrf.mxu0 }
0x2969   :  { %v4898_v17 = vpop.f32.mrf.mxu0 }
0x296a   :  { %v4902_v19 = vmul.f32 0.35355338, %v4898_v17 }
0x296b   :  { %v7068_v39 = vpop.f32.mrf.mxu0 }
0x296c   :  { %v4903_v20 = vsel %vm181_vm7, %v4902_v19, -1e+09 }
0x296d   :  { %v4904_v22 = vsel %vm332_vm5, %v4903_v20, -inf }
0x296e   :  { %4905 = vmax.xlane.f32.xlu1 %v4904_v22 }
0x297f   :  { %5068 = vrot.lane.b32.xlu1 %v8075_v21, %s7437_s15 }
0x2983   :  { %5066 = vrot.lane.b32.xlu1 %v8075_v21, %s7438_s3 }
0x29f7   :  { %v4906_v44 = vpop.xlane.xlu1 %4905 }
0x29f8   :  { %v4907_v24 = vsub.f32 %v4903_v20, %v4906_v44  ;;  %v8321_v44 = vld [vmem:[%s8510_s4 + $0xb0] sm:$0xff] }
0x29fa   :  { %v4908_v62 = vmul.f32 1.442695, %v4907_v24  ;;  %v8334_v24 = vld [vmem:[%s8510_s4 + $0x98] sm:$0xff] }
0x29fb   :  { %v5069_v27 = vpop.permute.xlu1 %5068 }
0x29fc   :  { %7301 = vpow2.f32 %v4908_v62  ;;  %v8345_v62 = vld [vmem:[%s8510_s4 + $0x68] sm:$0xff] }
0x29ff   :  { %v5067_v40 = vpop.permute.xlu1 %5066 }
0x2a09   :  { %v7302_v55 = vpop.eup %7301 }
0x2a0a   :  { %v4910_v56 = vsel %vm332_vm5, %v7302_v55, 0.0 }
0x2a0b   :  { %4911 = vadd.xlane.f32.xlu0 %v4910_v56 }
0x2a21   :  { %4916 = vrot.lane.b32.xlu0 %v8075_v21, %s7439_s16 }
0x2a94   :  { %v4912_v61 = vpop.xlane.xlu0 %4911 }
0x2a95   :  { %7303 = vrcp.f32 %v4912_v61 }
0x2a98   :  { %v4917_v33 = vpop.permute.xlu0 %4916 }
0x2a99   :  { %7070 = vmatpush3.msra.mxu1 %v4917_v33 }
0x2a9a   :  { %7079 = vmatprep.subr.mxu1 %v7427_v5 }
0x2aa2   :  { %v7304_v37 = vpop.eup %7303 }
0x2aa3   :  { %v4914_v28 = vmul.f32 %v7304_v37, %v7302_v55 }
0x2aa5   :  { %v4915_v30 = vsel %vm181_vm7, %v4914_v28, 0.0 }
0x2aa6   :  { %7072 = vmatmul.mubr.msk.f32.vlgmr.msra.gmra.mxu1 %vm332_vm5, %v4915_v30 }
0x2aa7   :  { %7080 = vmatpush3.xpose.msk.msra.mxu1 %vm332_vm5, %v5069_v27  ;;  %7081 = vmatprep.mubr.msk.f32.mxu1 %vm7428_vm4, %v7427_v5 }
0x2aa8   :  { %7089 = vmatprep.subr.mxu1 %v7427_v5 }
0x2aaa   :  { %7082 = vmatmul.mubr.msk.f32.vlgmr.msra.gmra.mxu1 %vm332_vm5, %v5067_v40  ;;  %v5348_v40 = vrot.slane %v8062_v9, %v7873_v51 }
0x2aab   :  { %7090 = vmatpush3.msra.mxu1 %v8224_v48  ;;  %7091 = vmatprep.mubr.msk.f32.mxu1 %vm7428_vm4, %v7427_v5 }
0x2b66   :  { %v4988_v2 = vpop.f32.mrf.mxu1 }
0x2b67   :  { %7077 = vmatmul.mubr.msk.f32.vlgmr.msra.gmra.mxu0 %vm332_vm5, %v4988_v2 }
0x2b68   :  { %v7073_v46 = vpop.f32.mrf.mxu1  ;;  %7086 = vmatprep.mubr.msk.f32.mxu0 %vm7428_vm4, %v7427_v5 }
0x2b6a   :  { %v5140_v47 = vpop.f32.mrf.mxu1 }
0x2b6b   :  { %v5144_v35 = vmul.f32 0.35355338, %v5140_v47 }
0x2b6c   :  { %v7083_v50 = vpop.f32.mrf.mxu1 }
0x2b6d   :  { %v5145_v49 = vsel %vm181_vm7, %v5144_v35, -1e+09  ;;  %v5354_v35 = vrot.slane %v8062_v9, %v7876_v52  ;;  %v7331_v9 = vld [vmem:[#allocation3 + $0x8] sm:$0xff] }
0x2b6e   :  { %v5146_v53 = vsel %vm332_vm5, %v5145_v49, -inf }
0x2b6f   :  { %5147 = vmax.xlane.f32.xlu0 %v5146_v53 }
0x2b85   :  { %5158 = vrot.lane.b32.xlu0 %v8075_v21, %s7440_s2  ;;  %v5319_v21 = vsel %vm204_vm3, %v8301_v0, 0.0 }
0x2b89   :  { %5456 = vrot.lane.b32.xlu0 %v8321_v44, %s7429_s26 }
0x2bf8   :  { %v5148_v48 = vpop.xlane.xlu0 %5147 }
0x2bf9   :  { %v5149_v14 = vsub.f32 %v5145_v49, %v5148_v48 }
0x2bfb   :  { %v5150_v12 = vmul.f32 1.442695, %v5149_v14 }
0x2bfc   :  { %v5159_v31 = vpop.permute.xlu0 %5158 }
0x2bfd   :  { %7305 = vpow2.f32 %v5150_v12  ;;  %7085 = vmatpush3.msra.mxu0 %v5159_v31 }
0x2bfe   :  { %7094 = vmatprep.subr.mxu0 %v8321_v44 }
0x2c00   :  { %v5457_v46 = vpop.permute.xlu0 %5456 }
0x2c01   :  { %7105 = vmatprep.subr.mxu1 %v5457_v46 }
0x2c0a   :  { %v7306_v58 = vpop.eup %7305 }
0x2c0b   :  { %v5152_v60 = vsel %vm332_vm5, %v7306_v58, 0.0 }
0x2c0c   :  { %5153 = vadd.xlane.f32.xlu1 %v5152_v60 }
0x2c10   :  { %5320 = vadd.xlane.f32.xlu1 %v5319_v21 }
0x2c27   :  { %v5061_v32 = vpop.f32.mrf.mxu0 }
0x2c28   :  { %v5065_v3 = vadd.f32 %v5061_v32, %v4821_v18 }
0x2c29   :  { %v7078_v4 = vpop.f32.mrf.mxu0 }
0x2c95   :  { %v5154_v23 = vpop.xlane.xlu1 %5153 }
0x2c96   :  { %7307 = vrcp.f32 %v5154_v23 }
0x2c99   :  { %v5321_v15 = vpop.xlane.xlu1 %5320 }
0x2c9a   :  { %v5325_v16 = vmul.f32 0.03125, %v5321_v15 }
0x2c9c   :  { %v5327_v34 = vsub.f32 %v8301_v0, %v5325_v16 }
0x2c9e   :  { %v5329_v20 = vmul.f32 %v5327_v34, %v5327_v34 }
0x2ca0   :  { %v5331_v22 = vsel %vm204_vm3, %v5329_v20, 0.0 }
0x2ca3   :  { %v7308_v29 = vpop.eup %7307 }
0x2ca4   :  { %v5156_v7 = vmul.f32 %v7308_v29, %v7306_v58 }
0x2ca6   :  { %v5157_v6 = vsel %vm181_vm7, %v5156_v7, 0.0 }
0x2ca7   :  { %7087 = vmatmul.mubr.msk.f32.vlgmr.msra.gmra.mxu0 %vm332_vm5, %v5157_v6 }
0x2ca8   :  { %7095 = vmatpush3.msra.mxu0 %v8321_v44 }
0x2ca9   :  { %7096 = vmatprep.subr.mxu0 %v8334_v24 }
0x2caa   :  { %7097 = vmatpush3.msra.mxu0 %v8334_v24 }
0x2d67   :  { %v5230_v63 = vpop.f32.mrf.mxu0 }
0x2d68   :  { %7092 = vmatmul.mubr.msk.f32.vlgmr.msra.gmra.mxu1 %vm332_vm5, %v5230_v63 }
0x2d69   :  { %v7088_v8 = vpop.f32.mrf.mxu0  ;;  %7113 = vmatprep.mubr.msk.f32.mxu1 %vm204_vm3, %v7330_v36  ;;  %7106 = vmatpush3.msra.mxu1 %v5457_v46 }
0x2e28   :  { %v5303_v10 = vpop.f32.mrf.mxu1 }
0x2e29   :  { %v5307_v11 = vadd.f32 %v5303_v10, %v5065_v3  ;;  %v8371_v3 = vld [vmem:[#allocation8 + $0x18] sm:$0xff] }
0x2e2a   :  { %v7093_v59 = vpop.f32.mrf.mxu1  ;;  %v5445_v4 = vrot.slane %v8371_v3, %v7873_v51  ;;  %v5360_v8 = vrot.slane %v8371_v3, %v7555_v43 }
0x2e2b   :  { %5308 = vst.msk [vmem:[#allocation2 + $0x8] sm:$0xff] %vm204_vm3, %v5307_v11 }
0x2e32   :  { %v5310_v18 = vld [vmem:[#allocation2 + $0x8] sm:$0xff] }
0x2e33   :  { %v5312_v17 = vadd.f32 %v5310_v18, %v8024_v38  ;;  %v8329_v38 = vld [vmem:[%s8510_s4 + $0x80] sm:$0xff] }
0x2e34   :  { %5452 = vrot.lane.b32.xlu0 %v8329_v38, %s7429_s26  ;;  %7098 = vmatprep.subr.mxu0 %v8329_v38 }
0x2e35   :  { %v8313_v19 = vadd.f32 %v5316_v25, %v5312_v17  ;;  %7099 = vmatpush3.msra.mxu0 %v8329_v38  ;;  %v7333_v25 = vld [vmem:[#allocation3 + $0x18] sm:$0xff] }
0x2e36   :  { %7100 = vmatprep.subr.mxu0 %v8345_v62 }
0x2e37   :  { %v5322_v39 = vsel %vm204_vm3, %v8313_v19, 0.0  ;;  %7101 = vmatpush3.msra.mxu0 %v8345_v62 }
0x2e38   :  { %5323 = vadd.xlane.f32.xlu1 %v5322_v39  ;;  %5450 = vrot.lane.b32.xlu0 %v8345_v62, %s7429_s26 }
0x2e39   :  { %7119 = vmatprep.subr.mxu0 %v7427_v5 }
0x2e3c   :  { %5332 = vadd.xlane.f32.xlu1 %v5331_v22 }
0x2ea6   :  { %v5453_v48 = vpop.permute.xlu0 %5452 }
0x2eaa   :  { %v5451_v54 = vpop.permute.xlu0 %5450 }
0x2ec1   :  { %v5324_v55 = vpop.xlane.xlu1 %5323 }
0x2ec2   :  { %v5326_v56 = vmul.f32 0.03125, %v5324_v55 }
0x2ec4   :  { %v5328_v61 = vsub.f32 %v8313_v19, %v5326_v56 }
0x2ec5   :  { %v5333_v33 = vpop.xlane.xlu1 %5332 }
0x2ec6   :  { %v5337_v37 = vmul.f32 0.03125, %v5333_v33  ;;  %v5330_v27 = vmul.f32 %v5328_v61, %v5328_v61 }
0x2ec8   :  { %v5339_v28 = vadd.f32 1e-12, %v5337_v37  ;;  %v5334_v30 = vsel %vm204_vm3, %v5330_v27, 0.0 }
0x2ec9   :  { %5335 = vadd.xlane.f32.xlu1 %v5334_v30 }
0x2eca   :  { %7309 = vrsqrt.f32 %v5339_v28 }
0x2ed7   :  { %v7310_v2 = vpop.eup %7309 }
0x2ed8   :  { %v5343_v47 = vmul.f32 %v7310_v2, %v5327_v34 }
0x2eda   :  { %v5349_v50 = vmul.f32 %v5348_v40, %v5343_v47  ;;  %5454 = vrot.lane.b32.xlu1 %v8334_v24, %s7429_s26 }
0x2edc   :  { %v5355_v49 = vadd.f32 %v5354_v35, %v5349_v50 }
0x2ede   :  { %7102 = vmatprep.mubr.msk.f32.mxu0 %vm204_vm3, %v5355_v49 }
0x2f52   :  { %v5336_v53 = vpop.xlane.xlu1 %5335 }
0x2f53   :  { %v5338_v14 = vmul.f32 0.03125, %v5336_v53 }
0x2f55   :  { %v5340_v12 = vadd.f32 1e-12, %v5338_v14 }
0x2f56   :  { %v5455_v31 = vpop.permute.xlu1 %5454 }
0x2f57   :  { %7311 = vrsqrt.f32 %v5340_v12  ;;  %7107 = vmatprep.subr.mxu1 %v5455_v31 }
0x2f58   :  { %7108 = vmatpush3.msra.mxu1 %v5455_v31 }
0x2f59   :  { %7109 = vmatprep.subr.mxu1 %v5453_v48 }
0x2f5a   :  { %7110 = vmatpush3.msra.mxu1 %v5453_v48 }
0x2f5b   :  { %7111 = vmatprep.subr.mxu1 %v5451_v54 }
0x2f5c   :  { %7112 = vmatpush3.msra.mxu1 %v5451_v54 }
0x2f5d   :  { %7114 = vmatmul.mubr.msk.f32.vlgmr.msra.gmra.mxu1 %vm204_vm3, %v7331_v9  ;;  %7126 = vmatprep.subr.mxu1 %v7427_v5 }
0x2f5e   :  { %7116 = vmatprep.mubr.msk.f32.mxu1 %vm204_vm3, %v7332_v57 }
0x2f61   :  { %7117 = vmatmul.mubr.msk.f32.gmra.mxu1 %vm204_vm3, %v7333_v25 }
0x2f62   :  { %7130 = vmatprep.mubr.msk.f32.mxu1 %vm7428_vm4, %v7427_v5 }
0x2f64   :  { %v7312_v58 = vpop.eup %7311 }
0x2f65   :  { %v5344_v60 = vmul.f32 %v7312_v58, %v5328_v61 }
0x2f67   :  { %v5350_v21 = vmul.f32 %v5348_v40, %v5344_v60 }
0x2f69   :  { %v5356_v32 = vadd.f32 %v5354_v35, %v5350_v21 }
0x2f6b   :  { %7103 = vmatmul.mubr.msk.f32.vlgmr.msra.gmra.mxu0 %vm204_vm3, %v5356_v32 }
0x2f6c   :  { %7123 = vmatprep.mubr.msk.f32.mxu0 %vm7428_vm4, %v7427_v5 }
0x301d   :  { %v7115_v23 = vpop.f32.mrf.mxu1 }
0x301e   :  { %v5534_v29 = vadd.f32 %v7115_v23, %v5445_v4 }
0x301f   :  { %v5528_v7 = vpop.f32.mrf.mxu1 }
0x3020   :  { %7120 = vmatpush3.xpose.msk.msra.mxu0 %vm204_vm3, %v5534_v29  ;;  %v5529_v6 = vadd.f32 %v5528_v7, %v5445_v4 }
0x3021   :  { %7121 = vmatprep.subr.mxu0 %v7427_v5  ;;  %v7118_v36 = vpop.f32.mrf.mxu1 }
0x3022   :  { %v5544_v10 = vadd.f32 %v7118_v36, %v5445_v4 }
0x3023   :  { %v5538_v59 = vpop.f32.mrf.mxu1 }
0x3024   :  { %7122 = vmatpush3.xpose.msk.msra.mxu0 %vm204_vm3, %v5529_v6  ;;  %v5539_v15 = vadd.f32 %v5538_v59, %v5445_v4 }
0x3025   :  { %7133 = vmatprep.subr.mxu0 %v7427_v5 }
0x302b   :  { %v7104_v63 = vpop.f32.mrf.mxu0 }
0x302c   :  { %v5439_v16 = vadd.f32 %v7104_v63, %v5360_v8 }
0x302d   :  { %v5433_v11 = vpop.f32.mrf.mxu0 }
0x302e   :  { %v5434_v51 = vadd.f32 %v5433_v11, %v5360_v8  ;;  %v6013_v8 = vrot.slane %v8371_v3, %v7954_v26 }
0x3030   :  { %7124 = vmatmul.mubr.msk.f32.vlgmr.msra.gmra.mxu0 %vm204_vm3, %v5434_v51 }
0x3031   :  { %7134 = vmatpush3.xpose.msk.msra.mxu0 %vm204_vm3, %v5544_v10  ;;  %7137 = vmatprep.mubr.msk.f32.mxu0 %vm7428_vm4, %v7427_v5 }
0x3032   :  { %7135 = vmatprep.subr.mxu0 %v7427_v5 }
0x3035   :  { %7136 = vmatpush3.xpose.msk.msra.mxu0 %vm204_vm3, %v5539_v15 }
0x3038   :  { %7138 = vmatmul.mubr.msk.f32.vlgmr.msra.gmra.mxu0 %vm204_vm3, %v5439_v16 }
0x30f0   :  { %v5622_v43 = vpop.f32.mrf.mxu0 }
0x30f1   :  { %v5626_v18 = vmul.f32 0.17677669, %v5622_v43 }
0x30f2   :  { %v7125_v34 = vpop.f32.mrf.mxu0 }
0x30f3   :  { %5628 = vrot.lane.b32.xlu0 %v5626_v18, %s7424_s30 }
0x30f8   :  { %v5805_v17 = vpop.f32.mrf.mxu0 }
0x30f9   :  { %v5809_v39 = vmul.f32 0.17677669, %v5805_v17 }
0x30fa   :  { %v7139_v20 = vpop.f32.mrf.mxu0 }
0x30fb   :  { %5811 = vrot.lane.b32.xlu0 %v5809_v39, %s7424_s30 }
0x3165   :  { %v5629_v22 = vpop.permute.xlu0 %5628 }
0x3166   :  { %v5631_v55 = vsel %vm180_vm6, %v5629_v22, -1e+09 }
0x3167   :  { %v5632_v56 = vsel %vm2613_vm8, %v5631_v55, -inf }
0x3168   :  { %5633 = vmax.xlane.f32.xlu1 %v5632_v56 }
0x316d   :  { %v5812_v61 = vpop.permute.xlu0 %5811 }
0x316e   :  { %v5814_v33 = vsel %vm181_vm7, %v5812_v61, -1e+09  ;;  %v6449_v61 = vld [vmem:[%s8510_s4 + $0xb8] sm:$0xff] }
0x316f   :  { %v5815_v37 = vsel %vm2613_vm8, %v5814_v33, -inf  ;;  %7158 = vmatprep.subr.mxu0 %v6449_v61 }
0x3170   :  { %5816 = vmax.xlane.f32.xlu0 %v5815_v37  ;;  %7159 = vmatpush3.msra.mxu0 %v6449_v61  ;;  %v6443_v37 = vld [vmem:[%s8510_s4 + $0x88] sm:$0xff] }
0x31f1   :  { %v5634_v27 = vpop.xlane.xlu1 %5633 }
0x31f2   :  { %v5635_v28 = vsub.f32 %v5631_v55, %v5634_v27  ;;  %v6440_v27 = vld [vmem:[%s8510_s4 + $0x70] sm:$0xff] }
0x31f4   :  { %v5636_v30 = vmul.f32 1.442695, %v5635_v28  ;;  %v6457_v28 = vld [vmem:[%s8511_s5 + $0x78] sm:$0xff] }
0x31f6   :  { %7313 = vpow2.f32 %v5636_v30  ;;  %v6456_v30 = vld [vmem:[%s8511_s5 + $0x70] sm:$0xff] }
0x31f9   :  { %v5817_v40 = vpop.xlane.xlu0 %5816 }
0x31fa   :  { %v5818_v2 = vsub.f32 %v5814_v33, %v5817_v40  ;;  %v6446_v33 = vld [vmem:[%s8510_s4 + $0xa0] sm:$0xff]  ;;  %v6455_v40 = vld [vmem:[%s8511_s5 + $0x68] sm:$0xff] }
0x31fb   :  { %7160 = vmatprep.subr.mxu0 %v6446_v33 }
0x31fc   :  { %v5819_v46 = vmul.f32 1.442695, %v5818_v2  ;;  %7161 = vmatpush3.msra.mxu0 %v6446_v33  ;;  %v6454_v2 = vld [vmem:[%s8511_s5 + $0x60] sm:$0xff] }
0x31fd   :  { %7162 = vmatprep.subr.mxu0 %v6443_v37 }
0x31fe   :  { %7315 = vpow2.f32 %v5819_v46  ;;  %7163 = vmatpush3.msra.mxu0 %v6443_v37  ;;  %v6512_v37 = vld [vmem:[#allocation6 + $0x20] ss:$0 sm:$0xff] }
0x31ff   :  { %7164 = vmatprep.subr.mxu0 %v6440_v27 }
0x3200   :  { %7165 = vmatpush3.msra.mxu0 %v6440_v27 }
0x3203   :  { %v7314_v47 = vpop.eup %7313 }
0x3204   :  { %5639 = vrot.lane.b32.xlu0 %v7314_v47, %s7431_s28 }
0x320b   :  { %v7316_v35 = vpop.eup %7315 }
0x320c   :  { %5822 = vrot.lane.b32.xlu1 %v7316_v35, %s7431_s28 }
0x3276   :  { %v5640_v50 = vpop.permute.xlu0 %5639 }
0x3277   :  { %v5642_v49 = vsel %vm88_vm0, %v5640_v50, 0.0 }
0x3278   :  { %5643 = vadd.xlane.f32.xlu1 %v5642_v49 }
0x327e   :  { %v5823_v53 = vpop.permute.xlu1 %5822 }
0x327f   :  { %v5825_v48 = vsel %vm88_vm0, %v5823_v53, 0.0 }
0x3280   :  { %5826 = vadd.xlane.f32.xlu0 %v5825_v48 }
0x3289   :  { %5651 = vrot.lane.b32.xlu1 %v5529_v6, %s7429_s26 }
0x3296   :  { %5653 = vrot.lane.b32.xlu0 %v5534_v29, %s7429_s26 }
0x329a   :  { %5836 = vrot.lane.b32.xlu0 %v5544_v10, %s7429_s26 }
0x3301   :  { %v5644_v14 = vpop.xlane.xlu1 %5643 }
0x3302   :  { %7317 = vrcp.f32 %v5644_v14  ;;  %v7334_v14 = vld [vmem:[#allocation8 + $0x10] sm:$0xff] }
0x3305   :  { %v5652_v9 = vpop.permute.xlu1 %5651 }
0x3309   :  { %v5827_v12 = vpop.xlane.xlu0 %5826 }
0x330a   :  { %7319 = vrcp.f32 %v5827_v12  ;;  %v6045_v12 = vrot.slane %v7334_v14, %v7954_v26  ;;  %v6452_v26 = vld [vmem:[%s8511_s5 + $0x50] sm:$0xff] }
0x330d   :  { %v5654_v31 = vpop.permute.xlu0 %5653 }
0x330e   :  { %7127 = vmatpush3.msra.mxu1 %v5654_v31 }
0x330f   :  { %v7318_v54 = vpop.eup %7317  ;;  %7128 = vmatprep.subr.mxu1 %v7427_v5 }
0x3310   :  { %7129 = vmatpush3.msra.mxu1 %v5652_v9  ;;  %v5646_v57 = vmul.f32 %v7318_v54, %v7314_v47 }
0x3311   :  { %7140 = vmatprep.subr.mxu1 %v7427_v5  ;;  %v5837_v32 = vpop.permute.xlu0 %5836 }
0x3312   :  { %v5647_v25 = vsel %vm180_vm6, %v5646_v57, 0.0 }
0x3313   :  { %5649 = vrot.lane.b32.xlu1 %v5647_v25, %s7431_s28  ;;  %v6051_v25 = vrot.slane %v7334_v14, %v3032_v13  ;;  %v6450_v13 = vld [vmem:[%s8511_s5 + $0x40] sm:$0xff] }
0x3317   :  { %v7320_v58 = vpop.eup %7319  ;;  %5834 = vrot.lane.b32.xlu1 %v5539_v15, %s7429_s26 }
0x3318   :  { %v5829_v60 = vmul.f32 %v7320_v58, %v7316_v35 }
0x331a   :  { %v5830_v21 = vsel %vm181_vm7, %v5829_v60, 0.0 }
0x331b   :  { %5832 = vrot.lane.b32.xlu0 %v5830_v21, %s7431_s28  ;;  %5921 = vrot.lane.b32.xlu1 %v8321_v44, %s7435_s13 }
0x331f   :  { %5919 = vrot.lane.b32.xlu0 %v8334_v24, %s7435_s13  ;;  %5917 = vrot.lane.b32.xlu1 %v8329_v38, %s7435_s13 }
0x3323   :  { %5915 = vrot.lane.b32.xlu0 %v8345_v62, %s7435_s13 }
0x3385   :  { %v5650_v1 = vpop.permute.xlu1 %5649 }
0x3386   :  { %7131 = vmatmul.mubr.msk.f32.vlgmr.msra.gmra.mxu1 %vm88_vm0, %v5650_v1  ;;  %v6453_v1 = vld [vmem:[%s8511_s5 + $0x58] sm:$0xff]  ;;  %s7441_s5 = smov [#allocation9]  }
0x3387   :  { %7141 = vmatpush3.msra.mxu1 %v5837_v32  ;;  %7144 = vmatprep.mubr.msk.f32.mxu1 %vm7428_vm4, %v7427_v5  ;;  %v6057_v32 = vrot.slane %v8371_v3, %v7560_v45  ;;  %s6367_s15 = sshll.u32 %s7441_s5, 4  ;;  %s6368_s15 = int_to_ptr.vmem [resolvable:$true] %s6367_s15 }
0x3388   :  { %7142 = vmatprep.subr.mxu1 %v7427_v5  ;;  %s7395_s3 = scalar_lea.vmem %s6368_s15, 256  ;;  %p7400_p2 = scmp.lt.s32.totalorder %s6368_s15, %s6368_s15 }
0x3389   :  { %v5835_v41 = vpop.permute.xlu1 %5834  ;;  %p7396_p1 = scmp.ne.s32.totalorder %s6368_s15, %s7395_s3  ;;  %p7401_p3 = scmp.lt.s32.totalorder %s7395_s3, %s7395_s3 }
0x338a   :  { %7143 = vmatpush3.msra.mxu1 %v5835_v41 }
0x338b   :  { %p7402_p4 = por %p7401_p3, %p7400_p2 }
0x338d   :  { %v5833_v44 = vpop.permute.xlu0 %5832  ;;  %v5922_v24 = vpop.permute.xlu1 %5921  ;;  %p7403_p5 = pnand %p7402_p4, %p7396_p1 }
0x338e   :  { %7145 = vmatmul.mubr.msk.f32.vlgmr.msra.gmra.mxu1 %vm88_vm0, %v5833_v44  ;;  %7147 = vmatprep.subr.mxu1 %v5922_v24 }
0x338f   :  { %7148 = vmatpush3.msra.mxu1 %v5922_v24 }
0x3391   :  { %v5920_v38 = vpop.permute.xlu0 %5919  ;;  %v5918_v62 = vpop.permute.xlu1 %5917 }
0x3392   :  { %7149 = vmatprep.subr.mxu1 %v5920_v38 }
0x3393   :  { %7150 = vmatpush3.msra.mxu1 %v5920_v38 }
0x3394   :  { %7151 = vmatprep.subr.mxu1 %v5918_v62 }
0x3395   :  { %7152 = vmatpush3.msra.mxu1 %v5918_v62  ;;  %v5916_v4 = vpop.permute.xlu0 %5915 }
0x3396   :  { %7153 = vmatprep.subr.mxu1 %v5916_v4 }
0x3397   :  { %7154 = vmatpush3.msra.mxu1 %v5916_v4 }
0x3398   :  { %7169 = vmatprep.subr.mxu1 %v6457_v28 }
0x3446   :  { %v5725_v23 = vpop.f32.mrf.mxu1 }
0x3447   :  { %5729 = vst.msk [vmem:[#allocation2] sm:$0xff] %vm204_vm3, %v5725_v23  ;;  %v6227_v23 = vrot.slane %v8371_v3, %v7876_v52 }
0x3448   :  { %v7132_v5 = vpop.f32.mrf.mxu1 }
0x344e   :  { %v5908_v29 = vpop.f32.mrf.mxu1  ;;  %v5913_v7 = vld [vmem:[#allocation2] sm:$0xff] }
0x344f   :  { %5912 = vst.msk [vmem:[#allocation2 + $0x8] sm:$0xff] %vm204_vm3, %v5908_v29  ;;  %7155 = vmatprep.mubr.msk.f32.mxu1 %vm204_vm3, %v5913_v7 }
0x3450   :  { %v7146_v6 = vpop.f32.mrf.mxu1 }
0x3456   :  { %v5914_v63 = vld [vmem:[#allocation2 + $0x8] sm:$0xff] }
0x3457   :  { %7156 = vmatmul.mubr.msk.f32.vlgmr.msra.gmra.mxu1 %vm204_vm3, %v5914_v63 }
0x3458   :  { %7170 = vmatpush3.msra.mxu1 %v6457_v28 }
0x3459   :  { %7171 = vmatprep.subr.mxu1 %v6456_v30 }
0x345a   :  { %7172 = vmatpush3.msra.mxu1 %v6456_v30 }
0x345b   :  { %7173 = vmatprep.subr.mxu1 %v6455_v40 }
0x345c   :  { %7174 = vmatpush3.msra.mxu1 %v6455_v40 }
0x345d   :  { %7175 = vmatprep.subr.mxu1 %v6454_v2 }
0x345e   :  { %7176 = vmatpush3.msra.mxu1 %v6454_v2  ;;  %v6513_v2 = vld [vmem:[#allocation6 + $0x21] ss:$0 sm:$0xff] }
0x345f   :  { %7177 = vmatprep.subr.mxu1 %v6453_v1 }
0x3460   :  { %7178 = vmatpush3.msra.mxu1 %v6453_v1 }
0x3461   :  { %7179 = vmatprep.subr.mxu1 %v6452_v26 }
0x3462   :  { %7180 = vmatpush3.msra.mxu1 %v6452_v26 }
0x3463   :  { %7181 = vmatprep.subr.mxu1 %v6451_v42 }
0x3464   :  { %7182 = vmatpush3.msra.mxu1 %v6451_v42 }
0x3465   :  { %7183 = vmatprep.subr.mxu1 %v6450_v13 }
0x3466   :  { %7184 = vmatpush3.msra.mxu1 %v6450_v13 }
0x3517   :  { %v7157_v36 = vpop.f32.mrf.mxu1 }
0x3518   :  { %v6009_v10 = vadd.f32 %v7157_v36, %v8313_v19 }
0x3519   :  { %v5999_v11 = vpop.f32.mrf.mxu1 }
0x351a   :  { %v8432_v51 = vadd.f32 %v6013_v8, %v6009_v10  ;;  %v6008_v59 = vadd.f32 %v5999_v11, %v8301_v0 }
0x351c   :  { %v8435_v15 = vadd.f32 %v6013_v8, %v6008_v59  ;;  %v6019_v16 = vsel %vm204_vm3, %v8432_v51, 0.0 }
0x351d   :  { %6020 = vadd.xlane.f32.xlu0 %v6019_v16 }
0x351e   :  { %v6016_v43 = vsel %vm204_vm3, %v8435_v15, 0.0 }
0x351f   :  { %6017 = vadd.xlane.f32.xlu1 %v6016_v43 }
0x35a6   :  { %v6021_v18 = vpop.xlane.xlu0 %6020 }
0x35a7   :  { %v6023_v34 = vmul.f32 0.03125, %v6021_v18 }
0x35a8   :  { %v6018_v17 = vpop.xlane.xlu1 %6017 }
0x35a9   :  { %v6025_v19 = vsub.f32 %v8432_v51, %v6023_v34  ;;  %v6022_v39 = vmul.f32 0.03125, %v6018_v17  ;;  %v6273_v34 = vld [vmem:[#allocation6 + $0x3a] sm:$0xff]  ;;  %v6272_v17 = vld [vmem:[#allocation6 + $0x32] sm:$0xff] }
0x35aa   :  { %7188 = vmatprep.subr.mxu0 %v6273_v34 }
0x35ab   :  { %v6024_v20 = vsub.f32 %v8435_v15, %v6022_v39  ;;  %v6027_v22 = vmul.f32 %v6025_v19, %v6025_v19  ;;  %v6270_v39 = vld [vmem:[#allocation6 + $0x22] sm:$0xff] }
0x35ad   :  { %v6031_v0 = vsel %vm204_vm3, %v6027_v22, 0.0  ;;  %v6026_v55 = vmul.f32 %v6024_v20, %v6024_v20 }
0x35ae   :  { %6032 = vadd.xlane.f32.xlu1 %v6031_v0 }
0x35af   :  { %v6028_v56 = vsel %vm204_vm3, %v6026_v55, 0.0 }
0x35b0   :  { %6029 = vadd.xlane.f32.xlu0 %v6028_v56 }
0x3637   :  { %v6033_v46 = vpop.xlane.xlu1 %6032 }
0x3638   :  { %v6035_v47 = vmul.f32 0.03125, %v6033_v46 }
0x3639   :  { %v6030_v35 = vpop.xlane.xlu0 %6029 }
0x363a   :  { %v6037_v50 = vadd.f32 1e-12, %v6035_v47  ;;  %v6034_v49 = vmul.f32 0.03125, %v6030_v35 }
0x363c   :  { %7321 = vrsqrt.f32 %v6037_v50  ;;  %v6036_v53 = vadd.f32 1e-12, %v6034_v49  ;;  %v6514_v50 = vld [vmem:[#allocation6 + $0x42] ss:$0 sm:$0xff] }
0x363e   :  { %7323 = vrsqrt.f32 %v6036_v53 }
0x3649   :  { %v7322_v48 = vpop.eup %7321 }
0x364a   :  { %v6041_v31 = vmul.f32 %v7322_v48, %v6025_v19  ;;  %v6271_v19 = vld [vmem:[#allocation6 + $0x2a] sm:$0xff] }
0x364b   :  { %v7324_v54 = vpop.eup %7323 }
0x364c   :  { %v6040_v9 = vmul.f32 %v7324_v54, %v6024_v20  ;;  %v6047_v57 = vmul.f32 %v6045_v12, %v6041_v31 }
0x364e   :  { %v6046_v58 = vmul.f32 %v6045_v12, %v6040_v9  ;;  %v6053_v21 = vadd.f32 %v6051_v25, %v6047_v57 }
0x3650   :  { %v6052_v60 = vadd.f32 %v6051_v25, %v6046_v58 }
0x3652   :  { %7166 = vmatprep.mubr.msk.f32.mxu0 %vm204_vm3, %v6052_v60 }
0x3653   :  { %7167 = vmatmul.mubr.msk.f32.vlgmr.msra.gmra.mxu0 %vm204_vm3, %v6053_v21 }
0x3654   :  { %7189 = vmatpush3.msra.mxu0 %v6273_v34 }
0x3655   :  { %7190 = vmatprep.subr.mxu0 %v6272_v17 }
0x3656   :  { %7191 = vmatpush3.msra.mxu0 %v6272_v17 }
0x3657   :  { %7192 = vmatprep.subr.mxu0 %v6271_v19 }
0x3658   :  { %7193 = vmatpush3.msra.mxu0 %v6271_v19 }
0x3659   :  { %7194 = vmatprep.subr.mxu0 %v6270_v39 }
0x365a   :  { %7195 = vmatpush3.msra.mxu0 %v6270_v39 }
0x3713   :  { %v7168_v41 = vpop.f32.mrf.mxu0 }
0x3714   :  { %v6136_v44 = vadd.f32 %v7168_v41, %v6057_v32 }
0x3715   :  { %v6130_v24 = vpop.f32.mrf.mxu0 }
0x3716   :  { %v6131_v38 = vadd.f32 %v6130_v24, %v6057_v32  ;;  %v6140_v4 = vmax.f32 %v6136_v44, 0.0 }
0x3718   :  { %v6139_v62 = vmax.f32 %v6131_v38, 0.0 }
0x371a   :  { %7185 = vmatprep.mubr.msk.f32.mxu1 %vm3123_vm9, %v6139_v62 }
0x371b   :  { %7186 = vmatmul.mubr.msk.f32.vlgmr.msra.gmra.mxu1 %vm3123_vm9, %v6140_v4 }
0x37db   :  { %v7187_v5 = vpop.f32.mrf.mxu1 }
0x37dc   :  { %v6223_v29 = vadd.f32 %v7187_v5, %v8432_v51 }
0x37dd   :  { %v6213_v7 = vpop.f32.mrf.mxu1 }
0x37de   :  { %v6229_v6 = vadd.f32 %v6227_v23, %v6223_v29  ;;  %v6222_v45 = vadd.f32 %v6213_v7, %v8435_v15 }
0x37e0   :  { %v6228_v63 = vadd.f32 %v6227_v23, %v6222_v45  ;;  %v6235_v8 = vsel %vm204_vm3, %v6229_v6, 0.0 }
0x37e1   :  { %6236 = vadd.xlane.f32.xlu1 %v6235_v8 }
0x37e2   :  { %v6232_v36 = vsel %vm204_vm3, %v6228_v63, 0.0 }
0x37e3   :  { %6233 = vadd.xlane.f32.xlu0 %v6232_v36 }
0x386a   :  { %v6237_v10 = vpop.xlane.xlu1 %6236 }
0x386b   :  { %v6239_v11 = vmul.f32 0.03125, %v6237_v10 }
0x386c   :  { %v6234_v59 = vpop.xlane.xlu0 %6233 }
0x386d   :  { %v6241_v16 = vsub.f32 %v6229_v6, %v6239_v11  ;;  %v6238_v43 = vmul.f32 0.03125, %v6234_v59 }
0x386f   :  { %v6240_v52 = vsub.f32 %v6228_v63, %v6238_v43  ;;  %v6243_v3 = vmul.f32 %v6241_v16, %v6241_v16 }
0x3871   :  { %v6247_v51 = vsel %vm204_vm3, %v6243_v3, 0.0  ;;  %v6242_v18 = vmul.f32 %v6240_v52, %v6240_v52 }
0x3872   :  { %6248 = vadd.xlane.f32.xlu1 %v6247_v51 }
0x3873   :  { %v6244_v15 = vsel %vm204_vm3, %v6242_v18, 0.0 }
0x3874   :  { %6245 = vadd.xlane.f32.xlu0 %v6244_v15 }
0x38fb   :  { %v6249_v20 = vpop.xlane.xlu1 %6248 }
0x38fc   :  { %v6251_v22 = vmul.f32 0.03125, %v6249_v20 }
0x38fd   :  { %v6246_v0 = vpop.xlane.xlu0 %6245 }
0x38fe   :  { %v6253_v55 = vadd.f32 1e-12, %v6251_v22  ;;  %v6250_v56 = vmul.f32 0.03125, %v6246_v0 }
0x3900   :  { %7325 = vrsqrt.f32 %v6253_v55  ;;  %v6252_v61 = vadd.f32 1e-12, %v6250_v56 }
0x3902   :  { %7327 = vrsqrt.f32 %v6252_v61 }
0x390d   :  { %v7326_v33 = vpop.eup %7325 }
0x390e   :  { %v6257_v27 = vmul.f32 %v7326_v33, %v6241_v16 }
0x390f   :  { %v7328_v28 = vpop.eup %7327 }
0x3910   :  { %v6256_v30 = vmul.f32 %v7328_v28, %v6240_v52  ;;  %v6263_v40 = vmul.f32 %v6512_v37, %v6257_v27 }
0x3912   :  { %v6262_v46 = vmul.f32 %v6512_v37, %v6256_v30  ;;  %v6269_v35 = vadd.f32 %v6513_v2, %v6263_v40 }
0x3914   :  { %v6268_v47 = vadd.f32 %v6513_v2, %v6262_v46 }
0x3916   :  { %7196 = vmatprep.mubr.msk.f32.mxu0 %vm204_vm3, %v6268_v47 }
0x3917   :  { %7197 = vmatmul.mubr.msk.f32.vlgmr.msra.gmra.mxu0 %vm204_vm3, %v6269_v35 }
0x39d7   :  { %v7198_v49 = vpop.f32.mrf.mxu0 }
0x39d8   :  { %v6357_v53 = vadd.f32 %v7198_v49, %v6514_v50 }
0x39d9   :  { %v6351_v48 = vpop.f32.mrf.mxu0 }
0x39da   :  { %6361 = vst [vmem:[#allocation9 + $0x8] sm:$0xff] %v6357_v53  ;;  %v6352_v14 = vadd.f32 %v6514_v50, %v6351_v48 }
0x39dc   :  { %6360 = vst [vmem:[#allocation9] sm:$0xff] %v6352_v14 }
0x39dd   :  { %7406 = shalt.err (!%p7403_p5)
}
0x39de   :  { %6373 = dma.vmem_to_hbm [thread:$0]  %s6368_s15, 256, %s8513_s7, [#allocation5], %s7423_s29, %s7423_s29, %s7424_s30  }
0x39df   :  { %7419 = dma.done.wait [#allocation5], 256  }
0x39e0   :  { %7420 = vsyncadd [#allocation5], 4294967040 }
0x39e1   :  { %6377 = vsyncpa [#allocation4], 1 }
0x39e2   :  { %6378 = vsyncpa [#allocation7], 1 }
0x39e3   :  { %6379 = vsyncpa [#allocation5], 1 }

</bundles_post_ra>
